<compile_context>
chip_gen: v5e
topology: v5e:2x2
jax: 0.10.0
libtpu: 0.0.40
codegen_flags: <defaults>
</compile_context>

<pallas_src>
import functools

import jax
import jax.numpy as jnp
from jax.experimental import pallas as pl
from jax.experimental.pallas import tpu as pltpu


# -----------------------------------------------------------------------------
# Wrapper-side glue (pure data movement)
# -----------------------------------------------------------------------------
def shift2d(x):
    """ShiftViT-style shift of 4 channel groups by 1 pixel, zero filled. NCHW."""
    B, C, H, W = x.shape
    g = C // 4
    g0 = jnp.concatenate(  # shift right along W
        [jnp.zeros_like(x[:, 0:g, :, :1]), x[:, 0:g, :, :-1]], axis=3)
    g1 = jnp.concatenate(  # shift left along W
        [x[:, g:2 * g, :, 1:], jnp.zeros_like(x[:, g:2 * g, :, :1])], axis=3)
    g2 = jnp.concatenate(  # shift down along H
        [jnp.zeros_like(x[:, 2 * g:3 * g, :1, :]), x[:, 2 * g:3 * g, :-1, :]], axis=2)
    g3 = jnp.concatenate(  # shift up along H
        [x[:, 3 * g:4 * g, 1:, :], jnp.zeros_like(x[:, 3 * g:4 * g, :1, :])], axis=2)
    rest = x[:, 4 * g:]
    return jnp.concatenate([g0, g1, g2, g3, rest], axis=1)


def window_partition(x_nchw, ws):
    """(B,C,H,W) -> (B*H/ws*W/ws, ws*ws, C). Used by the pure-JAX reference only."""
    B, C, H, W = x_nchw.shape
    x = jnp.transpose(x_nchw, (0, 2, 3, 1))
    x = x.reshape(B, H // ws, ws, W // ws, ws, C)
    x = jnp.transpose(x, (0, 1, 3, 2, 4, 5))
    return x.reshape(-1, ws * ws, C)


def window_reverse(win, ws, B, C, H, W):
    x = win.reshape(B, H // ws, W // ws, ws, ws, C)
    x = jnp.transpose(x, (0, 1, 3, 2, 4, 5)).reshape(B, H, W, C)
    return jnp.transpose(x, (0, 3, 1, 2))


def prepare_params(params, dim_head):
    """Fuse q|k|v into one wide weight (q pre-scaled), cast matmul weights to bf16."""
    scale = dim_head ** -0.5
    wqkv = jnp.concatenate(
        [params["wq"] * scale, params["wk"], params["wv"]], axis=1
    ).astype(jnp.bfloat16)
    return {
        "wqkv": wqkv,
        "wff": params["wff"].astype(jnp.bfloat16),
        "wao": params["wao"].astype(jnp.bfloat16),
        "wfo": params["wfo"].astype(jnp.bfloat16),
        "lnw": params["lnw"].astype(jnp.float32),
    }


# -----------------------------------------------------------------------------
# Pallas kernel: WB windows (stacked along H) per grid step.
#   xs_ref : (1, WB*ws, ws, C) shifted activations (f32, cast to bf16 in-kernel)
#   weights: bf16 fused projections; lnw f32 (1, C)
#   o_ref  : (1, WB*ws, ws, C) f32 = Norm(AttnFF(Shift(x))) for this block
# -----------------------------------------------------------------------------
def _fused_block_kernel(xs_ref, wqkv_ref, wff_ref, wao_ref, wfo_ref, lnw_ref,
                        o_ref, *, heads, dim_head, wb, ws, eps):
    S = ws * ws
    C = o_ref.shape[-1]
    inner = heads * dim_head
    M = wb * S

    # (WB*ws, ws, C) -> (M, C): layout-trivial merge; bf16 only at MXU inputs.
    x = xs_ref[0].reshape(M, C).astype(jnp.bfloat16)

    # Fused qkv projection (q already scaled in the weight) + FF projection.
    qkv = jnp.dot(x, wqkv_ref[...], preferred_element_type=jnp.float32)   # (M, 3*inner)
    ff = jnp.dot(x, wff_ref[...], preferred_element_type=jnp.float32)     # (M, dim_ff)

    q = qkv[:, :inner].reshape(wb, S, inner)
    k = qkv[:, inner:2 * inner].reshape(wb, S, inner)
    v = qkv[:, 2 * inner:3 * inner].reshape(wb, S, inner)

    # Windowed multi-head attention, accumulating each head straight into the
    # output projection (no lane-axis concat of head outputs).
    out = jnp.zeros((M, C), jnp.float32)
    for h in range(heads):
        sl = slice(h * dim_head, (h + 1) * dim_head)
        qh = q[:, :, sl].astype(jnp.bfloat16)
        kh = k[:, :, sl].astype(jnp.bfloat16)
        vh = v[:, :, sl].astype(jnp.bfloat16)
        s = jnp.einsum("wqd,wkd->wqk", qh, kh,
                       preferred_element_type=jnp.float32)                # (wb,S,S)
        s = s - jnp.max(s, axis=-1, keepdims=True)
        p = jnp.exp(s)
        denom = jnp.sum(p, axis=-1, keepdims=True)
        p = p * pl.reciprocal(denom, approx=True)                         # EUP slot
        oh = jnp.einsum("wqk,wkd->wqd", p.astype(jnp.bfloat16), vh,
                        preferred_element_type=jnp.float32)               # (wb,S,dh)
        out = out + jnp.dot(oh.reshape(M, dim_head).astype(jnp.bfloat16),
                            wao_ref[sl, :],
                            preferred_element_type=jnp.float32)

    # FF branch. TODO(synk): torch nn.GELU default is exact erf; tanh approx used.
    ff_act = jax.nn.gelu(ff, approximate=True)
    out = out + jnp.dot(ff_act.astype(jnp.bfloat16), wfo_ref[...],
                        preferred_element_type=jnp.float32)

    # LayerNormNoBias2d: normalize over channels per pixel, weight only (f32).
    mu = jnp.mean(out, axis=-1, keepdims=True)
    ctr = out - mu
    var = jnp.mean(ctr * ctr, axis=-1, keepdims=True)
    y = ctr * jax.lax.rsqrt(var + eps) * lnw_ref[...]

    o_ref[0] = y.reshape(wb * ws, ws, C)


# -----------------------------------------------------------------------------
# Wrapper
# -----------------------------------------------------------------------------
def fused_s2vit_block(x, params, *, dim_head=32, window_size=8, eps=1e-5,
                      max_rows_per_block=1024):
    B, C, H, W = x.shape
    ws = window_size
    assert H % ws == 0 and W % ws == 0 and C % dim_head == 0 and C % 4 == 0
    heads = C // dim_head
    inner = heads * dim_head
    S = ws * ws
    hn, wn = H // ws, W // ws

    # WB windows stacked along H per grid step (largest divisor of hn that keeps
    # the projection M dim <= max_rows_per_block -> bounded VMEM on v7x).
    wb = 1
    for d in range(1, hn + 1):
        if hn % d == 0 and d * S <= max_rows_per_block:
            wb = d

    prep = prepare_params(params, dim_head)
    dim_ff = prep["wff"].shape[1]

    # Shift + channels-last. Windows are cut by BlockSpec (no extra HBM copies).
    xs_nhwc = jnp.transpose(shift2d(x), (0, 2, 3, 1))

    kern = functools.partial(_fused_block_kernel, heads=heads,
                             dim_head=dim_head, wb=wb, ws=ws, eps=eps)

    def wspec(a):
        return pl.BlockSpec(a.shape, lambda b, i, j: (0,) * a.ndim)

    io_spec = pl.BlockSpec((1, wb * ws, ws, C), lambda b, i, j: (b, i, j, 0))
    grid = (B, hn // wb, wn)

    nw = B * hn * wn
    n_pix = B * H * W
    flops = (2 * n_pix * (C * (3 * inner + dim_ff) + inner * C + dim_ff * C)
             + 4 * nw * heads * S * S * dim_head)
    transcendentals = n_pix * dim_ff + nw * heads * S * S
    bytes_accessed = (n_pix * C * 8
                      + 2 * (prep["wqkv"].size + prep["wff"].size
                             + prep["wao"].size + prep["wfo"].size)
                      + 4 * C)

    y_nhwc = pl.pallas_call(
        kern,
        out_shape=jax.ShapeDtypeStruct((B, H, W, C), jnp.float32),
        grid=grid,
        in_specs=[io_spec, wspec(prep["wqkv"]), wspec(prep["wff"]),
                  wspec(prep["wao"]), wspec(prep["wfo"]), wspec(prep["lnw"])],
        out_specs=io_spec,
        compiler_params=pltpu.CompilerParams(
            dimension_semantics=("parallel", "parallel", "parallel"),
            vmem_limit_bytes=48 * 1024 * 1024),
        cost_estimate=pl.CostEstimate(flops=int(flops),
                                      transcendentals=int(transcendentals),
                                      bytes_accessed=int(bytes_accessed)),
    )(xs_nhwc, prep["wqkv"], prep["wff"], prep["wao"], prep["wfo"], prep["lnw"])

    # Residual add; DropBlock2d(p=0) is identity. XLA fuses this with the transpose.
    return x + jnp.transpose(y_nhwc, (0, 3, 1, 2))


# -----------------------------------------------------------------------------
# Pure-JAX reference (same math, same bf16 matmul inputs) for correctness check
# -----------------------------------------------------------------------------
def reference(x, params, *, dim_head=32, window_size=8, eps=1e-5):
    B, C, H, W = x.shape
    ws = window_size
    heads = C // dim_head
    inner = heads * dim_head
    S = ws * ws
    prep = prepare_params(params, dim_head)

    xw = window_partition(shift2d(x), ws)                    # (NW, S, C)
    NW = xw.shape[0]
    M = NW * S
    xb = xw.reshape(M, C).astype(jnp.bfloat16)

    qkv = jnp.dot(xb, prep["wqkv"], preferred_element_type=jnp.float32)
    ff = jnp.dot(xb, prep["wff"], preferred_element_type=jnp.float32)
    q = qkv[:, :inner].reshape(NW, S, inner)
    k = qkv[:, inner:2 * inner].reshape(NW, S, inner)
    v = qkv[:, 2 * inner:].reshape(NW, S, inner)

    out = jnp.zeros((M, C), jnp.float32)
    for h in range(heads):
        sl = slice(h * dim_head, (h + 1) * dim_head)
        qh = q[:, :, sl].astype(jnp.bfloat16)
        kh = k[:, :, sl].astype(jnp.bfloat16)
        vh = v[:, :, sl].astype(jnp.bfloat16)
        s = jnp.einsum("wqd,wkd->wqk", qh, kh, preferred_element_type=jnp.float32)
        p = jax.nn.softmax(s, axis=-1)
        oh = jnp.einsum("wqk,wkd->wqd", p.astype(jnp.bfloat16), vh,
                        preferred_element_type=jnp.float32)
        out = out + jnp.dot(oh.reshape(M, dim_head).astype(jnp.bfloat16),
                            prep["wao"][sl, :], preferred_element_type=jnp.float32)

    out = out + jnp.dot(jax.nn.gelu(ff, approximate=True).astype(jnp.bfloat16),
                        prep["wfo"], preferred_element_type=jnp.float32)
    mu = out.mean(-1, keepdims=True)
    var = ((out - mu) ** 2).mean(-1, keepdims=True)
    y = (out - mu) * jax.lax.rsqrt(var + eps) * prep["lnw"]
    y = y.reshape(NW, S, C)
    return x + window_reverse(y, ws, B, C, H, W)


# -----------------------------------------------------------------------------
def make_params(key, dim, dim_head, dim_ff):
    heads = dim // dim_head
    inner = heads * dim_head
    ks = jax.random.split(key, 7)
    f32 = jnp.float32
    return {
        "wq": jax.random.normal(ks[0], (dim, inner), f32) * dim ** -0.5,
        "wk": jax.random.normal(ks[1], (dim, inner), f32) * dim ** -0.5,
        "wv": jax.random.normal(ks[2], (dim, inner), f32) * dim ** -0.5,
        "wff": jax.random.normal(ks[3], (dim, dim_ff), f32) * dim ** -0.5,
        "wao": jax.random.normal(ks[4], (inner, dim), f32) * inner ** -0.5,
        "wfo": jax.random.normal(ks[5], (dim_ff, dim), f32) * dim_ff ** -0.5,
        "lnw": (jnp.ones((1, dim), f32)
                + 0.05 * jax.random.normal(ks[6], (1, dim), f32)),
    }


if __name__ == "__main__":
    # dim=128 (lane-dense channels), heads = 128//32 = 4, 2x2x2 = 8 windows.
    B, C, H, W = 2, 128, 16, 16
    dim_head, window_size = 32, 8
    dim_ff = 4 * C                       # dim_ff=None -> 4*dim

    key = jax.random.PRNGKey(0)
    kx, kp = jax.random.split(key)
    x = jax.random.normal(kx, (B, C, H, W), dtype=jnp.float32)
    params = make_params(kp, C, dim_head, dim_ff)

    out = jax.block_until_ready(
        fused_s2vit_block(x, params, dim_head=dim_head, window_size=window_size))
    ref = jax.block_until_ready(
        reference(x, params, dim_head=dim_head, window_size=window_size))

    assert out.shape == x.shape and out.dtype == jnp.float32
    err = float(jnp.max(jnp.abs(out - ref)))
    assert jnp.allclose(out, ref, atol=2e-2, rtol=2e-2), err

    print("KERNEL_OK")
</pallas_src>

<mosaic_0001>
module attributes {stable_mosaic.version = 11 : i64} {
  func.func @_fused_block_kernel(%arg0: i32, %arg1: i32, %arg2: i32, %arg3: memref<1x16x8x128xf32, #tpu.memory_space<vmem>>, %arg4: memref<128x384xbf16, #tpu.memory_space<vmem>>, %arg5: memref<128x512xbf16, #tpu.memory_space<vmem>>, %arg6: memref<128x128xbf16, #tpu.memory_space<vmem>>, %arg7: memref<512x128xbf16, #tpu.memory_space<vmem>>, %arg8: memref<1x128xf32, #tpu.memory_space<vmem>>, %arg9: memref<1x16x8x128xf32, #tpu.memory_space<vmem>>) attributes {dimension_semantics = [#tpu.dimension_semantics<parallel>, #tpu.dimension_semantics<parallel>, #tpu.dimension_semantics<parallel>], iteration_bounds = array<i64: 2, 1, 2>, scalar_prefetch = 0 : i64, scratch_operands = 0 : i64, tpu.core_type = #tpu.core_type<tc>, window_params = [{transform_indices = @transform_0, window_bounds = array<i64: 1, 16, 8, 128>}, {pipeline_mode = #tpu.pipeline_mode<synchronous>, transform_indices = @transform_1, window_bounds = array<i64: 128, 384>}, {pipeline_mode = #tpu.pipeline_mode<synchronous>, transform_indices = @transform_2, window_bounds = array<i64: 128, 512>}, {pipeline_mode = #tpu.pipeline_mode<synchronous>, transform_indices = @transform_3, window_bounds = array<i64: 128, 128>}, {pipeline_mode = #tpu.pipeline_mode<synchronous>, transform_indices = @transform_4, window_bounds = array<i64: 512, 128>}, {pipeline_mode = #tpu.pipeline_mode<synchronous>, transform_indices = @transform_5, window_bounds = array<i64: 1, 128>}, {transform_indices = @transform_6, window_bounds = array<i64: 1, 16, 8, 128>}]} {
    %c0 = arith.constant 0 : index
    %c0_0 = arith.constant 0 : index
    %c0_1 = arith.constant 0 : index
    %c0_2 = arith.constant 0 : index
    %0 = vector.load %arg3[%c0, %c0_0, %c0_1, %c0_2] : memref<1x16x8x128xf32, #tpu.memory_space<vmem>>, vector<1x16x8x128xf32>
    %1 = vector.shape_cast %0 : vector<1x16x8x128xf32> to vector<16x8x128xf32>
    %2 = vector.shape_cast %1 : vector<16x8x128xf32> to vector<128x128xf32>
    %3 = arith.truncf %2 : vector<128x128xf32> to vector<128x128xbf16>
    %c0_3 = arith.constant 0 : index
    %c0_4 = arith.constant 0 : index
    %4 = vector.load %arg4[%c0_3, %c0_4] : memref<128x384xbf16, #tpu.memory_space<vmem>>, vector<128x384xbf16>
    %cst = arith.constant dense<0.000000e+00> : vector<128x384xf32>
    %5 = tpu.matmul %3, %4, %cst {dimension_numbers = #tpu.dot_dimension_numbers<[1], [0], [0], [1], [0, 0, 1, 1], [], []>} : vector<128x128xbf16>, vector<128x384xbf16>, vector<128x384xf32> -> vector<128x384xf32>
    %c0_5 = arith.constant 0 : index
    %c0_6 = arith.constant 0 : index
    %6 = vector.load %arg5[%c0_5, %c0_6] : memref<128x512xbf16, #tpu.memory_space<vmem>>, vector<128x512xbf16>
    %cst_7 = arith.constant dense<0.000000e+00> : vector<128x512xf32>
    %7 = tpu.matmul %3, %6, %cst_7 {dimension_numbers = #tpu.dot_dimension_numbers<[1], [0], [0], [1], [0, 0, 1, 1], [], []>} : vector<128x128xbf16>, vector<128x512xbf16>, vector<128x512xf32> -> vector<128x512xf32>
    %8 = vector.extract_strided_slice %5 {offsets = [0, 0], sizes = [128, 128], strides = [1, 1]} : vector<128x384xf32> to vector<128x128xf32>
    %9 = vector.shape_cast %8 : vector<128x128xf32> to vector<2x64x128xf32>
    %10 = vector.extract_strided_slice %5 {offsets = [0, 128], sizes = [128, 128], strides = [1, 1]} : vector<128x384xf32> to vector<128x128xf32>
    %11 = vector.shape_cast %10 : vector<128x128xf32> to vector<2x64x128xf32>
    %12 = vector.extract_strided_slice %5 {offsets = [0, 256], sizes = [128, 128], strides = [1, 1]} : vector<128x384xf32> to vector<128x128xf32>
    %13 = vector.shape_cast %12 : vector<128x128xf32> to vector<2x64x128xf32>
    %cst_8 = arith.constant 0.000000e+00 : f32
    %14 = vector.broadcast %cst_8 : f32 to vector<128x128xf32>
    %15 = vector.extract_strided_slice %9 {offsets = [0, 0, 0], sizes = [2, 64, 32], strides = [1, 1, 1]} : vector<2x64x128xf32> to vector<2x64x32xf32>
    %16 = arith.truncf %15 : vector<2x64x32xf32> to vector<2x64x32xbf16>
    %17 = vector.extract_strided_slice %11 {offsets = [0, 0, 0], sizes = [2, 64, 32], strides = [1, 1, 1]} : vector<2x64x128xf32> to vector<2x64x32xf32>
    %18 = arith.truncf %17 : vector<2x64x32xf32> to vector<2x64x32xbf16>
    %19 = vector.extract_strided_slice %13 {offsets = [0, 0, 0], sizes = [2, 64, 32], strides = [1, 1, 1]} : vector<2x64x128xf32> to vector<2x64x32xf32>
    %20 = arith.truncf %19 : vector<2x64x32xf32> to vector<2x64x32xbf16>
    "tpu.trace_start"() <{level = 10 : i32, message = "wqd,wkd->wqk"}> : () -> ()
    %cst_9 = arith.constant dense<0.000000e+00> : vector<2x64x64xf32>
    %21 = tpu.matmul %16, %18, %cst_9 {dimension_numbers = #tpu.dot_dimension_numbers<[2], [2], [1], [1], [0, 0, 0, 1, 1, 1], [0], [0]>} : vector<2x64x32xbf16>, vector<2x64x32xbf16>, vector<2x64x64xf32> -> vector<2x64x64xf32>
    "tpu.trace_stop"() : () -> ()
    %cst_10 = arith.constant dense<0xFF800000> : vector<2x64xf32>
    %22 = vector.multi_reduction <maximumf>, %21, %cst_10 [2] : vector<2x64x64xf32> to vector<2x64xf32>
    %23 = vector.shape_cast %22 : vector<2x64xf32> to vector<2x64x1xf32>
    %24 = vector.broadcast %23 : vector<2x64x1xf32> to vector<2x64x64xf32>
    %25 = arith.subf %21, %24 : vector<2x64x64xf32>
    %26 = math.exp %25 : vector<2x64x64xf32>
    %cst_11 = arith.constant dense<0.000000e+00> : vector<2x64xf32>
    %27 = vector.multi_reduction <add>, %26, %cst_11 [2] : vector<2x64x64xf32> to vector<2x64xf32>
    %28 = vector.shape_cast %27 : vector<2x64xf32> to vector<2x64x1xf32>
    %29 = tpu.reciprocal %28 {approx = true} : vector<2x64x1xf32> -> vector<2x64x1xf32>
    %30 = vector.broadcast %29 : vector<2x64x1xf32> to vector<2x64x64xf32>
    %31 = arith.mulf %26, %30 : vector<2x64x64xf32>
    %32 = arith.truncf %31 : vector<2x64x64xf32> to vector<2x64x64xbf16>
    "tpu.trace_start"() <{level = 10 : i32, message = "wqk,wkd->wqd"}> : () -> ()
    %cst_12 = arith.constant dense<0.000000e+00> : vector<2x64x32xf32>
    %33 = tpu.matmul %32, %20, %cst_12 {dimension_numbers = #tpu.dot_dimension_numbers<[2], [1], [1], [2], [0, 0, 0, 1, 1, 2], [0], [0]>} : vector<2x64x64xbf16>, vector<2x64x32xbf16>, vector<2x64x32xf32> -> vector<2x64x32xf32>
    "tpu.trace_stop"() : () -> ()
    %34 = vector.shape_cast %33 : vector<2x64x32xf32> to vector<128x32xf32>
    %35 = arith.truncf %34 : vector<128x32xf32> to vector<128x32xbf16>
    %c0_13 = arith.constant 0 : index
    %c0_14 = arith.constant 0 : index
    %36 = vector.load %arg6[%c0_13, %c0_14] : memref<128x128xbf16, #tpu.memory_space<vmem>>, vector<32x128xbf16>
    %cst_15 = arith.constant dense<0.000000e+00> : vector<128x128xf32>
    %37 = tpu.matmul %35, %36, %cst_15 {dimension_numbers = #tpu.dot_dimension_numbers<[1], [0], [0], [1], [0, 0, 1, 1], [], []>} : vector<128x32xbf16>, vector<32x128xbf16>, vector<128x128xf32> -> vector<128x128xf32>
    %38 = arith.addf %14, %37 : vector<128x128xf32>
    %39 = vector.extract_strided_slice %9 {offsets = [0, 0, 32], sizes = [2, 64, 32], strides = [1, 1, 1]} : vector<2x64x128xf32> to vector<2x64x32xf32>
    %40 = arith.truncf %39 : vector<2x64x32xf32> to vector<2x64x32xbf16>
    %41 = vector.extract_strided_slice %11 {offsets = [0, 0, 32], sizes = [2, 64, 32], strides = [1, 1, 1]} : vector<2x64x128xf32> to vector<2x64x32xf32>
    %42 = arith.truncf %41 : vector<2x64x32xf32> to vector<2x64x32xbf16>
    %43 = vector.extract_strided_slice %13 {offsets = [0, 0, 32], sizes = [2, 64, 32], strides = [1, 1, 1]} : vector<2x64x128xf32> to vector<2x64x32xf32>
    %44 = arith.truncf %43 : vector<2x64x32xf32> to vector<2x64x32xbf16>
    "tpu.trace_start"() <{level = 10 : i32, message = "wqd,wkd->wqk"}> : () -> ()
    %cst_16 = arith.constant dense<0.000000e+00> : vector<2x64x64xf32>
    %45 = tpu.matmul %40, %42, %cst_16 {dimension_numbers = #tpu.dot_dimension_numbers<[2], [2], [1], [1], [0, 0, 0, 1, 1, 1], [0], [0]>} : vector<2x64x32xbf16>, vector<2x64x32xbf16>, vector<2x64x64xf32> -> vector<2x64x64xf32>
    "tpu.trace_stop"() : () -> ()
    %cst_17 = arith.constant dense<0xFF800000> : vector<2x64xf32>
    %46 = vector.multi_reduction <maximumf>, %45, %cst_17 [2] : vector<2x64x64xf32> to vector<2x64xf32>
    %47 = vector.shape_cast %46 : vector<2x64xf32> to vector<2x64x1xf32>
    %48 = vector.broadcast %47 : vector<2x64x1xf32> to vector<2x64x64xf32>
    %49 = arith.subf %45, %48 : vector<2x64x64xf32>
    %50 = math.exp %49 : vector<2x64x64xf32>
    %cst_18 = arith.constant dense<0.000000e+00> : vector<2x64xf32>
    %51 = vector.multi_reduction <add>, %50, %cst_18 [2] : vector<2x64x64xf32> to vector<2x64xf32>
    %52 = vector.shape_cast %51 : vector<2x64xf32> to vector<2x64x1xf32>
    %53 = tpu.reciprocal %52 {approx = true} : vector<2x64x1xf32> -> vector<2x64x1xf32>
    %54 = vector.broadcast %53 : vector<2x64x1xf32> to vector<2x64x64xf32>
    %55 = arith.mulf %50, %54 : vector<2x64x64xf32>
    %56 = arith.truncf %55 : vector<2x64x64xf32> to vector<2x64x64xbf16>
    "tpu.trace_start"() <{level = 10 : i32, message = "wqk,wkd->wqd"}> : () -> ()
    %cst_19 = arith.constant dense<0.000000e+00> : vector<2x64x32xf32>
    %57 = tpu.matmul %56, %44, %cst_19 {dimension_numbers = #tpu.dot_dimension_numbers<[2], [1], [1], [2], [0, 0, 0, 1, 1, 2], [0], [0]>} : vector<2x64x64xbf16>, vector<2x64x32xbf16>, vector<2x64x32xf32> -> vector<2x64x32xf32>
    "tpu.trace_stop"() : () -> ()
    %58 = vector.shape_cast %57 : vector<2x64x32xf32> to vector<128x32xf32>
    %59 = arith.truncf %58 : vector<128x32xf32> to vector<128x32xbf16>
    %c32 = arith.constant 32 : index
    %c0_20 = arith.constant 0 : index
    %60 = vector.load %arg6[%c32, %c0_20] : memref<128x128xbf16, #tpu.memory_space<vmem>>, vector<32x128xbf16>
    %cst_21 = arith.constant dense<0.000000e+00> : vector<128x128xf32>
    %61 = tpu.matmul %59, %60, %cst_21 {dimension_numbers = #tpu.dot_dimension_numbers<[1], [0], [0], [1], [0, 0, 1, 1], [], []>} : vector<128x32xbf16>, vector<32x128xbf16>, vector<128x128xf32> -> vector<128x128xf32>
    %62 = arith.addf %38, %61 : vector<128x128xf32>
    %63 = vector.extract_strided_slice %9 {offsets = [0, 0, 64], sizes = [2, 64, 32], strides = [1, 1, 1]} : vector<2x64x128xf32> to vector<2x64x32xf32>
    %64 = arith.truncf %63 : vector<2x64x32xf32> to vector<2x64x32xbf16>
    %65 = vector.extract_strided_slice %11 {offsets = [0, 0, 64], sizes = [2, 64, 32], strides = [1, 1, 1]} : vector<2x64x128xf32> to vector<2x64x32xf32>
    %66 = arith.truncf %65 : vector<2x64x32xf32> to vector<2x64x32xbf16>
    %67 = vector.extract_strided_slice %13 {offsets = [0, 0, 64], sizes = [2, 64, 32], strides = [1, 1, 1]} : vector<2x64x128xf32> to vector<2x64x32xf32>
    %68 = arith.truncf %67 : vector<2x64x32xf32> to vector<2x64x32xbf16>
    "tpu.trace_start"() <{level = 10 : i32, message = "wqd,wkd->wqk"}> : () -> ()
    %cst_22 = arith.constant dense<0.000000e+00> : vector<2x64x64xf32>
    %69 = tpu.matmul %64, %66, %cst_22 {dimension_numbers = #tpu.dot_dimension_numbers<[2], [2], [1], [1], [0, 0, 0, 1, 1, 1], [0], [0]>} : vector<2x64x32xbf16>, vector<2x64x32xbf16>, vector<2x64x64xf32> -> vector<2x64x64xf32>
    "tpu.trace_stop"() : () -> ()
    %cst_23 = arith.constant dense<0xFF800000> : vector<2x64xf32>
    %70 = vector.multi_reduction <maximumf>, %69, %cst_23 [2] : vector<2x64x64xf32> to vector<2x64xf32>
    %71 = vector.shape_cast %70 : vector<2x64xf32> to vector<2x64x1xf32>
    %72 = vector.broadcast %71 : vector<2x64x1xf32> to vector<2x64x64xf32>
    %73 = arith.subf %69, %72 : vector<2x64x64xf32>
    %74 = math.exp %73 : vector<2x64x64xf32>
    %cst_24 = arith.constant dense<0.000000e+00> : vector<2x64xf32>
    %75 = vector.multi_reduction <add>, %74, %cst_24 [2] : vector<2x64x64xf32> to vector<2x64xf32>
    %76 = vector.shape_cast %75 : vector<2x64xf32> to vector<2x64x1xf32>
    %77 = tpu.reciprocal %76 {approx = true} : vector<2x64x1xf32> -> vector<2x64x1xf32>
    %78 = vector.broadcast %77 : vector<2x64x1xf32> to vector<2x64x64xf32>
    %79 = arith.mulf %74, %78 : vector<2x64x64xf32>
    %80 = arith.truncf %79 : vector<2x64x64xf32> to vector<2x64x64xbf16>
    "tpu.trace_start"() <{level = 10 : i32, message = "wqk,wkd->wqd"}> : () -> ()
    %cst_25 = arith.constant dense<0.000000e+00> : vector<2x64x32xf32>
    %81 = tpu.matmul %80, %68, %cst_25 {dimension_numbers = #tpu.dot_dimension_numbers<[2], [1], [1], [2], [0, 0, 0, 1, 1, 2], [0], [0]>} : vector<2x64x64xbf16>, vector<2x64x32xbf16>, vector<2x64x32xf32> -> vector<2x64x32xf32>
    "tpu.trace_stop"() : () -> ()
    %82 = vector.shape_cast %81 : vector<2x64x32xf32> to vector<128x32xf32>
    %83 = arith.truncf %82 : vector<128x32xf32> to vector<128x32xbf16>
    %c64 = arith.constant 64 : index
    %c0_26 = arith.constant 0 : index
    %84 = vector.load %arg6[%c64, %c0_26] : memref<128x128xbf16, #tpu.memory_space<vmem>>, vector<32x128xbf16>
    %cst_27 = arith.constant dense<0.000000e+00> : vector<128x128xf32>
    %85 = tpu.matmul %83, %84, %cst_27 {dimension_numbers = #tpu.dot_dimension_numbers<[1], [0], [0], [1], [0, 0, 1, 1], [], []>} : vector<128x32xbf16>, vector<32x128xbf16>, vector<128x128xf32> -> vector<128x128xf32>
    %86 = arith.addf %62, %85 : vector<128x128xf32>
    %87 = vector.extract_strided_slice %9 {offsets = [0, 0, 96], sizes = [2, 64, 32], strides = [1, 1, 1]} : vector<2x64x128xf32> to vector<2x64x32xf32>
    %88 = arith.truncf %87 : vector<2x64x32xf32> to vector<2x64x32xbf16>
    %89 = vector.extract_strided_slice %11 {offsets = [0, 0, 96], sizes = [2, 64, 32], strides = [1, 1, 1]} : vector<2x64x128xf32> to vector<2x64x32xf32>
    %90 = arith.truncf %89 : vector<2x64x32xf32> to vector<2x64x32xbf16>
    %91 = vector.extract_strided_slice %13 {offsets = [0, 0, 96], sizes = [2, 64, 32], strides = [1, 1, 1]} : vector<2x64x128xf32> to vector<2x64x32xf32>
    %92 = arith.truncf %91 : vector<2x64x32xf32> to vector<2x64x32xbf16>
    "tpu.trace_start"() <{level = 10 : i32, message = "wqd,wkd->wqk"}> : () -> ()
    %cst_28 = arith.constant dense<0.000000e+00> : vector<2x64x64xf32>
    %93 = tpu.matmul %88, %90, %cst_28 {dimension_numbers = #tpu.dot_dimension_numbers<[2], [2], [1], [1], [0, 0, 0, 1, 1, 1], [0], [0]>} : vector<2x64x32xbf16>, vector<2x64x32xbf16>, vector<2x64x64xf32> -> vector<2x64x64xf32>
    "tpu.trace_stop"() : () -> ()
    %cst_29 = arith.constant dense<0xFF800000> : vector<2x64xf32>
    %94 = vector.multi_reduction <maximumf>, %93, %cst_29 [2] : vector<2x64x64xf32> to vector<2x64xf32>
    %95 = vector.shape_cast %94 : vector<2x64xf32> to vector<2x64x1xf32>
    %96 = vector.broadcast %95 : vector<2x64x1xf32> to vector<2x64x64xf32>
    %97 = arith.subf %93, %96 : vector<2x64x64xf32>
    %98 = math.exp %97 : vector<2x64x64xf32>
    %cst_30 = arith.constant dense<0.000000e+00> : vector<2x64xf32>
    %99 = vector.multi_reduction <add>, %98, %cst_30 [2] : vector<2x64x64xf32> to vector<2x64xf32>
    %100 = vector.shape_cast %99 : vector<2x64xf32> to vector<2x64x1xf32>
    %101 = tpu.reciprocal %100 {approx = true} : vector<2x64x1xf32> -> vector<2x64x1xf32>
    %102 = vector.broadcast %101 : vector<2x64x1xf32> to vector<2x64x64xf32>
    %103 = arith.mulf %98, %102 : vector<2x64x64xf32>
    %104 = arith.truncf %103 : vector<2x64x64xf32> to vector<2x64x64xbf16>
    "tpu.trace_start"() <{level = 10 : i32, message = "wqk,wkd->wqd"}> : () -> ()
    %cst_31 = arith.constant dense<0.000000e+00> : vector<2x64x32xf32>
    %105 = tpu.matmul %104, %92, %cst_31 {dimension_numbers = #tpu.dot_dimension_numbers<[2], [1], [1], [2], [0, 0, 0, 1, 1, 2], [0], [0]>} : vector<2x64x64xbf16>, vector<2x64x32xbf16>, vector<2x64x32xf32> -> vector<2x64x32xf32>
    "tpu.trace_stop"() : () -> ()
    %106 = vector.shape_cast %105 : vector<2x64x32xf32> to vector<128x32xf32>
    %107 = arith.truncf %106 : vector<128x32xf32> to vector<128x32xbf16>
    %c96 = arith.constant 96 : index
    %c0_32 = arith.constant 0 : index
    %108 = vector.load %arg6[%c96, %c0_32] : memref<128x128xbf16, #tpu.memory_space<vmem>>, vector<32x128xbf16>
    %cst_33 = arith.constant dense<0.000000e+00> : vector<128x128xf32>
    %109 = tpu.matmul %107, %108, %cst_33 {dimension_numbers = #tpu.dot_dimension_numbers<[1], [0], [0], [1], [0, 0, 1, 1], [], []>} : vector<128x32xbf16>, vector<32x128xbf16>, vector<128x128xf32> -> vector<128x128xf32>
    %110 = arith.addf %86, %109 : vector<128x128xf32>
    %111 = arith.mulf %7, %7 : vector<128x512xf32>
    %112 = arith.mulf %7, %111 : vector<128x512xf32>
    %cst_34 = arith.constant 4.471500e-02 : f32
    %113 = vector.broadcast %cst_34 : f32 to vector<128x512xf32>
    %114 = arith.mulf %113, %112 : vector<128x512xf32>
    %115 = arith.addf %7, %114 : vector<128x512xf32>
    %cst_35 = arith.constant 0.797884583 : f32
    %116 = vector.broadcast %cst_35 : f32 to vector<128x512xf32>
    %117 = arith.mulf %116, %115 : vector<128x512xf32>
    %118 = math.tanh %117 : vector<128x512xf32>
    %cst_36 = arith.constant 1.000000e+00 : f32
    %119 = vector.broadcast %cst_36 : f32 to vector<128x512xf32>
    %120 = arith.addf %119, %118 : vector<128x512xf32>
    %cst_37 = arith.constant 5.000000e-01 : f32
    %121 = vector.broadcast %cst_37 : f32 to vector<128x512xf32>
    %122 = arith.mulf %121, %120 : vector<128x512xf32>
    %123 = arith.mulf %7, %122 : vector<128x512xf32>
    %124 = arith.truncf %123 : vector<128x512xf32> to vector<128x512xbf16>
    %c0_38 = arith.constant 0 : index
    %c0_39 = arith.constant 0 : index
    %125 = vector.load %arg7[%c0_38, %c0_39] : memref<512x128xbf16, #tpu.memory_space<vmem>>, vector<512x128xbf16>
    %cst_40 = arith.constant dense<0.000000e+00> : vector<128x128xf32>
    %126 = tpu.matmul %124, %125, %cst_40 {dimension_numbers = #tpu.dot_dimension_numbers<[1], [0], [0], [1], [0, 0, 1, 1], [], []>} : vector<128x512xbf16>, vector<512x128xbf16>, vector<128x128xf32> -> vector<128x128xf32>
    %127 = arith.addf %110, %126 : vector<128x128xf32>
    %cst_41 = arith.constant dense<0.000000e+00> : vector<128xf32>
    %128 = vector.multi_reduction <add>, %127, %cst_41 [1] : vector<128x128xf32> to vector<128xf32>
    %129 = vector.shape_cast %128 : vector<128xf32> to vector<128x1xf32>
    %cst_42 = arith.constant 1.280000e+02 : f32
    %130 = vector.broadcast %cst_42 : f32 to vector<128x1xf32>
    %131 = arith.divf %129, %130 : vector<128x1xf32>
    %132 = vector.broadcast %131 : vector<128x1xf32> to vector<128x128xf32>
    %133 = arith.subf %127, %132 : vector<128x128xf32>
    %134 = arith.mulf %133, %133 : vector<128x128xf32>
    %cst_43 = arith.constant dense<0.000000e+00> : vector<128xf32>
    %135 = vector.multi_reduction <add>, %134, %cst_43 [1] : vector<128x128xf32> to vector<128xf32>
    %136 = vector.shape_cast %135 : vector<128xf32> to vector<128x1xf32>
    %cst_44 = arith.constant 1.280000e+02 : f32
    %137 = vector.broadcast %cst_44 : f32 to vector<128x1xf32>
    %138 = arith.divf %136, %137 : vector<128x1xf32>
    %cst_45 = arith.constant 9.99999974E-6 : f32
    %139 = vector.broadcast %cst_45 : f32 to vector<128x1xf32>
    %140 = arith.addf %138, %139 : vector<128x1xf32>
    %141 = math.rsqrt %140 : vector<128x1xf32>
    %142 = vector.broadcast %141 : vector<128x1xf32> to vector<128x128xf32>
    %143 = arith.mulf %133, %142 : vector<128x128xf32>
    %c0_46 = arith.constant 0 : index
    %c0_47 = arith.constant 0 : index
    %144 = vector.load %arg8[%c0_46, %c0_47] : memref<1x128xf32, #tpu.memory_space<vmem>>, vector<1x128xf32>
    %145 = vector.broadcast %144 : vector<1x128xf32> to vector<128x128xf32>
    %146 = arith.mulf %143, %145 : vector<128x128xf32>
    %147 = vector.shape_cast %146 : vector<128x128xf32> to vector<16x8x128xf32>
    %c0_48 = arith.constant 0 : index
    %c0_49 = arith.constant 0 : index
    %c0_50 = arith.constant 0 : index
    %c0_51 = arith.constant 0 : index
    %148 = vector.load %arg9[%c0_48, %c0_49, %c0_50, %c0_51] : memref<1x16x8x128xf32, #tpu.memory_space<vmem>>, vector<1x16x8x128xf32>
    %149 = vector.shape_cast %148 : vector<1x16x8x128xf32> to vector<16x8x128xf32>
    %150 = vector.shape_cast %147 : vector<16x8x128xf32> to vector<1x16x8x128xf32>
    tpu.vector_store %arg9[%c0_48, %c0_49, %c0_50, %c0_51], %150 {strides = array<i32>} : memref<1x16x8x128xf32, #tpu.memory_space<vmem>>, vector<1x16x8x128xf32>,
    return
  }
  func.func @transform_0(%arg0: i32, %arg1: i32, %arg2: i32) -> (i32, i32, i32, i32) {
    %c0_i32 = arith.constant 0 : i32
    %c0_i32_0 = arith.constant 0 : i32
    return %arg0, %arg1, %arg2, %c0_i32 : i32, i32, i32, i32
  }
  func.func @transform_1(%arg0: i32, %arg1: i32, %arg2: i32) -> (i32, i32) {
    %c0_i32 = arith.constant 0 : i32
    %c0_i32_0 = arith.constant 0 : i32
    %c0_i32_1 = arith.constant 0 : i32
    return %c0_i32, %c0_i32_0 : i32, i32
  }
  func.func @transform_2(%arg0: i32, %arg1: i32, %arg2: i32) -> (i32, i32) {
    %c0_i32 = arith.constant 0 : i32
    %c0_i32_0 = arith.constant 0 : i32
    %c0_i32_1 = arith.constant 0 : i32
    return %c0_i32, %c0_i32_0 : i32, i32
  }
  func.func @transform_3(%arg0: i32, %arg1: i32, %arg2: i32) -> (i32, i32) {
    %c0_i32 = arith.constant 0 : i32
    %c0_i32_0 = arith.constant 0 : i32
    %c0_i32_1 = arith.constant 0 : i32
    return %c0_i32, %c0_i32_0 : i32, i32
  }
  func.func @transform_4(%arg0: i32, %arg1: i32, %arg2: i32) -> (i32, i32) {
    %c0_i32 = arith.constant 0 : i32
    %c0_i32_0 = arith.constant 0 : i32
    %c0_i32_1 = arith.constant 0 : i32
    return %c0_i32, %c0_i32_0 : i32, i32
  }
  func.func @transform_5(%arg0: i32, %arg1: i32, %arg2: i32) -> (i32, i32) {
    %c0_i32 = arith.constant 0 : i32
    %c0_i32_0 = arith.constant 0 : i32
    %c0_i32_1 = arith.constant 0 : i32
    return %c0_i32, %c0_i32_0 : i32, i32
  }
  func.func @transform_6(%arg0: i32, %arg1: i32, %arg2: i32) -> (i32, i32, i32, i32) {
    %c0_i32 = arith.constant 0 : i32
    %c0_i32_0 = arith.constant 0 : i32
    return %arg0, %arg1, %arg2, %c0_i32 : i32, i32, i32, i32
  }
}

</mosaic_0001>

<bundles_post_ra>
// kernel: tpu_custom_call.1
= control target key start
LH: loop header
LB: loop body
LE: loop exit
PB: predicated region body
PF: predicated region fallthrough
CT: control target
= control target key end

     0   :  { %s8890_s0 = inlined_call_operand.hbm [shape: f32[2,16,16,128], index: 0, kind: input, shape index: {}]   ;;  %s8891_s1 = inlined_call_operand.hbm [shape: bf16[128,384], index: 1, kind: input, shape index: {}]   ;;  %s8892_s2 = inlined_call_operand.hbm [shape: bf16[128,512], index: 2, kind: input, shape index: {}]   ;;  %s8893_s3 = inlined_call_operand.hbm [shape: bf16[128,128], index: 3, kind: input, shape index: {}]   ;;  %s8894_s4 = inlined_call_operand.hbm [shape: bf16[512,128], index: 4, kind: input, shape index: {}]   ;;  %s8895_s5 = inlined_call_operand.vmem [shape: f32[1,128], index: 5, kind: input, shape index: {}]   ;;  %s8896_s6 = inlined_call_operand.hbm [shape: f32[2,16,16,128], index: 6, kind: output, shape index: {}]  }
   0x1   :  { %8961 = sst [smem:[#allocation89_spill]] %s8891_s1 }
   0x2   :  { %8962 = sst [smem:[#allocation90_spill]] %s8892_s2 }
   0x3   :  { %8963 = sst [smem:[#allocation91_spill]] %s8893_s3 }
   0x4   :  { %8964 = sst [smem:[#allocation92_spill]] %s8894_s4 }
   0x5   :  { %11 = vsyncpa [#allocation3], 0 }
   0x6   :  { %13 = vsyncpa [#allocation3 + $0x1], 0 }
   0x7   :  { %14 = vsyncpa [#allocation6], 0 }
   0x8   :  { %15 = vsyncpa [#allocation9], 0 }
   0x9   :  { %16 = vsyncpa [#allocation4], 0 }
   0xa   :  { %18 = vsyncpa [#allocation4 + $0x1], 0  ;;  %s6609_s21 = smov 0   ;;  %s6611_s22 = smov 0  }
   0xb   :  { %s6613_s23 = smov 0   ;;  %s6615_s24 = smov 0  }
   0xc   :  { %s6617_s25 = smov 0   ;;  %s6619_s26 = smov 0  }
   0xd   :  { %s6621_s27 = smov 0   ;;  %s6623_s28 = smov 0  }
   0xe LB: > { %8965 = sst [smem:[#allocation16_spill]] %s6525_s21  ;;  %s5129_s29 = sadd.s32 4294967295, %s6553_s28   ;;  %s6553_s28 = sphi %s6623_s28, %s24_s28   ;;  %s6549_s27 = sphi %s6621_s27, %s9148_s27   ;;  %s6545_s26 = sphi %s6619_s26, %s9147_s26   ;;  %s6541_s25 = sphi %s6617_s25, %s9146_s25   ;;  %s6537_s24 = sphi %s6615_s24, %s9145_s24   ;;  %s6533_s23 = sphi %s6613_s23, %s9144_s23   ;;  %s6529_s22 = sphi %s6611_s22, %s9143_s22   ;;  %s6525_s21 = sphi %s6609_s21, %s9142_s21  }
   0xf   : > { %s5130_s30 = sadd.s32 4294967294, %s6553_s28   ;;  %p67_p0 = scmp.ne.s32.totalorder %s6529_s22, %s6525_s21 }
  0x10   : > { %p6653_p1 = scmp.eq.s32.totalorder %s5129_s29, 0  ;;  %p6657_p2 = scmp.eq.s32.totalorder %s5129_s29, 3 }
  0x11   : > { %p206_p3 = scmp.eq.s32.totalorder %s5130_s30, 3  ;;  %p5131_p5 = scmp.ge.s32.totalorder %s6553_s28, 1 }
  0x12   : > { %p6663_p4 = por %p6653_p1, %p67_p0  ;;  %p213_p7 = scmp.lt.s32.totalorder %s6553_s28, 5 }
  0x13   : > { %p6668_p6 = por %p206_p3, %p67_p0  ;;  %s8971_s1 = sld [smem:[#allocation89_spill]] }
  0x14   : > { %p6676_p8 = pnand %p5131_p5, %p213_p7  ;;  %s6555_s15 = smov [#allocation5]  }
  0x15   : > { %s8969_s10 = scalar_select %p6668_p6, 1, 0 }
  0x16   : > { %p5764_p9 = pneg %p6676_p8  ;;  %s226_s16 = sshll.u32 %s6555_s15, 4  ;;  %s227_s16 = int_to_ptr.vmem [resolvable:$true] %s226_s16 }
  0x17   : > { %8970 = sst [smem:[#allocation17_spill]] %s8969_s10  ;;  %s6556_s29 = smov 192  }
  0x18   : > { %p6684_p10 = pnand %p5764_p9, %p6653_p1  ;;  %s8974_s3 = sld [smem:[#allocation91_spill]] }
  0x19   : > { %s224_s13 = sshll.u32 %s8971_s1, 4  ;;  %s6557_s30 = smov 12   ;;  %s225_s13 = int_to_ptr.hbm [resolvable:$true] %s224_s13 }
  0x1a   : > { %5767 = dma.hbm_to_vmem [thread:$0]  (!%p6684_p10), %s225_s13, 3072, %s227_s16, [#allocation6], %s6556_s29, %s6556_s29, %s6557_s30  }
  0x1b   : > { %s6558_s11 = smov [#allocation8]   ;;  %s6559_s15 = smov 64  }
  0x1c   : > { %s254_s12 = sshll.u32 %s6558_s11, 4  ;;  %s6560_s1 = smov 4   ;;  %s255_s12 = int_to_ptr.vmem [resolvable:$true] %s254_s12 }
  0x1d   : > { %s8975_s2 = sld [smem:[#allocation90_spill]]  ;;  %s8898_s11 = smov 256  }
  0x1e   : > { %s252_s20 = sshll.u32 %s8974_s3, 4  ;;  %s6561_s3 = smov [#allocation7]   ;;  %s253_s20 = int_to_ptr.hbm [resolvable:$true] %s252_s20 }
  0x1f   : > { %5773 = dma.hbm_to_vmem [thread:$0]  (!%p6684_p10), %s253_s20, 1024, %s255_s12, [#allocation9], %s6559_s15, %s6559_s15, %s6560_s1  }
  0x20   : > { %s240_s13 = sshll.u32 %s6561_s3, 4  ;;  %s8976_s4 = sld [smem:[#allocation92_spill]]  ;;  %s241_s13 = int_to_ptr.vmem [resolvable:$true] %s240_s13 }
  0x21   : > { %s6563_s20 = smov 16   ;;  %s6564_s10 = smov [#allocation10]  }
  0x22   : > { %s268_s12 = sshll.u32 %s6564_s10, 4  ;;  %s36_s3 = sadd.s32 1, %s6545_s26  ;;  %s269_s12 = int_to_ptr.vmem [resolvable:$true] %s268_s12 }
  0x23   : > { %s238_s19 = sshll.u32 %s8975_s2, 4  ;;  %s43_s18 = sadd.s32 1, %s6549_s27  ;;  %s239_s19 = int_to_ptr.hbm [resolvable:$true] %s238_s19 }
  0x24   : > { %5770 = dma.hbm_to_vmem [thread:$0]  (!%p6684_p10), %s239_s19, 4096, %s241_s13, [#allocation6], %s8898_s11, %s8898_s11, %s6563_s20  }
  0x25   : > { %p37_p11 = scmp.ge.s32.totalorder %s36_s3, 2  ;;  %s54_s16 = sadd.s32 1, %s6533_s23 }
  0x26   : > { %s266_s30 = sshll.u32 %s8976_s4, 4  ;;  %p61_p12 = scmp.ne.s32.totalorder %s6533_s23, %s6529_s22  ;;  %s267_s30 = int_to_ptr.hbm [resolvable:$true] %s266_s30 }
  0x27   : > { %5776 = dma.hbm_to_vmem [thread:$0]  (!%p6684_p10), %s267_s30, 4096, %s269_s12, [#allocation9], %s6559_s15, %s6559_s15, %s6560_s1  }
  0x28   : > { %p62_p13 = scmp.eq.s32.totalorder %s6553_s28, 0  ;;  %s9150_s3 = smov (%p37_p11, %s36_s3), 0 }
  0x29   : > { %8977 = sst [smem:[#allocation18_spill]] %s9150_s3  ;;  %s9152_s18 = smov (!%p37_p11, %s43_s18), %s6549_s27 }
  0x2a   : > { %s50_s19 = ssub.s32 %s6545_s26, %s9150_s3  ;;  %p6718_p0 = por %p62_p13, %p61_p12 }
  0x2b   : > { %p45_p3 = scmp.ge.s32.totalorder %s9152_s18, 2  ;;  %p6724_p5 = por %p6657_p2, %p61_p12 }
  0x2c   : > { %p5789_p7 = scmp.lt.s32.totalorder %s6553_s28, 4  ;;  %s285_s17 = sand.u32 1, %s6533_s23  }
  0x2d   : > { %s8979_s1 = scalar_select %p6724_p5, 1, 0 }
  0x2e   : > { %s9154_s18 = smov (%p45_p3, %s9152_s18), 0  ;;  %s5137_s15 = sshll.u32 %s285_s17, 7 }
  0x2f   : > { %8980 = sst [smem:[#allocation19_spill]] %s8979_s1  ;;  %s47_s29 = ssub.s32 %s6549_s27, %s9154_s18 }
  0x30   : > { %8981 = sst [smem:[#allocation20_spill]] %s9154_s18  ;;  %s51_s30 = sor.u32 %s50_s19, %s47_s29 }
  0x31   : > { %s5138_s20 = sshll.u32 %s6549_s27, 5  ;;  %p52_p9 = scmp.eq.s32.totalorder %s51_s30, 0 }
  0x32   : > { %s296_s10 = sadd.s32 %s6545_s26, %s5138_s20  ;;  %s289_s11 = scalar_lea.vmem [#allocation2], %s5137_s15 }
  0x33   : > { %s5139_s12 = sshll.u32 %s296_s10, 3  ;;  %s301_s8 = sshll.u32 %s289_s11, 4  ;;  %s302_s8 = int_to_ptr.vmem [resolvable:$true] %s301_s8 }
  0x34   : > { %s6737_s2 = scalar_select %p52_p9, %s6533_s23, %s54_s16  }
  0x35   : > { %s298_s21 = scalar_lea.hbm %s8890_s0, %s5139_s12  ;;  %p5778_p2 = pnand %p5789_p7, %p6718_p0 }
  0x36   : > { %s299_s1 = sshll.u32 %s298_s21, 4  ;;  %s286_s18 = scalar_lea.sflag [#allocation3], %s285_s17  ;;  %s300_s1 = int_to_ptr.hbm [resolvable:$true] %s299_s1 }
  0x37   : > { %s6565_s19 = smov 128   ;;  %s6566_s29 = smov 8  }
  0x38   : > { %s8982_s30 = smov 256   ;;  %313 = sbr.rel (%p6676_p8) target bundleno = 2708 (0xa94), region = 44 }
  0x39   : > { %5780 = dma.hbm_to_vmem [thread:$0]  (!%p5778_p2), %s300_s1, 2048, %s302_s8, %s286_s18, %s8982_s30, %s6565_s19, %s6566_s29  }
  0x3d   : > { %s6750_s11 = sand.u32 1, %s6529_s22  }
  0x3e   : > { %s5141_s4 = sshll.u32 %s6750_s11, 7  ;;  %s316_s21 = scalar_lea.sflag [#allocation3], %s6750_s11 }
  0x3f   : > { %s6756_s3 = scalar_lea.vmem [#allocation2], %s5141_s4 }
  0x40   : > { %6508 = dma.done.wait (%p6663_p4), %s316_s21, 2048  }
  0x41   : > { %6510 = vsyncadd (%p6663_p4), %s316_s21, 4294965248 }
  0x42   : > { %6512 = dma.done.wait (%p6653_p1), [#allocation6], 7168  }
  0x43   : > { %6514 = vsyncadd (%p6653_p1), [#allocation6], 4294960128 }
  0x44   : > { %6516 = dma.done.wait (%p6653_p1), [#allocation9], 5120  }
  0x45   : > { %6518 = vsyncadd (%p6653_p1), [#allocation9], 4294962176  ;;  %v5233_v0 = vld [vmem:[#allocation5 + $0xa8] sm:$0xf]  ;;  %v5654_v1 = vld [vmem:[#allocation5 + $0xb0] sm:$0xf0] }
  0x46   : > { %v5653_v2 = vld [vmem:[#allocation5 + $0xac] sm:$0xf]  ;;  %v5234_v3 = vor.u32 %v5654_v1, %v5233_v0  ;;  %v5235_v4 = vld [vmem:[#allocation5 + $0xb4] sm:$0xf0]  ;;  %v5221_v5 = vld [vmem:[#allocation5 + $0x90] sm:$0xf] }
  0x47   : > { %v5651_v6 = vld [vmem:[#allocation5 + $0x98] sm:$0xf0]  ;;  %v5238_v7 = vor.u32 %v5653_v2, %v5235_v4  ;;  %v5650_v8 = vld [vmem:[#allocation5 + $0x94] sm:$0xf]  ;;  %v5223_v9 = vld [vmem:[#allocation5 + $0x9c] sm:$0xf0] }
  0x48   : > { %556 = vmatpush.bf16.msra.mxu0 %v5234_v3  ;;  %5728 = vmatpush.bf16.msra.mxu2 %v5234_v3  ;;  %v5222_v10 = vor.u32 %v5651_v6, %v5221_v5  ;;  %v5226_v11 = vor.u32 %v5650_v8, %v5223_v9  ;;  %v5209_v12 = vld [vmem:[#allocation5 + $0x78] sm:$0xf]  ;;  %v5648_v13 = vld [vmem:[#allocation5 + $0x80] sm:$0xf0]  ;;  %v5647_v14 = vld [vmem:[#allocation5 + $0x7c] sm:$0xf] }
  0x49   : > { %605 = vmatpush.bf16.msra.mxu1 %v5238_v7  ;;  %5736 = vmatpush.bf16.msra.mxu3 %v5238_v7  ;;  %v5211_v15 = vld [vmem:[#allocation5 + $0x84] sm:$0xf0]  ;;  %v5210_v16 = vor.u32 %v5648_v13, %v5209_v12  ;;  %v5197_v18 = vld [vmem:[#allocation5 + $0x60] sm:$0xf]  ;;  %v5645_v19 = vld [vmem:[#allocation5 + $0x68] sm:$0xf0] }
  0x4a   : > { %v5214_v17 = vor.u32 %v5647_v14, %v5211_v15  ;;  %v5644_v20 = vld [vmem:[#allocation5 + $0x64] sm:$0xf]  ;;  %v5199_v21 = vld [vmem:[#allocation5 + $0x6c] sm:$0xf0]  ;;  %v5198_v22 = vor.u32 %v5645_v19, %v5197_v18  ;;  %v5185_v24 = vld [vmem:[#allocation5 + $0x48] sm:$0xf] }
  0x4b   : > { %v5202_v23 = vor.u32 %v5644_v20, %v5199_v21  ;;  %v5642_v25 = vld [vmem:[#allocation5 + $0x50] sm:$0xf0]  ;;  %v5641_v26 = vld [vmem:[#allocation5 + $0x4c] sm:$0xf]  ;;  %v5187_v27 = vld [vmem:[#allocation5 + $0x54] sm:$0xf0] }
  0x4c   : > { %557 = vmatpush.bf16.msra.mxu0 %v5222_v10  ;;  %5729 = vmatpush.bf16.msra.mxu2 %v5222_v10  ;;  %v5186_v28 = vor.u32 %v5642_v25, %v5185_v24  ;;  %v5190_v29 = vor.u32 %v5641_v26, %v5187_v27  ;;  %v5173_v30 = vld [vmem:[#allocation5 + $0x30] sm:$0xf]  ;;  %v5639_v31 = vld [vmem:[#allocation5 + $0x38] sm:$0xf0]  ;;  %v5638_v32 = vld [vmem:[#allocation5 + $0x34] sm:$0xf] }
  0x4d   : > { %606 = vmatpush.bf16.msra.mxu1 %v5226_v11  ;;  %5737 = vmatpush.bf16.msra.mxu3 %v5226_v11  ;;  %v5175_v33 = vld [vmem:[#allocation5 + $0x3c] sm:$0xf0]  ;;  %v5174_v34 = vor.u32 %v5639_v31, %v5173_v30  ;;  %v5161_v36 = vld [vmem:[#allocation5 + $0x18] sm:$0xf]  ;;  %v5636_v37 = vld [vmem:[#allocation5 + $0x20] sm:$0xf0] }
  0x4e   : > { %v5178_v35 = vor.u32 %v5638_v32, %v5175_v33  ;;  %v5635_v38 = vld [vmem:[#allocation5 + $0x1c] sm:$0xf]  ;;  %v5163_v39 = vld [vmem:[#allocation5 + $0x24] sm:$0xf0]  ;;  %v5162_v40 = vor.u32 %v5636_v37, %v5161_v36  ;;  %v5149_v42 = vld [vmem:[#allocation5] sm:$0xf] }
  0x4f   : > { %v5166_v41 = vor.u32 %v5635_v38, %v5163_v39  ;;  %v5633_v43 = vld [vmem:[#allocation5 + $0x8] sm:$0xf0]  ;;  %v5632_v44 = vld [vmem:[#allocation5 + $0x4] sm:$0xf]  ;;  %v5151_v45 = vld [vmem:[#allocation5 + $0xc] sm:$0xf0] }
  0x50   : > { %558 = vmatpush.bf16.msra.mxu0 %v5210_v16  ;;  %5730 = vmatpush.bf16.msra.mxu2 %v5210_v16  ;;  %v372_v46 = vld [vmem:[%s6756_s3] sm:$0xff]  ;;  %v5241_v47 = vld [vmem:[#allocation5 + $0xb0] sm:$0xf]  ;;  %v5655_v48 = vld [vmem:[#allocation5 + $0xb8] sm:$0xf0]  ;;  %v5150_v49 = vor.u32 %v5633_v43, %v5149_v42  ;;  %v5154_v53 = vor.u32 %v5632_v44, %v5151_v45  ;;  %s6567_s7 = smov 96  }
  0x51   : > { %607 = vmatpush.bf16.msra.mxu1 %v5214_v17  ;;  %5738 = vmatpush.bf16.msra.mxu3 %v5214_v17  ;;  %v373_v50 = vld [vmem:[%s6756_s3 + $0x8] sm:$0xff]  ;;  %v384_v51 = vld [vmem:[%s6756_s3 + $0x60] sm:$0xff]  ;;  %v5242_v54 = vor.u32 %v5655_v48, %v5241_v47  ;;  %v5229_v57 = vld [vmem:[#allocation5 + $0x98] sm:$0xf]  ;;  %s6568_s9 = smov 64   ;;  %vm1179_vm0 = vcmask 261120  }
  0x52   : > { %v385_v52 = vld [vmem:[%s6756_s3 + $0x68] sm:$0xff]  ;;  %v6774_v55 = vpack.c.bf16 %v373_v50, %v372_v46  ;;  %v5652_v58 = vld [vmem:[#allocation5 + $0xa0] sm:$0xf0]  ;;  %v5217_v60 = vld [vmem:[#allocation5 + $0x80] sm:$0xf]  ;;  %vm1326_vm1 = vcmask 523264  }
  0x53   : > { %v6776_v56 = vpack.c.bf16 %v385_v52, %v384_v51  ;;  %v5230_v59 = vor.u32 %v5652_v58, %v5229_v57  ;;  %v5649_v61 = vld [vmem:[#allocation5 + $0x88] sm:$0xf0]  ;;  %v5357_v62 = vld [vmem:[#allocation7 + $0xe0] sm:$0xf]  ;;  %v5686_v63 = vld [vmem:[#allocation7 + $0xec] sm:$0xf0] }
  0x54   : > { %559 = vmatpush.bf16.msra.mxu0 %v5198_v22  ;;  %5731 = vmatpush.bf16.msra.mxu2 %v5198_v22  ;;  %v5218_v0 = vor.u32 %v5649_v61, %v5217_v60  ;;  %v5358_v1 = vor.u32 %v5686_v63, %v5357_v62  ;;  %v5205_v2 = vld [vmem:[#allocation5 + $0x68] sm:$0xf]  ;;  %v5646_v3 = vld [vmem:[#allocation5 + $0x70] sm:$0xf0]  ;;  %v5341_v4 = vld [vmem:[#allocation7 + $0xc0] sm:$0xf] }
  0x55   : > { %608 = vmatpush.bf16.msra.mxu1 %v5202_v23  ;;  %5739 = vmatpush.bf16.msra.mxu3 %v5202_v23  ;;  %v5682_v5 = vld [vmem:[#allocation7 + $0xcc] sm:$0xf0]  ;;  %v5206_v7 = vor.u32 %v5646_v3, %v5205_v2  ;;  %v375_v9 = vld [vmem:[%s6756_s3 + $0x18] sm:$0xff]  ;;  %v5325_v14 = vld [vmem:[#allocation7 + $0xa0] sm:$0xf]  ;;  %s6569_s14 = smov 32  }
  0x56   : > { %v5342_v6 = vor.u32 %v5682_v5, %v5341_v4  ;;  %v374_v8 = vld [vmem:[%s6756_s3 + $0x10] sm:$0xff]  ;;  %v5643_v12 = vld [vmem:[#allocation5 + $0x58] sm:$0xf0]  ;;  %v5181_v20 = vld [vmem:[#allocation5 + $0x38] sm:$0xf]  ;;  %s8785_s13 = scalar_lea.vmem [#allocation11], %s5141_s4 }
  0x57   : > { %v386_v10 = vld [vmem:[%s6756_s3 + $0x70] sm:$0xff]  ;;  %v387_v13 = vld [vmem:[%s6756_s3 + $0x78] sm:$0xff]  ;;  %v6786_v18 = vpack.c.bf16 %v375_v9, %v374_v8  ;;  %v5640_v21 = vld [vmem:[#allocation5 + $0x40] sm:$0xf0]  ;;  %s5628_s1 = sshll.u32 %s6541_s25, 5  ;;  %s4993_s12 = sshll.u32 %s8785_s13, 4  ;;  %s4994_s12 = int_to_ptr.vmem [resolvable:$true] %s4993_s12 }
  0x58   : > { %560 = vmatpush.bf16.msra.mxu0 %v5186_v28  ;;  %5732 = vmatpush.bf16.msra.mxu2 %v5186_v28  ;;  %v5193_v11 = vld [vmem:[#allocation5 + $0x50] sm:$0xf]  ;;  %v6788_v19 = vpack.c.bf16 %v387_v13, %v386_v10  ;;  %v5309_v22 = vld [vmem:[#allocation7 + $0x80] sm:$0xf]  ;;  %v5182_v25 = vor.u32 %v5640_v21, %v5181_v20  ;;  %v5637_v27 = vld [vmem:[#allocation5 + $0x28] sm:$0xf0]  ;;  %s4990_s17 = sadd.s32 %s6537_s24, %s5628_s1 }
  0x59   : > { %609 = vmatpush.bf16.msra.mxu1 %v5190_v29  ;;  %5740 = vmatpush.bf16.msra.mxu3 %v5190_v29  ;;  %v5678_v15 = vld [vmem:[#allocation7 + $0xac] sm:$0xf0]  ;;  %v5194_v17 = vor.u32 %v5643_v12, %v5193_v11  ;;  %v5169_v26 = vld [vmem:[#allocation5 + $0x20] sm:$0xf]  ;;  %v5157_v32 = vld [vmem:[#allocation5 + $0x8] sm:$0xf] }
  0x5a   : > { %v5326_v16 = vor.u32 %v5678_v15, %v5325_v14  ;;  %v5674_v23 = vld [vmem:[#allocation7 + $0x8c] sm:$0xf0]  ;;  %v5293_v28 = vld [vmem:[#allocation7 + $0x60] sm:$0xf]  ;;  %v5170_v30 = vor.u32 %v5637_v27, %v5169_v26  ;;  %v5634_v33 = vld [vmem:[#allocation5 + $0x10] sm:$0xf0] }
  0x5b   : > { %v5310_v24 = vor.u32 %v5674_v23, %v5309_v22  ;;  %v5670_v29 = vld [vmem:[#allocation7 + $0x6c] sm:$0xf0]  ;;  %v5158_v37 = vor.u32 %v5634_v33, %v5157_v32  ;;  %v376_v38 = vld [vmem:[%s6756_s3 + $0x20] sm:$0xff]  ;;  %v377_v39 = vld [vmem:[%s6756_s3 + $0x28] sm:$0xff]  ;;  %s5629_s15 = sshll.u32 %s4990_s17, 3  ;;  %s4977_s19 = scalar_lea.sflag [#allocation4], %s6750_s11 }
  0x5c   : > { %561 = vmatpush.bf16.msra.mxu0 %v5174_v34  ;;  %5733 = vmatpush.bf16.msra.mxu2 %v5174_v34  ;;  %v5294_v31 = vor.u32 %v5670_v29, %v5293_v28  ;;  %v5277_v34 = vld [vmem:[#allocation7 + $0x40] sm:$0xf]  ;;  %v6796_v43 = vpack.c.bf16 %v377_v39, %v376_v38  ;;  %v5658_v45 = vld [vmem:[#allocation7 + $0xc] sm:$0xf0]  ;;  %v379_v48 = vld [vmem:[%s6756_s3 + $0x38] sm:$0xff]  ;;  %s4992_s10 = scalar_lea.hbm %s8896_s6, %s5629_s15 }
  0x5d   : > { %610 = vmatpush.bf16.msra.mxu1 %v5178_v35  ;;  %5741 = vmatpush.bf16.msra.mxu3 %v5178_v35  ;;  %v5666_v35 = vld [vmem:[#allocation7 + $0x4c] sm:$0xf0]  ;;  %v5245_v44 = vld [vmem:[#allocation7] sm:$0xf]  ;;  %v381_v51 = vld [vmem:[%s6756_s3 + $0x48] sm:$0xff]  ;;  %s4995_s8 = sshll.u32 %s4992_s10, 4  ;;  %s4996_s8 = int_to_ptr.hbm [resolvable:$true] %s4995_s8 }
  0x5e   : > { %v5278_v36 = vor.u32 %v5666_v35, %v5277_v34  ;;  %v5246_v46 = vor.u32 %v5658_v45, %v5245_v44  ;;  %v378_v47 = vld [vmem:[%s6756_s3 + $0x30] sm:$0xff]  ;;  %v380_v50 = vld [vmem:[%s6756_s3 + $0x40] sm:$0xff]  ;;  %v5685_v58 = vld [vmem:[#allocation7 + $0xec] sm:$0xf]  ;;  %s6461_s29 = sshra.s32 %s4996_s8, 4  ;;  %s6462_s29 = int_to_ptr.hbm [resolvable:$true] %s6461_s29 }
  0x5f   : > { %v6812_v52 = vpack.c.bf16 %v381_v51, %v380_v50  ;;  %v5681_v62 = vld [vmem:[#allocation7 + $0xcc] sm:$0xf]  ;;  %v5351_v63 = vld [vmem:[#allocation7 + $0xd8] sm:$0xf0]  ;;  %s6463_s30 = scalar_lea.hbm %s6462_s29, 128  ;;  %p6468_p10 = scmp.lt.s32.totalorder %s6462_s29, %s8896_s6 }
  0x60   : > { %562 = vmatpush.bf16.msra.mxu0 %v5162_v40  ;;  %5734 = vmatpush.bf16.msra.mxu2 %v5162_v40  ;;  %v5261_v40 = vld [vmem:[#allocation7 + $0x20] sm:$0xf]  ;;  %v5677_v2 = vld [vmem:[#allocation7 + $0xac] sm:$0xf]  ;;  %v5335_v3 = vld [vmem:[#allocation7 + $0xb8] sm:$0xf0]  ;;  %p6464_p1 = scmp.ne.s32.totalorder %s6462_s29, %s6463_s30 }
  0x61   : > { %611 = vmatpush.bf16.msra.mxu1 %v5166_v41  ;;  %5742 = vmatpush.bf16.msra.mxu3 %v5166_v41  ;;  %v5662_v41 = vld [vmem:[#allocation7 + $0x2c] sm:$0xf0]  ;;  %v5338_v5 = vor.u32 %v5677_v2, %v5335_v3  ;;  %v5673_v9 = vld [vmem:[#allocation7 + $0x8c] sm:$0xf]  ;;  %v5319_v10 = vld [vmem:[#allocation7 + $0x98] sm:$0xf0] }
  0x62   : > { %v5262_v42 = vor.u32 %v5662_v41, %v5261_v40  ;;  %v5322_v14 = vor.u32 %v5673_v9, %v5319_v10  ;;  %v5303_v20 = vld [vmem:[#allocation7 + $0x78] sm:$0xf0]  ;;  %v5665_v28 = vld [vmem:[#allocation7 + $0x4c] sm:$0xf]  ;;  %v5365_v10 = vld [vmem:[#allocation7 + $0xe8] sm:$0xf]  ;;  %p6465_p4 = pnand %p6464_p1, %p6724_p5 }
  0x63   : > { %v5287_v29 = vld [vmem:[#allocation7 + $0x58] sm:$0xf0]  ;;  %v5661_v35 = vld [vmem:[#allocation7 + $0x2c] sm:$0xf] }
  0x64   : > { %563 = vmatpush.bf16.msra.mxu0 %v5150_v49  ;;  %5735 = vmatpush.bf16.msra.mxu2 %v5150_v49  ;;  %v6804_v49 = vpack.c.bf16 %v379_v48, %v378_v47  ;;  %v5657_v45 = vld [vmem:[#allocation7 + $0xc] sm:$0xf]  ;;  %p6466_p8 = pneg %p6465_p4 }
  0x65   : > { %612 = vmatpush.bf16.msra.mxu1 %v5154_v53  ;;  %5743 = vmatpush.bf16.msra.mxu3 %v5154_v53  ;;  %v382_v53 = vld [vmem:[%s6756_s3 + $0x50] sm:$0xff] }
  0x67   : > { %564 = vmatmul.bf16.vlgmr.msra.gmra.mxu0 %v6774_v55  ;;  %594 = vmatmul.bf16.vlgmr.msra.gmra.mxu2 %v6776_v56 }
  0x68   : > { %654 = vmatpush.bf16.msrb.mxu2 %v5242_v54  ;;  %613 = vmatmul.bf16.vlgmr.msra.gmra.mxu1 %v6774_v55  ;;  %v383_v54 = vld [vmem:[%s6756_s3 + $0x58] sm:$0xff]  ;;  %s6467_s3 = scalar_lea.hbm %s8896_s6, 512 }
  0x69   : > { %643 = vmatmul.bf16.vlgmr.msra.gmra.mxu3 %v6776_v56  ;;  %v6820_v57 = vpack.c.bf16 %v383_v54, %v382_v53  ;;  %p6469_p11 = scmp.lt.s32.totalorder %s6467_s3, %s6463_s30 }
  0x6a   : > { %895 = vmatpush.bf16.msrb.mxu3 %v5358_v1  ;;  %v5354_v1 = vor.u32 %v5681_v62, %v5351_v63 }
  0x6b   : > { %p6470_p12 = por %p6469_p11, %p6468_p10 }
  0x6c   : > { %655 = vmatpush.bf16.msrb.mxu2 %v5230_v59  ;;  %v5367_v59 = vld [vmem:[#allocation7 + $0xf8] sm:$0xf0] }
  0x6d   : > { %v5370_v60 = vor.u32 %v5685_v58, %v5367_v59  ;;  %p6471_p13 = pnand %p6470_p12, %p6466_p8 }
  0x6e   : > { %896 = vmatpush.bf16.msrb.mxu3 %v5342_v6 }
  0x70   : > { %656 = vmatpush.bf16.msrb.mxu2 %v5218_v0 }
  0x72   : > { %897 = vmatpush.bf16.msrb.mxu3 %v5326_v16 }
  0x74   : > { %657 = vmatpush.bf16.msrb.mxu2 %v5206_v7 }
  0x76   : > { %898 = vmatpush.bf16.msrb.mxu3 %v5310_v24 }
  0x77   : > { %569 = vmatmul.bf16.gmra.mxu0 %v6786_v18  ;;  %599 = vmatmul.bf16.gmra.mxu2 %v6788_v19 }
  0x78   : > { %658 = vmatpush.bf16.msrb.mxu2 %v5194_v17  ;;  %618 = vmatmul.bf16.gmra.mxu1 %v6786_v18  ;;  %v5669_v17 = vld [vmem:[#allocation7 + $0x6c] sm:$0xf] }
  0x79   : > { %648 = vmatmul.bf16.gmra.mxu3 %v6788_v19  ;;  %v5306_v22 = vor.u32 %v5669_v17, %v5303_v20  ;;  %v5349_v17 = vld [vmem:[#allocation7 + $0xc8] sm:$0xf]  ;;  %v5683_v20 = vld [vmem:[#allocation7 + $0xd4] sm:$0xf0] }
  0x7a   : > { %899 = vmatpush.bf16.msrb.mxu3 %v5294_v31  ;;  %v5290_v31 = vor.u32 %v5665_v28, %v5287_v29  ;;  %v5333_v29 = vld [vmem:[#allocation7 + $0xa8] sm:$0xf] }
  0x7c   : > { %659 = vmatpush.bf16.msrb.mxu2 %v5182_v25 }
  0x7e   : > { %900 = vmatpush.bf16.msrb.mxu3 %v5278_v36  ;;  %v5271_v36 = vld [vmem:[#allocation7 + $0x38] sm:$0xf0] }
  0x7f   : > { %v5274_v38 = vor.u32 %v5661_v35, %v5271_v36 }
  0x80   : > { %660 = vmatpush.bf16.msrb.mxu2 %v5170_v30 }
  0x82   : > { %901 = vmatpush.bf16.msrb.mxu3 %v5262_v42 }
  0x84   : > { %661 = vmatpush.bf16.msrb.mxu2 %v5158_v37 }
  0x86   : > { %902 = vmatpush.bf16.msrb.mxu3 %v5246_v46  ;;  %v5255_v46 = vld [vmem:[#allocation7 + $0x18] sm:$0xf0] }
  0x87   : > { %574 = vmatmul.bf16.gmra.mxu0 %v6796_v43  ;;  %662 = vmatmul.bf16.vlgmr.msrb.gmra.mxu2 %v6774_v55  ;;  %v5258_v51 = vor.u32 %v5657_v45, %v5255_v46 }
  0x88   : > { %623 = vmatmul.bf16.gmra.mxu1 %v6796_v43  ;;  %1042 = vmatpush.bf16.msra.mxu2 %v5370_v60 }
  0x89   : > { %903 = vmatmul.bf16.vlgmr.msrb.gmra.mxu3 %v6774_v55 }
  0x8c   : > { %1043 = vmatpush.bf16.msra.mxu2 %v5354_v1 }
  0x90   : > { %1044 = vmatpush.bf16.msra.mxu2 %v5338_v5 }
  0x94   : > { %1045 = vmatpush.bf16.msra.mxu2 %v5322_v14 }
  0x97   : > { %667 = vmatmul.bf16.gmra.mxu2 %v6786_v18  ;;  %579 = vmatmul.bf16.gmra.mxu0 %v6804_v49 }
  0x98   : > { %628 = vmatmul.bf16.gmra.mxu1 %v6804_v49  ;;  %1046 = vmatpush.bf16.msra.mxu2 %v5306_v22  ;;  %v5350_v22 = vor.u32 %v5683_v20, %v5349_v17 }
  0x99   : > { %908 = vmatmul.bf16.gmra.mxu3 %v6786_v18 }
  0x9c   : > { %1047 = vmatpush.bf16.msra.mxu2 %v5290_v31 }
  0xa0   : > { %1048 = vmatpush.bf16.msra.mxu2 %v5274_v38  ;;  %v5317_v38 = vld [vmem:[#allocation7 + $0x88] sm:$0xf] }
  0xa4   : > { %1049 = vmatpush.bf16.msra.mxu2 %v5258_v51 }
  0xa7   : > { %672 = vmatmul.bf16.gmra.mxu2 %v6796_v43  ;;  %584 = vmatmul.bf16.gmra.mxu0 %v6812_v52 }
  0xa8   : > { %633 = vmatmul.bf16.gmra.mxu1 %v6812_v52 }
  0xa9   : > { %913 = vmatmul.bf16.gmra.mxu3 %v6796_v43 }
  0xb7   : > { %677 = vmatmul.bf16.gmra.mxu2 %v6804_v49  ;;  %589 = vmatmul.bf16.gmra.mxu0 %v6820_v57 }
  0xb8   : > { %638 = vmatmul.bf16.gmra.mxu1 %v6820_v57 }
  0xb9   : > { %918 = vmatmul.bf16.gmra.mxu3 %v6804_v49 }
  0xc7   : > { %682 = vmatmul.bf16.gmra.mxu2 %v6812_v52 }
  0xc9   : > { %923 = vmatmul.bf16.gmra.mxu3 %v6812_v52 }
  0xd7   : > { %687 = vmatmul.bf16.gmra.mxu2 %v6820_v57 }
  0xd9   : > { %928 = vmatmul.bf16.gmra.mxu3 %v6820_v57 }
  0xe4   : > { %v565_v61 = vpop.f32.mrf.mxu0 }
  0xe5   : > { %v614_v0 = vpop.f32.mrf.mxu1  ;;  %v1091_v4 = vpack.c.bf16 %v565_v61, %v565_v61 }
  0xe6   : > { %v1107_v39 = vpack.c.bf16 %v614_v0, %v614_v0 }
  0xe7   : > { %692 = vmatmul.bf16.gmra.mxu2 %v6776_v56  ;;  %v1147_v11 = vunpack.c.l.b16 %v1091_v4 }
  0xe8   : > { %v1167_v53 = vunpack.c.l.b16 %v1107_v39  ;;  %v5675_v39 = vld [vmem:[#allocation7 + $0x94] sm:$0xf0] }
  0xe9   : > { %933 = vmatmul.bf16.gmra.mxu3 %v6776_v56 }
  0xea   : > { %v6831_v6 = vpop.f32.mrf.mxu2 }
  0xeb   : > { %v1103_v58 = vpack.c.bf16 %v6831_v6, %v6831_v6 }
  0xec   : > { %v644_v7 = vpop.f32.mrf.mxu3  ;;  %v567_v8 = vpop.f32.mrf.mxu0 }
  0xed   : > { %v1092_v12 = vpack.c.bf16 %v567_v8, %v567_v8  ;;  %v616_v13 = vpop.f32.mrf.mxu1  ;;  %v1119_v16 = vpack.c.bf16 %v644_v7, %v644_v7  ;;  %v1245_v3 = vunpack.c.l.b16 %v1103_v58 }
  0xee   : > { %v1108_v33 = vpack.c.bf16 %v616_v13, %v616_v13 }
  0xef   : > { %v1148_v15 = vunpack.c.l.b16 %v1092_v12  ;;  %v1265_v25 = vunpack.c.l.b16 %v1119_v16 }
  0xf0   : > { %v1168_v41 = vunpack.c.l.b16 %v1108_v33 }
  0xf1   : > { %v6834_v21 = vpack.c.b16 %v1148_v15, %v1147_v11  ;;  %v5687_v11 = vld [vmem:[#allocation7 + $0xf4] sm:$0xf0] }
  0xf2   : > { %v597_v23 = vpop.f32.mrf.mxu2  ;;  %v6848_v61 = vpack.c.b16 %v1168_v41, %v1167_v53  ;;  %v5366_v12 = vor.u32 %v5687_v11, %v5365_v10 }
  0xf3   : > { %8983 = vst [vmem:[#allocation21_spill] sm:$0xff] %v6834_v21  ;;  %1701 = vrot.lane.b32.xlu2 %v6834_v21, %s6567_s7  ;;  %v1104_v59 = vpack.c.bf16 %v597_v23, %v597_v23 }
  0xf4   : > { %v646_v24 = vpop.f32.mrf.mxu3  ;;  %v570_v27 = vpop.f32.mrf.mxu0  ;;  %993 = vmatpush.bf16.msrb.mxu1 %v5366_v12 }
  0xf5   : > { %v1120_v26 = vpack.c.bf16 %v646_v24, %v646_v24  ;;  %v619_v30 = vpop.f32.mrf.mxu1  ;;  %v1093_v37 = vpack.c.bf16 %v570_v27, %v570_v27  ;;  %v1246_v4 = vunpack.c.l.b16 %v1104_v59 }
  0xf6   : > { %v1109_v42 = vpack.c.bf16 %v619_v30, %v619_v30  ;;  %v5679_v30 = vld [vmem:[#allocation7 + $0xb4] sm:$0xf0] }
  0xf7   : > { %v1266_v32 = vunpack.c.l.b16 %v1120_v26  ;;  %697 = vmatmul.bf16.gmra.mxu2 %v6788_v19  ;;  %v1149_v47 = vunpack.c.l.b16 %v1093_v37  ;;  %v6862_v7 = vpack.c.b16 %v1246_v4, %v1245_v3  ;;  %v5334_v31 = vor.u32 %v5679_v30, %v5333_v29 }
  0xf8   : > { %v1169_v62 = vunpack.c.l.b16 %v1109_v42  ;;  %994 = vmatpush.bf16.msrb.mxu1 %v5350_v22  ;;  %v5269_v22 = vld [vmem:[#allocation7 + $0x28] sm:$0xf] }
  0xf9   : > { %v6839_v34 = vpack.c.b16 %v1266_v32, %v1265_v25  ;;  %938 = vmatmul.bf16.gmra.mxu3 %v6788_v19 }
  0xfa   : > { %v6843_v40 = vpop.f32.mrf.mxu2 }
  0xfb   : > { %1782 = vrot.lane.b32.xlu0 %v6839_v34, %s6567_s7  ;;  %v1105_v3 = vpack.c.bf16 %v6843_v40, %v6843_v40 }
  0xfc   : > { %v572_v44 = vpop.f32.mrf.mxu0  ;;  %v649_v9 = vpop.f32.mrf.mxu3  ;;  %995 = vmatpush.bf16.msrb.mxu1 %v5334_v31 }
  0xfd   : > { %v1094_v48 = vpack.c.bf16 %v572_v44, %v572_v44  ;;  %v621_v50 = vpop.f32.mrf.mxu1  ;;  %v1121_v41 = vpack.c.bf16 %v649_v9, %v649_v9  ;;  %v5318_v44 = vor.u32 %v5675_v39, %v5317_v38  ;;  %v5667_v9 = vld [vmem:[#allocation7 + $0x54] sm:$0xf0]  ;;  %v1247_v17 = vunpack.c.l.b16 %v1105_v3 }
  0xfe   : > { %v1110_v54 = vpack.c.bf16 %v621_v50, %v621_v50  ;;  %v5671_v50 = vld [vmem:[#allocation7 + $0x74] sm:$0xf0] }
  0xff   : > { %v1150_v60 = vunpack.c.l.b16 %v1094_v48  ;;  %v5301_v48 = vld [vmem:[#allocation7 + $0x68] sm:$0xf]  ;;  %v1267_v51 = vunpack.c.l.b16 %v1121_v41 }
 0x100   : > { %v1170_v63 = vunpack.c.l.b16 %v1110_v54  ;;  %996 = vmatpush.bf16.msrb.mxu1 %v5318_v44  ;;  %v5302_v54 = vor.u32 %v5671_v50, %v5301_v48 }
 0x101   : > { %v6850_v0 = vpack.c.b16 %v1150_v60, %v1149_v47 }
 0x102   : > { %v6852_v1 = vpack.c.b16 %v1170_v63, %v1169_v62  ;;  %v6856_v2 = vpop.f32.mrf.mxu2 }
 0x103   : > { %2367 = vrot.lane.b32.xlu0 %v6848_v61, %s6568_s9  ;;  %1703 = vrot.lane.b32.xlu2 %v6850_v0, %s6567_s7  ;;  %v1106_v4 = vpack.c.bf16 %v6856_v2, %v6856_v2  ;;  %v5663_v2 = vld [vmem:[#allocation7 + $0x34] sm:$0xf0] }
 0x104   : > { %1711 = vrot.lane.b32.xlu1 %v6852_v1, %s6567_s7  ;;  %v575_v5 = vpop.f32.mrf.mxu0  ;;  %v651_v33 = vpop.f32.mrf.mxu3  ;;  %997 = vmatpush.bf16.msrb.mxu1 %v5302_v54 }
 0x105   : > { %v624_v6 = vpop.f32.mrf.mxu1  ;;  %v1095_v25 = vpack.c.bf16 %v575_v5, %v575_v5  ;;  %v1122_v42 = vpack.c.bf16 %v651_v33, %v651_v33  ;;  %v5253_v33 = vld [vmem:[#allocation7 + $0x8] sm:$0xf] }
 0x106   : > { %v1111_v13 = vpack.c.bf16 %v624_v6, %v624_v6  ;;  %v5285_v6 = vld [vmem:[#allocation7 + $0x48] sm:$0xf] }
 0x107   : > { %1050 = vmatmul.bf16.vlgmr.msra.gmra.mxu2 %v6774_v55  ;;  %v1151_v36 = vunpack.c.l.b16 %v1095_v25  ;;  %v1268_v53 = vunpack.c.l.b16 %v1122_v42 }
 0x108   : > { %v1171_v23 = vunpack.c.l.b16 %v1111_v13  ;;  %v5286_v13 = vor.u32 %v5667_v9, %v5285_v6 }
 0x109   : > { %v6892_v11 = vpack.c.b16 %v1268_v53, %v1267_v51 }
 0x10a   : > { %v6865_v8 = vpop.f32.mrf.mxu2  ;;  %998 = vmatpush.bf16.msrb.mxu1 %v5286_v13 }
 0x10b   : > { %1774 = vrot.lane.b32.xlu2 %v6862_v7, %s6567_s7  ;;  %v1295_v9 = vsel %vm1179_vm0, %v6892_v11, 0 }
 0x10c   : > { %1709 = vrot.lane.b32.xlu1 %v6848_v61, %s6567_s7  ;;  %v577_v14 = vpop.f32.mrf.mxu0  ;;  %v6913_v39 = vpop.f32.mrf.mxu3 }
 0x10d   : > { %v626_v15 = vpop.f32.mrf.mxu1  ;;  %v1096_v26 = vpack.c.bf16 %v577_v14, %v577_v14  ;;  %8985 = vst [vmem:[#allocation23_spill] sm:$0xff] %v6913_v39 }
 0x10e   : > { %v1112_v16 = vpack.c.bf16 %v626_v15, %v626_v15 }
 0x10f   : > { %v1152_v37 = vunpack.c.l.b16 %v1096_v26  ;;  %v5270_v26 = vor.u32 %v5663_v2, %v5269_v22 }
 0x110   : > { %v1172_v24 = vunpack.c.l.b16 %v1112_v16 }
 0x111   : > { %v6882_v46 = vpack.c.b16 %v1152_v37, %v1151_v36  ;;  %999 = vmatpush.bf16.msrb.mxu1 %v5270_v26 }
 0x112   : > { %v6871_v27 = vpack.c.b16 %v1172_v24, %v1171_v23  ;;  %v6873_v28 = vpop.f32.mrf.mxu2  ;;  %v1248_v23 = vunpack.c.l.b16 %v1106_v4 }
 0x113   : > { %2369 = vrot.lane.b32.xlu2 %v6852_v1, %s6568_s9  ;;  %v1124_v48 = vpack.c.bf16 %v6873_v28, %v6873_v28 }
 0x114   : > { %1713 = vrot.lane.b32.xlu0 %v6871_v27, %s6567_s7  ;;  %2359 = vrot.lane.b32.xlu1 %v6834_v21, %s6568_s9  ;;  %v580_v32 = vpop.f32.mrf.mxu0  ;;  %v6908_v36 = vpack.c.b16 %v1248_v23, %v1247_v17  ;;  %v1199_v42 = vsel %vm1179_vm0, %v6871_v27, 0  ;;  %v6930_v53 = vpop.f32.mrf.mxu3 }
 0x115   : > { %v629_v35 = vpop.f32.mrf.mxu1  ;;  %v1097_v45 = vpack.c.bf16 %v580_v32, %v580_v32  ;;  %8986 = vst [vmem:[#allocation24_spill] sm:$0xff] %v6930_v53 }
 0x116   : > { %v1113_v58 = vpack.c.bf16 %v629_v35, %v629_v35  ;;  %v5659_v35 = vld [vmem:[#allocation7 + $0x14] sm:$0xf0] }
 0x117   : > { %1055 = vmatmul.bf16.gmra.mxu2 %v6786_v18  ;;  %v1153_v60 = vunpack.c.l.b16 %v1097_v45  ;;  %v5254_v38 = vor.u32 %v5659_v35, %v5253_v33 }
 0x118   : > { %v1173_v14 = vunpack.c.l.b16 %v1113_v58  ;;  %v1548_v58 = vunpack.c.l.b16 %v1124_v48 }
 0x119   : > { %1000 = vmatpush.bf16.msrb.mxu1 %v5254_v38 }
 0x11a   : > { %v668_v47 = vpop.f32.mrf.mxu2 }
 0x11b   : > { %2361 = vrot.lane.b32.xlu2 %v6850_v0, %s6568_s9  ;;  %v1125_v10 = vpack.c.bf16 %v668_v47, %v668_v47  ;;  %v1123_v47 = vpack.c.bf16 %v6865_v8, %v6865_v8 }
 0x11c   : > { %1705 = vrot.lane.b32.xlu0 %v6882_v46, %s6567_s7  ;;  %v582_v59 = vpop.f32.mrf.mxu0  ;;  %1001 = vmatmul.bf16.vlgmr.msrb.gmra.mxu1 %v6774_v55 }
 0x11d   : > { %v631_v62 = vpop.f32.mrf.mxu1  ;;  %v1098_v63 = vpack.c.bf16 %v582_v59, %v582_v59  ;;  %v1549_v24 = vunpack.c.l.b16 %v1125_v10  ;;  %v1547_v54 = vunpack.c.l.b16 %v1123_v47  ;;  %v1193_v10 = vsel %vm1179_vm0, %v6848_v61, 0 }
 0x11e   : > { %v1114_v5 = vpack.c.bf16 %v631_v62, %v631_v62  ;;  %v1196_v62 = vsel %vm1179_vm0, %v6852_v1, 0 }
 0x11f   : > { %v1154_v12 = vunpack.c.l.b16 %v1098_v63  ;;  %v6936_v4 = vpack.c.b16 %v1548_v58, %v1547_v54 }
 0x120   : > { %v1174_v15 = vunpack.c.l.b16 %v1114_v5 }
 0x121   : > { %v6894_v16 = vpack.c.b16 %v1154_v12, %v1153_v60  ;;  %8987 = vst [vmem:[#allocation25_spill] sm:$0xff] %v6936_v4  ;;  %v6949_v12 = vpop.f32.mrf.mxu3 }
 0x122   : > { %v6896_v20 = vpack.c.b16 %v1174_v15, %v1173_v14  ;;  %v670_v40 = vpop.f32.mrf.mxu2  ;;  %8989 = vst [vmem:[#allocation27_spill] sm:$0xff] %v6949_v12 }
 0x123   : > { %v1126_v25 = vpack.c.bf16 %v670_v40, %v670_v40  ;;  %1784 = vrot.lane.b32.xlu2 %v6892_v11, %s6567_s7  ;;  %1707 = vrot.lane.b32.xlu1 %v6894_v16, %s6567_s7 }
 0x124   : > { %8984 = vst [vmem:[#allocation22_spill] sm:$0xff] %v6896_v20  ;;  %2371 = vrot.lane.b32.xlu0 %v6871_v27, %s6568_s9  ;;  %v1202_v29 = vsel %vm1179_vm0, %v6896_v20, 0  ;;  %v6906_v32 = vpop.f32.mrf.mxu0 }
 0x125   : > { %v1550_v30 = vunpack.c.l.b16 %v1126_v25  ;;  %v634_v31 = vpop.f32.mrf.mxu1  ;;  %1208 = vmatpush.bf16.xpose.msra.mxu3 %v1202_v29 }
 0x126   : > { %v1115_v40 = vpack.c.bf16 %v634_v31, %v634_v31 }
 0x127   : > { %v6910_v37 = vpack.c.b16 %v1550_v30, %v1549_v24  ;;  %1060 = vmatmul.bf16.gmra.mxu2 %v6796_v43 }
 0x128   : > { %v1261_v30 = vunpack.c.l.b16 %v1115_v40 }
 0x129   : > { %v6970_v54 = vpop.f32.mrf.mxu3 }
 0x12a   : > { %v673_v41 = vpop.f32.mrf.mxu2  ;;  %8990 = vst [vmem:[#allocation28_spill] sm:$0xff] %v6970_v54 }
 0x12b   : > { %1776 = vrot.lane.b32.xlu2 %v6908_v36, %s6567_s7  ;;  %2053 = vrot.lane.b32.xlu1 %v6910_v37, %s6567_s7  ;;  %v1127_v50 = vpack.c.bf16 %v673_v41, %v673_v41 }
 0x12c   : > { %1715 = vrot.lane.b32.xlu0 %v6896_v20, %s6567_s7  ;;  %v6924_v45 = vpop.f32.mrf.mxu0  ;;  %1006 = vmatmul.bf16.gmra.mxu1 %v6786_v18 }
 0x12d   : > { %v636_v44 = vpop.f32.mrf.mxu1  ;;  %1209 = vmatpush.bf16.xpose.msra.mxu3 %v1199_v42  ;;  %v1551_v59 = vunpack.c.l.b16 %v1127_v50  ;;  %v1099_v50 = vpack.c.bf16 %v6906_v32, %v6906_v32 }
 0x12e   : > { %v1116_v22 = vpack.c.bf16 %v636_v44, %v636_v44  ;;  %v1292_v44 = vsel %vm1179_vm0, %v6839_v34, 0 }
 0x130   : > { %v1262_v33 = vunpack.c.l.b16 %v1116_v22 }
 0x132   : > { %v675_v51 = vpop.f32.mrf.mxu2  ;;  %v6962_v47 = vpack.c.b16 %v1262_v33, %v1261_v30 }
 0x133   : > { %v1128_v60 = vpack.c.bf16 %v675_v51, %v675_v51  ;;  %2363 = vrot.lane.b32.xlu2 %v6882_v46, %s6568_s9  ;;  %v1100_v51 = vpack.c.bf16 %v6924_v45, %v6924_v45 }
 0x134   : > { %v590_v8 = vpop.f32.mrf.mxu0 }
 0x135   : > { %v1552_v63 = vunpack.c.l.b16 %v1128_v60  ;;  %v639_v3 = vpop.f32.mrf.mxu1  ;;  %1210 = vmatpush.bf16.xpose.msra.mxu3 %v1196_v62  ;;  %v1101_v24 = vpack.c.bf16 %v590_v8, %v590_v8  ;;  %v1241_v60 = vunpack.c.l.b16 %v1099_v50  ;;  %v1242_v62 = vunpack.c.l.b16 %v1100_v51  ;;  %v5680_v50 = vld [vmem:[#allocation7 + $0xc4] sm:$0xf]  ;;  %v5343_v51 = vld [vmem:[#allocation7 + $0xd0] sm:$0xf0] }
 0x136   : > { %v1117_v5 = vpack.c.bf16 %v639_v3, %v639_v3  ;;  %v1286_v8 = vsel %vm1179_vm0, %v6962_v47, 0 }
 0x137   : > { %v6938_v28 = vpack.c.b16 %v1552_v63, %v1551_v59  ;;  %1065 = vmatmul.bf16.gmra.mxu2 %v6804_v49  ;;  %v1243_v31 = vunpack.c.l.b16 %v1101_v24  ;;  %v6988_v45 = vpack.c.b16 %v1242_v62, %v1241_v60  ;;  %v6990_v63 = vpop.f32.mrf.mxu3  ;;  %v5346_v62 = vor.u32 %v5680_v50, %v5343_v51  ;;  %v5672_v51 = vld [vmem:[#allocation7 + $0x84] sm:$0xf] }
 0x138   : > { %v1263_v15 = vunpack.c.l.b16 %v1117_v5  ;;  %8991 = vst [vmem:[#allocation29_spill] sm:$0xff] %v6990_v63 }
 0x139   : > { %8988 = vst [vmem:[#allocation26_spill] sm:$0xff] %v6938_v28  ;;  %2055 = vrot.lane.b32.xlu1 %v6938_v28, %s6567_s7 }
 0x13a   : > { %v678_v6 = vpop.f32.mrf.mxu2 }
 0x13b   : > { %2051 = vrot.lane.b32.xlu2 %v6936_v4, %s6567_s7  ;;  %v1129_v2 = vpack.c.bf16 %v678_v6, %v678_v6 }
 0x13c   : > { %v592_v14 = vpop.f32.mrf.mxu0  ;;  %1011 = vmatmul.bf16.gmra.mxu1 %v6796_v43 }
 0x13d   : > { %v641_v13 = vpop.f32.mrf.mxu1  ;;  %1211 = vmatpush.bf16.xpose.msra.mxu3 %v1193_v10  ;;  %v1102_v25 = vpack.c.bf16 %v592_v14, %v592_v14  ;;  %v1553_v35 = vunpack.c.l.b16 %v1129_v2 }
 0x13e   : > { %v1118_v17 = vpack.c.bf16 %v641_v13, %v641_v13 }
 0x13f   : > { %v1244_v41 = vunpack.c.l.b16 %v1102_v25 }
 0x140   : > { %v1264_v23 = vunpack.c.l.b16 %v1118_v17 }
 0x141   : > { %v6973_v58 = vpack.c.b16 %v1244_v41, %v1243_v31 }
 0x142   : > { %v6952_v26 = vpack.c.b16 %v1264_v23, %v1263_v15  ;;  %v680_v29 = vpop.f32.mrf.mxu2 }
 0x143   : > { %v1130_v38 = vpack.c.bf16 %v680_v29, %v680_v29  ;;  %2373 = vrot.lane.b32.xlu2 %v6896_v20, %s6568_s9 }
 0x144   : > { %5371 = vmatmul.msk.bf16.vlgmr.msra.gmra.mxu3 %vm1179_vm0, %v6834_v21  ;;  %1780 = vrot.lane.b32.xlu1 %v6952_v26, %s6567_s7  ;;  %v1289_v32 = vsel %vm1179_vm0, %v6952_v26, 0 }
 0x145   : > { %1301 = vmatpush.bf16.xpose.msrb.mxu3 %v1295_v9  ;;  %v1554_v42 = vunpack.c.l.b16 %v1130_v38  ;;  %v7005_v9 = vpop.f32.mrf.mxu3  ;;  %v5359_v38 = vld [vmem:[#allocation7 + $0xf0] sm:$0xf0] }
 0x146   : > { %8992 = vst [vmem:[#allocation30_spill] sm:$0xff] %v7005_v9 }
 0x147   : > { %v6964_v48 = vpack.c.b16 %v1554_v42, %v1553_v35  ;;  %1070 = vmatmul.bf16.gmra.mxu2 %v6812_v52  ;;  %v5684_v35 = vld [vmem:[#allocation7 + $0xe4] sm:$0xf] }
 0x148   : > { %v5362_v42 = vor.u32 %v5684_v35, %v5359_v38  ;;  %v5327_v35 = vld [vmem:[#allocation7 + $0xb0] sm:$0xf0] }
 0x149   : > { %2057 = vrot.lane.b32.xlu0 %v6964_v48, %s6567_s7  ;;  %1579 = vmatpush.bf16.msra.mxu1 %v6964_v48 }
 0x14a   : > { %v6978_v59 = vpop.f32.mrf.mxu2  ;;  %944 = vmatpush.bf16.msrb.mxu0 %v5362_v42 }
 0x14b   : > { %1778 = vrot.lane.b32.xlu2 %v6962_v47, %s6567_s7 }
 0x14c   : > { %1772 = vrot.lane.b32.xlu1 %v6973_v58, %s6567_s7  ;;  %1016 = vmatmul.bf16.gmra.mxu1 %v6804_v49 }
 0x14d   : > { %1302 = vmatpush.bf16.xpose.msrb.mxu3 %v1292_v44  ;;  %1580 = vmatpush.bf16.msra.mxu1 %v6938_v28  ;;  %v7001_v5 = vpop.permute.xlu2 %1701  ;;  %v7014_v15 = vpop.f32.mrf.mxu3 }
 0x14e   : > { %8993 = vst [vmem:[#allocation31_spill] sm:$0xff] %v7014_v15  ;;  %945 = vmatpush.bf16.msrb.mxu0 %v5346_v62 }
 0x151   : > { %1581 = vmatpush.bf16.msra.mxu1 %v6910_v37 }
 0x152   : > { %v6993_v3 = vpop.f32.mrf.mxu2 }
 0x153   : > { %1770 = vrot.lane.b32.xlu2 %v6988_v45, %s6567_s7 }
 0x154   : > { %5372 = vmatmul.msk.bf16.gmra.mxu3 %vm1179_vm0, %v6850_v0 }
 0x155   : > { %1303 = vmatpush.bf16.xpose.msrb.mxu3 %v1289_v32  ;;  %1582 = vmatpush.bf16.msra.mxu1 %v6936_v4  ;;  %v7020_v22 = vpop.f32.mrf.mxu3 }
 0x156   : > { %8994 = vst [vmem:[#allocation32_spill] sm:$0xff] %v7020_v22 }
 0x157   : > { %1075 = vmatmul.bf16.gmra.mxu2 %v6820_v57 }
 0x15a   : > { %v688_v6 = vpop.f32.mrf.mxu2 }
 0x15b   : > { %v1133_v9 = vpack.c.bf16 %v688_v6, %v688_v6 }
 0x15c   : > { %1021 = vmatmul.bf16.gmra.mxu1 %v6812_v52 }
 0x15d   : > { %1304 = vmatpush.bf16.xpose.msrb.mxu3 %v1286_v8  ;;  %v7008_v10 = vpop.permute.xlu2 %1703  ;;  %v7027_v25 = vpop.f32.mrf.mxu3  ;;  %v1634_v6 = vunpack.c.l.b16 %v1133_v9 }
 0x15e   : > { %8996 = vst [vmem:[#allocation34_spill] sm:$0xff] %v7027_v25 }
 0x162   : > { %v690_v13 = vpop.f32.mrf.mxu2 }
 0x163   : > { %v1134_v63 = vpack.c.bf16 %v690_v13, %v690_v13 }
 0x164   : > { %5373 = vmatmul.msk.bf16.gmra.mxu3 %vm1179_vm0, %v6882_v46 }
 0x165   : > { %v7012_v14 = vpop.permute.xlu2 %1774  ;;  %v7035_v25 = vpop.f32.mrf.mxu3  ;;  %v1635_v13 = vunpack.c.l.b16 %v1134_v63 }
 0x166   : > { %8997 = vst [vmem:[#allocation35_spill] sm:$0xff] %v7035_v25 }
 0x167   : > { %1080 = vmatmul.bf16.gmra.mxu2 %v6776_v56  ;;  %v7054_v63 = vpack.c.b16 %v1635_v13, %v1634_v6 }
 0x16a   : > { %v693_v17 = vpop.f32.mrf.mxu2 }
 0x16b   : > { %v1135_v60 = vpack.c.bf16 %v693_v17, %v693_v17 }
 0x16c   : > { %1026 = vmatmul.bf16.gmra.mxu1 %v6820_v57 }
 0x16d   : > { %v7018_v40 = vpop.permute.xlu2 %2369  ;;  %v1783_v23 = vpop.permute.xlu0 %1782 }
 0x16e   : > { %v1805_v50 = vsel %vm1179_vm0, %v1783_v23, 0  ;;  %v5668_v23 = vld [vmem:[#allocation7 + $0x64] sm:$0xf] }
 0x172   : > { %v695_v2 = vpop.f32.mrf.mxu2 }
 0x173   : > { %v1136_v32 = vpack.c.bf16 %v695_v2, %v695_v2 }
 0x174   : > { %5374 = vmatmul.msk.bf16.gmra.mxu3 %vm1179_vm0, %v6894_v16 }
 0x175   : > { %v7024_v24 = vpop.permute.xlu2 %2361  ;;  %v7032_v31 = vpop.permute.xlu0 %2367 }
 0x176   : > { %8995 = vst [vmem:[#allocation33_spill] sm:$0xff] %v7024_v24  ;;  %v7029_v30 = vpop.permute.xlu1 %1711 }
 0x177   : > { %1085 = vmatmul.bf16.gmra.mxu2 %v6788_v19 }
 0x17a   : > { %v698_v29 = vpop.f32.mrf.mxu2 }
 0x17b   : > { %v1137_v44 = vpack.c.bf16 %v698_v29, %v698_v29  ;;  %v1636_v29 = vunpack.c.l.b16 %v1135_v60  ;;  %v1132_v60 = vpack.c.bf16 %v6993_v3, %v6993_v3  ;;  %v5664_v3 = vld [vmem:[#allocation7 + $0x44] sm:$0xf] }
 0x17c   : > { %1031 = vmatmul.bf16.gmra.mxu1 %v6776_v56 }
 0x17d   : > { %v1785_v33 = vpop.permute.xlu2 %1784  ;;  %v1638_v22 = vunpack.c.l.b16 %v1137_v44 }
 0x17e   : > { %v1808_v41 = vsel %vm1179_vm0, %v1785_v33, 0  ;;  %v5676_v33 = vld [vmem:[#allocation7 + $0xa4] sm:$0xf]  ;;  %v7039_v17 = vpop.permute.xlu1 %1709 }
 0x17f   : > { %1814 = vmatpush.bf16.xpose.msra.mxu3 %v1808_v41  ;;  %v5330_v38 = vor.u32 %v5676_v33, %v5327_v35  ;;  %v1637_v41 = vunpack.c.l.b16 %v1136_v32  ;;  %v5295_v32 = vld [vmem:[#allocation7 + $0x70] sm:$0xf0]  ;;  %v7052_v33 = vpop.f32.mrf.mxu3 }
 0x180   : > { %8998 = vst [vmem:[#allocation36_spill] sm:$0xff] %v7052_v33 }
 0x181   : > { %946 = vmatpush.bf16.msrb.mxu0 %v5330_v38  ;;  %v7044_v62 = vpack.c.b16 %v1637_v41, %v1636_v29  ;;  %v1633_v29 = vunpack.c.l.b16 %v1132_v60  ;;  %v5279_v38 = vld [vmem:[#allocation7 + $0x50] sm:$0xf0]  ;;  %v5656_v60 = vld [vmem:[#allocation7 + $0x4] sm:$0xf] }
 0x182   : > { %v700_v8 = vpop.f32.mrf.mxu2  ;;  %v5282_v41 = vor.u32 %v5664_v3, %v5279_v38 }
 0x183   : > { %v1138_v15 = vpack.c.bf16 %v700_v8, %v700_v8  ;;  %v5311_v8 = vld [vmem:[#allocation7 + $0x90] sm:$0xf0] }
 0x184   : > { %5375 = vmatmul.msk.bf16.vlgmr.msrb.gmra.mxu3 %vm1179_vm0, %v6988_v45  ;;  %v5314_v25 = vor.u32 %v5672_v51, %v5311_v8 }
 0x185   : > { %v1639_v42 = vunpack.c.l.b16 %v1138_v15  ;;  %v1131_v15 = vpack.c.bf16 %v6978_v59, %v6978_v59  ;;  %v7067_v51 = vpop.permute.xlu2 %1776 }
 0x186   : > { %v1714_v2 = vpop.permute.xlu0 %1713  ;;  %947 = vmatpush.bf16.msrb.mxu0 %v5314_v25  ;;  %v7059_v59 = vpop.permute.xlu1 %2359 }
 0x187   : > { %1815 = vmatpush.bf16.xpose.msra.mxu3 %v1805_v50  ;;  %v7042_v44 = vpack.c.b16 %v1639_v42, %v1638_v22  ;;  %v5298_v22 = vor.u32 %v5668_v23, %v5295_v32  ;;  %v1632_v35 = vunpack.c.l.b16 %v1131_v15  ;;  %8999 = vst [vmem:[#allocation37_spill] sm:$0xff] %v7059_v59  ;;  %v5660_v42 = vld [vmem:[#allocation7 + $0x24] sm:$0xf]  ;;  %v5263_v50 = vld [vmem:[#allocation7 + $0x30] sm:$0xf0]  ;;  %v7069_v13 = vpop.f32.mrf.mxu3 }
 0x188   : > { %v5266_v6 = vor.u32 %v5660_v42, %v5263_v50  ;;  %9000 = vst [vmem:[#allocation38_spill] sm:$0xff] %v7069_v13  ;;  %v5247_v23 = vld [vmem:[#allocation7 + $0x10] sm:$0xf0]  ;;  %v1736_v42 = vsel %vm1179_vm0, %v1714_v2, 0 }
 0x189   : > { %1664 = vmatpush.bf16.msrb.mxu1 %v7042_v44  ;;  %v7062_v25 = vpack.c.b16 %v1633_v29, %v1632_v35  ;;  %v5250_v32 = vor.u32 %v5656_v60, %v5247_v23 }
 0x18a   : > { %948 = vmatpush.bf16.msrb.mxu0 %v5298_v22 }
 0x18c   : > { %1036 = vmatmul.bf16.gmra.mxu1 %v6788_v19 }
 0x18d   : > { %1665 = vmatpush.bf16.msrb.mxu1 %v7044_v62  ;;  %v7076_v29 = vpop.permute.xlu2 %2363 }
 0x18e   : > { %v7057_v9 = vpop.permute.xlu0 %1705  ;;  %949 = vmatpush.bf16.msrb.mxu0 %v5282_v41  ;;  %9001 = vst [vmem:[#allocation39_spill] sm:$0xff] %v7076_v29  ;;  %v7082_v41 = vpop.f32.mrf.mxu2 }
 0x18f   : > { %v7078_v3 = vpop.f32.mrf.mxu3  ;;  %9003 = vst [vmem:[#allocation41_spill] sm:$0xff] %v7082_v41 }
 0x190   : > { %9002 = vst [vmem:[#allocation40_spill] sm:$0xff] %v7078_v3 }
 0x191   : > { %1666 = vmatpush.bf16.msrb.mxu1 %v7054_v63 }
 0x192   : > { %950 = vmatpush.bf16.msrb.mxu0 %v5266_v6 }
 0x194   : > { %5376 = vmatmul.msk.bf16.gmra.mxu3 %vm1179_vm0, %v6973_v58 }
 0x195   : > { %1667 = vmatpush.bf16.msrb.mxu1 %v7062_v25  ;;  %v7071_v15 = vpop.permute.xlu1 %1707  ;;  %v2052_v50 = vpop.permute.xlu2 %2051 }
 0x196   : > { %v2372_v8 = vpop.permute.xlu0 %2371  ;;  %951 = vmatpush.bf16.msrb.mxu0 %v5250_v32  ;;  %v7087_v23 = vpop.f32.mrf.mxu2 }
 0x197   : > { %v7085_v6 = vpop.f32.mrf.mxu3  ;;  %9005 = vst [vmem:[#allocation43_spill] sm:$0xff] %v7087_v23 }
 0x198   : > { %9004 = vst [vmem:[#allocation42_spill] sm:$0xff] %v7085_v6 }
 0x199   : > { %952 = vmatmul.bf16.vlgmr.msrb.gmra.mxu0 %v6774_v55  ;;  %v1733_v55 = vsel %vm1179_vm0, %v7029_v30, 0  ;;  %v7327_v53 = vpop.f32.mrf.mxu1 }
 0x19a   : > { %9022 = vst [vmem:[#allocation60_spill] sm:$0xff] %v7327_v53 }
 0x19d   : > { %v2054_v38 = vpop.permute.xlu1 %2053  ;;  %v2374_v32 = vpop.permute.xlu2 %2373 }
 0x19e   : > { %v1716_v22 = vpop.permute.xlu0 %1715  ;;  %v7099_v23 = vpop.f32.mrf.mxu2 }
 0x19f   : > { %v1739_v35 = vsel %vm1179_vm0, %v1716_v22, 0  ;;  %v7094_v22 = vpop.f32.mrf.mxu3  ;;  %9007 = vst [vmem:[#allocation45_spill] sm:$0xff] %v7099_v23 }
 0x1a0   : > { %1745 = vmatpush.bf16.xpose.msrb.mxu2 %v1739_v35  ;;  %9006 = vst [vmem:[#allocation44_spill] sm:$0xff] %v7094_v22  ;;  %v1730_v35 = vsel %vm1179_vm0, %v7039_v17, 0 }
 0x1a4   : > { %5377 = vmatmul.msk.bf16.gmra.mxu3 %vm1179_vm0, %v6862_v7 }
 0x1a6   : > { %v7107_v17 = vpop.f32.mrf.mxu2 }
 0x1a7   : > { %9009 = vst [vmem:[#allocation47_spill] sm:$0xff] %v7107_v17 }
 0x1a8   : > { %1746 = vmatpush.bf16.xpose.msrb.mxu2 %v1736_v42 }
 0x1a9   : > { %957 = vmatmul.bf16.gmra.mxu0 %v6786_v18  ;;  %v1779_v18 = vpop.permute.xlu2 %1778 }
 0x1aa   : > { %v1799_v41 = vsel %vm1179_vm0, %v1779_v18, 0 }
 0x1ab   : > { %v2056_v60 = vpop.permute.xlu1 %2055 }
 0x1b0   : > { %1747 = vmatpush.bf16.xpose.msrb.mxu2 %v1733_v55  ;;  %v7101_v55 = vpop.f32.mrf.mxu3 }
 0x1b1   : > { %9008 = vst [vmem:[#allocation46_spill] sm:$0xff] %v7101_v55 }
 0x1b4   : > { %5378 = vmatmul.msk.bf16.gmra.mxu3 %vm1179_vm0, %v6908_v36 }
 0x1b6   : > { %v1781_v2 = vpop.permute.xlu1 %1780 }
 0x1b7   : > { %v1802_v42 = vsel %vm1179_vm0, %v1781_v2, 0  ;;  %v1771_v2 = vpop.permute.xlu2 %1770 }
 0x1b8   : > { %1748 = vmatpush.bf16.xpose.msrb.mxu2 %v1730_v35  ;;  %1816 = vmatpush.bf16.xpose.msra.mxu3 %v1802_v42  ;;  %v2397_v42 = vsel %vm1179_vm0, %v2374_v32, 0 }
 0x1b9   : > { %962 = vmatmul.bf16.gmra.mxu0 %v6796_v43  ;;  %v7115_v43 = vpop.f32.mrf.mxu2 }
 0x1ba   : > { %9010 = vst [vmem:[#allocation48_spill] sm:$0xff] %v7115_v43 }
 0x1bb   : > { %v2058_v30 = vpop.permute.xlu0 %2057 }
 0x1bc   : > { %2079 = vmatpush.bf16.msra.mxu0 %v2058_v30 }
 0x1be   : > { %v1773_v32 = vpop.permute.xlu1 %1772 }
 0x1bf   : > { %5387 = vmatmul.msk.bf16.vlgmr.msrb.gmra.mxu2 %vm1179_vm0, %v7001_v5 }
 0x1c0   : > { %1817 = vmatpush.bf16.xpose.msra.mxu3 %v1799_v41  ;;  %2080 = vmatpush.bf16.msra.mxu0 %v2056_v60  ;;  %v2394_v60 = vsel %vm1179_vm0, %v2372_v8, 0 }
 0x1c4   : > { %2081 = vmatpush.bf16.msra.mxu0 %v2054_v38 }
 0x1c7   : > { %v7109_v35 = vpop.f32.mrf.mxu3  ;;  %5391 = vmatmul.msk.bf16.vlgmr.msra.gmra.mxu3 %vm1179_vm0, %v1771_v2  ;;  %v2388_v2 = vsel %vm1179_vm0, %v7032_v31, 0 }
 0x1c8   : > { %v1327_v5 = vsel %vm1326_vm1, %v7109_v35, -inf  ;;  %2082 = vmatpush.bf16.msra.mxu0 %v2052_v50  ;;  %v7125_v50 = vpop.f32.mrf.mxu2 }
 0x1c9   : > { %1328 = vmax.xlane.f32.xlu0 %v1327_v5  ;;  %967 = vmatmul.bf16.gmra.mxu0 %v6804_v49  ;;  %9011 = vst [vmem:[#allocation49_spill] sm:$0xff] %v7125_v50  ;;  %v2391_v49 = vsel %vm1179_vm0, %v7018_v40, 0 }
 0x1cc   : > { %2403 = vmatpush.bf16.xpose.msrb.mxu0 %v2397_v42 }
 0x1cf   : > { %v7117_v41 = vpop.f32.mrf.mxu3  ;;  %5388 = vmatmul.msk.bf16.gmra.mxu2 %vm1179_vm0, %v7008_v10 }
 0x1d0   : > { %v1330_v38 = vsel %vm1326_vm1, %v7117_v41, -inf  ;;  %v7143_v42 = vpop.f32.mrf.mxu2 }
 0x1d1   : > { %1331 = vmax.xlane.f32.xlu0 %v1330_v38  ;;  %9012 = vst [vmem:[#allocation50_spill] sm:$0xff] %v7143_v42 }
 0x1d4   : > { %2404 = vmatpush.bf16.xpose.msrb.mxu0 %v2394_v60 }
 0x1d7   : > { %v7127_v30 = vpop.f32.mrf.mxu3  ;;  %5392 = vmatmul.msk.bf16.gmra.mxu3 %vm1179_vm0, %v1773_v32 }
 0x1d8   : > { %v1333_v18 = vsel %vm1326_vm1, %v7127_v30, -inf }
 0x1d9   : > { %1334 = vmax.xlane.f32.xlu0 %v1333_v18  ;;  %972 = vmatmul.bf16.gmra.mxu0 %v6812_v52  ;;  %v7151_v52 = vpop.f32.mrf.mxu2 }
 0x1da   : > { %9013 = vst [vmem:[#allocation51_spill] sm:$0xff] %v7151_v52 }
 0x1dc   : > { %2405 = vmatpush.bf16.xpose.msrb.mxu0 %v2391_v49 }
 0x1df   : > { %v7134_v10 = vpop.f32.mrf.mxu3  ;;  %5389 = vmatmul.msk.bf16.gmra.mxu2 %vm1179_vm0, %v7057_v9 }
 0x1e0   : > { %v1336_v8 = vsel %vm1326_vm1, %v7134_v10, -inf }
 0x1e1   : > { %1337 = vmax.xlane.f32.xlu2 %v1336_v8  ;;  %v7160_v38 = vpop.f32.mrf.mxu2 }
 0x1e2   : > { %9014 = vst [vmem:[#allocation52_spill] sm:$0xff] %v7160_v38 }
 0x1e4   : > { %2406 = vmatpush.bf16.xpose.msrb.mxu0 %v2388_v2 }
 0x1e7   : > { %v7145_v40 = vpop.f32.mrf.mxu3  ;;  %5393 = vmatmul.msk.bf16.gmra.mxu3 %vm1179_vm0, %v7012_v14 }
 0x1e8   : > { %v1339_v9 = vsel %vm1326_vm1, %v7145_v40, -inf }
 0x1e9   : > { %1340 = vmax.xlane.f32.xlu0 %v1339_v9  ;;  %977 = vmatmul.bf16.gmra.mxu0 %v6820_v57  ;;  %v7168_v32 = vpop.f32.mrf.mxu2 }
 0x1ea   : > { %9015 = vst [vmem:[#allocation53_spill] sm:$0xff] %v7168_v32 }
 0x1ef   : > { %v7153_v5 = vpop.f32.mrf.mxu3  ;;  %5390 = vmatmul.msk.bf16.gmra.mxu2 %vm1179_vm0, %v7071_v15 }
 0x1f0   : > { %v1342_v31 = vsel %vm1326_vm1, %v7153_v5, -inf }
 0x1f1   : > { %1343 = vmax.xlane.f32.xlu2 %v1342_v31 }
 0x1f7   : > { %v7162_v14 = vpop.f32.mrf.mxu3  ;;  %5394 = vmatmul.msk.bf16.gmra.mxu3 %vm1179_vm0, %v7067_v51  ;;  %v7179_v51 = vpop.f32.mrf.mxu2 }
 0x1f8   : > { %v1345_v60 = vsel %vm1326_vm1, %v7162_v14, -inf  ;;  %9016 = vst [vmem:[#allocation54_spill] sm:$0xff] %v7179_v51 }
 0x1f9   : > { %1346 = vmax.xlane.f32.xlu0 %v1345_v60  ;;  %982 = vmatmul.bf16.gmra.mxu0 %v6776_v56 }
 0x1ff   : > { %v7170_v15 = vpop.f32.mrf.mxu3  ;;  %v7186_v56 = vpop.f32.mrf.mxu2 }
 0x200   : > { %v1348_v57 = vsel %vm1326_vm1, %v7170_v15, -inf  ;;  %9017 = vst [vmem:[#allocation55_spill] sm:$0xff] %v7186_v56 }
 0x201   : > { %1349 = vmax.xlane.f32.xlu1 %v1348_v57 }
 0x207   : > { %v7175_v18 = vpop.f32.mrf.mxu3  ;;  %v7192_v60 = vpop.f32.mrf.mxu2 }
 0x208   : > { %v1351_v49 = vsel %vm1326_vm1, %v7175_v18, -inf  ;;  %9018 = vst [vmem:[#allocation56_spill] sm:$0xff] %v7192_v60 }
 0x209   : > { %1352 = vmax.xlane.f32.xlu0 %v1351_v49  ;;  %987 = vmatmul.bf16.gmra.mxu0 %v6788_v19 }
 0x20f   : > { %v7181_v8 = vpop.f32.mrf.mxu3  ;;  %v7198_v19 = vpop.f32.mrf.mxu2 }
 0x210   : > { %v1354_v2 = vsel %vm1326_vm1, %v7181_v8, -inf  ;;  %9019 = vst [vmem:[#allocation57_spill] sm:$0xff] %v7198_v19 }
 0x211   : > { %1355 = vmax.xlane.f32.xlu1 %v1354_v2 }
 0x217   : > { %v7188_v9 = vpop.f32.mrf.mxu3  ;;  %v7208_v60 = vpop.f32.mrf.mxu2 }
 0x218   : > { %v1357_v31 = vsel %vm1326_vm1, %v7188_v9, -inf  ;;  %9020 = vst [vmem:[#allocation58_spill] sm:$0xff] %v7208_v60 }
 0x219   : > { %1358 = vmax.xlane.f32.xlu1 %v1357_v31 }
 0x21f   : > { %v7194_v57 = vpop.f32.mrf.mxu3  ;;  %v7214_v19 = vpop.f32.mrf.mxu2 }
 0x220   : > { %v1360_v49 = vsel %vm1326_vm1, %v7194_v57, -inf  ;;  %9021 = vst [vmem:[#allocation59_spill] sm:$0xff] %v7214_v19 }
 0x221   : > { %1361 = vmax.xlane.f32.xlu2 %v1360_v49 }
 0x227   : > { %v7200_v51 = vpop.f32.mrf.mxu3 }
 0x228   : > { %v1363_v2 = vsel %vm1326_vm1, %v7200_v51, -inf }
 0x229   : > { %1364 = vmax.xlane.f32.xlu1 %v1363_v2 }
 0x22f   : > { %v7204_v56 = vpop.f32.mrf.mxu3 }
 0x230   : > { %v1366_v31 = vsel %vm1326_vm1, %v7204_v56, -inf }
 0x231   : > { %1367 = vmax.xlane.f32.xlu2 %v1366_v31 }
 0x237   : > { %v7210_v32 = vpop.f32.mrf.mxu3 }
 0x238   : > { %v1369_v49 = vsel %vm1326_vm1, %v7210_v32, -inf }
 0x239   : > { %1370 = vmax.xlane.f32.xlu0 %v1369_v49 }
 0x23c   : > { %v1329_v38 = vpop.xlane.xlu0 %1328 }
 0x23d   : > { %v1375_v2 = vsub.f32 %v7109_v35, %v1329_v38 }
 0x23f   : > { %v1391_v60 = vmul.f32 1.442695, %v1375_v2  ;;  %v7222_v17 = vpop.f32.mrf.mxu3 }
 0x240   : > { %v1372_v35 = vsel %vm1326_vm1, %v7222_v17, -inf }
 0x242   : > { %v7216_v52 = vpop.f32.mrf.mxu2 }
 0x243   : > { %v1839_v42 = vsel %vm1326_vm1, %v7216_v52, -inf }
 0x244   : > { %v1332_v50 = vpop.xlane.xlu0 %1331  ;;  %1840 = vmax.xlane.f32.xlu0 %v1839_v42 }
 0x245   : > { %v1376_v31 = vsub.f32 %v7117_v41, %v1332_v50 }
 0x247   : > { %v1393_v43 = vmul.f32 1.442695, %v1376_v31 }
 0x249   : > { %5879 = vpow2.f32 %v1393_v43 }
 0x24a   : > { %v7224_v49 = vpop.f32.mrf.mxu2  ;;  %5881 = vpow2.f32 %v1391_v60  ;;  %v7296_v54 = vpop.f32.mrf.mxu3 }
 0x24b   : > { %v1842_v19 = vsel %vm1326_vm1, %v7224_v49, -inf }
 0x24c   : > { %v1335_v38 = vpop.xlane.xlu0 %1334  ;;  %1843 = vmax.xlane.f32.xlu1 %v1842_v19  ;;  %1373 = vmax.xlane.f32.xlu0 %v1372_v35 }
 0x24d   : > { %v1377_v42 = vsub.f32 %v7127_v30, %v1335_v38 }
 0x24f   : > { %v1395_v41 = vmul.f32 1.442695, %v1377_v42  ;;  %v7231_v50 = vpop.eup %5879 }
 0x250   : > { %v7233_v2 = vpop.eup %5881  ;;  %v1426_v60 = vsel %vm1326_vm1, %v7231_v50, 0.0 }
 0x251   : > { %5883 = vpow2.f32 %v1395_v41  ;;  %v1423_v30 = vsel %vm1326_vm1, %v7233_v2, 0.0 }
 0x252   : > { %v7235_v43 = vpop.f32.mrf.mxu2 }
 0x253   : > { %v1845_v31 = vsel %vm1326_vm1, %v7235_v43, -inf }
 0x254   : > { %v1338_v23 = vpop.xlane.xlu2 %1337  ;;  %1427 = vadd.xlane.f32.xlu1 %v1426_v60  ;;  %1846 = vmax.xlane.f32.xlu2 %v1845_v31 }
 0x255   : > { %v1378_v19 = vsub.f32 %v7134_v10, %v1338_v23  ;;  %1424 = vadd.xlane.f32.xlu0 %v1423_v30 }
 0x257   : > { %v1397_v35 = vmul.f32 1.442695, %v1378_v19  ;;  %v7244_v38 = vpop.eup %5883 }
 0x258   : > { %v1429_v41 = vsel %vm1326_vm1, %v7244_v38, 0.0 }
 0x259   : > { %5885 = vpow2.f32 %v1397_v35 }
 0x25a   : > { %v7246_v42 = vpop.f32.mrf.mxu2 }
 0x25b   : > { %v1848_v55 = vsel %vm1326_vm1, %v7246_v42, -inf }
 0x25c   : > { %v1341_v60 = vpop.xlane.xlu0 %1340  ;;  %1430 = vadd.xlane.f32.xlu1 %v1429_v41 }
 0x25d   : > { %v1379_v31 = vsub.f32 %v7145_v40, %v1341_v60  ;;  %1849 = vmax.xlane.f32.xlu0 %v1848_v55 }
 0x25f   : > { %v1399_v22 = vmul.f32 1.442695, %v1379_v31  ;;  %v7253_v23 = vpop.eup %5885 }
 0x260   : > { %v1432_v30 = vsel %vm1326_vm1, %v7253_v23, 0.0 }
 0x261   : > { %5887 = vpow2.f32 %v1399_v22 }
 0x262   : > { %v7255_v10 = vpop.f32.mrf.mxu2 }
 0x263   : > { %v1851_v19 = vsel %vm1326_vm1, %v7255_v10, -inf }
 0x264   : > { %v1344_v35 = vpop.xlane.xlu2 %1343  ;;  %1433 = vadd.xlane.f32.xlu1 %v1432_v30  ;;  %1852 = vmax.xlane.f32.xlu2 %v1851_v19 }
 0x265   : > { %v1380_v41 = vsub.f32 %v7153_v5, %v1344_v35 }
 0x267   : > { %v1401_v6 = vmul.f32 1.442695, %v1380_v41  ;;  %v7262_v40 = vpop.eup %5887 }
 0x268   : > { %v1435_v22 = vsel %vm1326_vm1, %v7262_v40, 0.0 }
 0x269   : > { %5889 = vpow2.f32 %v1401_v6 }
 0x26a   : > { %v7264_v55 = vpop.f32.mrf.mxu2 }
 0x26b   : > { %v1854_v60 = vsel %vm1326_vm1, %v7264_v55, -inf }
 0x26c   : > { %v1347_v31 = vpop.xlane.xlu0 %1346  ;;  %1436 = vadd.xlane.f32.xlu1 %v1435_v22  ;;  %1855 = vmax.xlane.f32.xlu0 %v1854_v60 }
 0x26d   : > { %v1381_v30 = vsub.f32 %v7162_v14, %v1347_v31 }
 0x26f   : > { %v1403_v19 = vmul.f32 1.442695, %v1381_v30  ;;  %v7271_v3 = vpop.eup %5889 }
 0x270   : > { %v1438_v35 = vsel %vm1326_vm1, %v7271_v3, 0.0 }
 0x271   : > { %5891 = vpow2.f32 %v1403_v19 }
 0x272   : > { %v7273_v5 = vpop.f32.mrf.mxu2 }
 0x273   : > { %v1857_v6 = vsel %vm1326_vm1, %v7273_v5, -inf }
 0x274   : > { %v1350_v41 = vpop.xlane.xlu1 %1349  ;;  %1858 = vmax.xlane.f32.xlu1 %v1857_v6  ;;  %1439 = vadd.xlane.f32.xlu0 %v1438_v35 }
 0x275   : > { %v1382_v22 = vsub.f32 %v7170_v15, %v1350_v41 }
 0x277   : > { %v7280_v60 = vpop.eup %5891  ;;  %v1405_v14 = vmul.f32 1.442695, %v1382_v22 }
 0x278   : > { %v1441_v31 = vsel %vm1326_vm1, %v7280_v60, 0.0 }
 0x279   : > { %1442 = vadd.xlane.f32.xlu2 %v1441_v31  ;;  %5893 = vpow2.f32 %v1405_v14 }
 0x27a   : > { %v7284_v30 = vpop.f32.mrf.mxu2 }
 0x27b   : > { %v1860_v19 = vsel %vm1326_vm1, %v7284_v30, -inf }
 0x27c   : > { %v1353_v13 = vpop.xlane.xlu0 %1352  ;;  %1861 = vmax.xlane.f32.xlu0 %v1860_v19 }
 0x27d   : > { %v1383_v6 = vsub.f32 %v7175_v18, %v1353_v13 }
 0x27f   : > { %v1407_v35 = vmul.f32 1.442695, %v1383_v6  ;;  %v7289_v33 = vpop.eup %5893 }
 0x280   : > { %v1444_v15 = vsel %vm1326_vm1, %v7289_v33, 0.0 }
 0x281   : > { %5895 = vpow2.f32 %v1407_v35 }
 0x284   : > { %v1356_v41 = vpop.xlane.xlu1 %1355  ;;  %1445 = vadd.xlane.f32.xlu0 %v1444_v15 }
 0x285   : > { %v1384_v22 = vsub.f32 %v7181_v8, %v1356_v41  ;;  %v7305_v8 = vpop.f32.mrf.mxu3 }
 0x287   : > { %v1409_v14 = vmul.f32 1.442695, %v1384_v22  ;;  %v7294_v31 = vpop.eup %5895 }
 0x288   : > { %v1447_v13 = vsel %vm1326_vm1, %v7294_v31, 0.0 }
 0x289   : > { %5897 = vpow2.f32 %v1409_v14 }
 0x28c   : > { %v1359_v18 = vpop.xlane.xlu1 %1358  ;;  %1448 = vadd.xlane.f32.xlu0 %v1447_v13 }
 0x28d   : > { %v1385_v19 = vsub.f32 %v7188_v9, %v1359_v18  ;;  %v7312_v9 = vpop.f32.mrf.mxu3 }
 0x28f   : > { %v7301_v6 = vpop.eup %5897  ;;  %v1411_v35 = vmul.f32 1.442695, %v1385_v19 }
 0x290   : > { %v1450_v15 = vsel %vm1326_vm1, %v7301_v6, 0.0 }
 0x291   : > { %5899 = vpow2.f32 %v1411_v35  ;;  %1451 = vadd.xlane.f32.xlu1 %v1450_v15 }
 0x294   : > { %v1362_v41 = vpop.xlane.xlu2 %1361 }
 0x295   : > { %v1386_v22 = vsub.f32 %v7194_v57, %v1362_v41  ;;  %v7318_v35 = vpop.f32.mrf.mxu3  ;;  %v1866_v57 = vsel %vm1326_vm1, %v7305_v8, -inf }
 0x297   : > { %v7308_v14 = vpop.eup %5899  ;;  %v1413_v12 = vmul.f32 1.442695, %v1386_v22 }
 0x298   : > { %v1453_v13 = vsel %vm1326_vm1, %v7308_v14, 0.0 }
 0x299   : > { %5901 = vpow2.f32 %v1413_v12  ;;  %1454 = vadd.xlane.f32.xlu0 %v1453_v13  ;;  %v1869_v12 = vsel %vm1326_vm1, %v7312_v9, -inf }
 0x29c   : > { %v7331_v39 = vpop.xlane.xlu1 %1364 }
 0x29d   : > { %v7325_v13 = vpop.f32.mrf.mxu3 }
 0x29e   : > { %v1875_v21 = vsel %vm1326_vm1, %v7325_v13, -inf }
 0x29f   : > { %v7314_v18 = vpop.eup %5901 }
 0x2a0   : > { %v1456_v19 = vsel %vm1326_vm1, %v7314_v18, 0.0 }
 0x2a1   : > { %1457 = vadd.xlane.f32.xlu1 %v1456_v19 }
 0x2a4   : > { %v1368_v24 = vpop.xlane.xlu2 %1367 }
 0x2a9   : > { %1867 = vmax.xlane.f32.xlu1 %v1866_v57 }
 0x2ac   : > { %v1371_v15 = vpop.xlane.xlu0 %1370 }
 0x2ad   : > { %v1389_v41 = vsub.f32 %v7210_v32, %v1371_v15 }
 0x2af   : > { %v1419_v22 = vmul.f32 1.442695, %v1389_v41  ;;  %v7336_v41 = vpop.f32.mrf.mxu3 }
 0x2b1   : > { %5903 = vpow2.f32 %v1419_v22  ;;  %1870 = vmax.xlane.f32.xlu1 %v1869_v12  ;;  %v7338_v22 = vpop.f32.mrf.mxu1 }
 0x2b2   : > { %9023 = vst [vmem:[#allocation61_spill] sm:$0xff] %v7338_v22 }
 0x2b7   : > { %v7329_v19 = vpop.eup %5903  ;;  %v1841_v29 = vpop.xlane.xlu0 %1840 }
 0x2b8   : > { %v1887_v57 = vsub.f32 %v7216_v52, %v1841_v29  ;;  %v1465_v32 = vsel %vm1326_vm1, %v7329_v19, 0.0  ;;  %v1388_v52 = vsub.f32 %v7204_v56, %v1368_v24 }
 0x2b9   : > { %1466 = vadd.xlane.f32.xlu1 %v1465_v32  ;;  %v7353_v24 = vpop.f32.mrf.mxu1 }
 0x2ba   : > { %v1903_v15 = vmul.f32 1.442695, %v1887_v57  ;;  %v1417_v22 = vmul.f32 1.442695, %v1388_v52  ;;  %9025 = vst [vmem:[#allocation63_spill] sm:$0xff] %v7353_v24 }
 0x2bc   : > { %5905 = vpow2.f32 %v1903_v15  ;;  %v7348_v15 = vpop.f32.mrf.mxu3 }
 0x2bd   : > { %9024 = vst [vmem:[#allocation62_spill] sm:$0xff] %v7348_v15 }
 0x2bf   : > { %v1844_v12 = vpop.xlane.xlu1 %1843  ;;  %v1374_v53 = vpop.xlane.xlu0 %1373 }
 0x2c0   : > { %v1888_v59 = vsub.f32 %v7224_v49, %v1844_v12  ;;  %v1390_v24 = vsub.f32 %v7222_v17, %v1374_v53 }
 0x2c1   : > { %1876 = vmax.xlane.f32.xlu1 %v1875_v21  ;;  %v1881_v21 = vsel %vm1326_vm1, %v7348_v15, -inf }
 0x2c2   : > { %v7343_v29 = vpop.eup %5905  ;;  %v1905_v32 = vmul.f32 1.442695, %v1888_v59 }
 0x2c3   : > { %v1935_v57 = vsel %vm1326_vm1, %v7343_v29, 0.0 }
 0x2c4   : > { %5907 = vpow2.f32 %v1905_v32  ;;  %1936 = vadd.xlane.f32.xlu0 %v1935_v57 }
 0x2c7   : > { %v1428_v4 = vpop.xlane.xlu1 %1427  ;;  %v1847_v28 = vpop.xlane.xlu2 %1846 }
 0x2c8   : > { %5909 = vrcp.f32 %v1428_v4  ;;  %v1889_v49 = vsub.f32 %v7235_v43, %v1847_v28  ;;  %v1425_v12 = vpop.xlane.xlu0 %1424  ;;  %v1863_v4 = vsel %vm1326_vm1, %v7296_v54, -inf }
 0x2c9   : > { %5911 = vrcp.f32 %v1425_v12  ;;  %1882 = vmax.xlane.f32.xlu1 %v1881_v21 }
 0x2ca   : > { %v7355_v59 = vpop.eup %5907  ;;  %5913 = vpow2.f32 %v1417_v22  ;;  %v1907_v56 = vmul.f32 1.442695, %v1889_v49 }
 0x2cb   : > { %v1938_v52 = vsel %vm1326_vm1, %v7355_v59, 0.0 }
 0x2cc   : > { %5915 = vpow2.f32 %v1907_v56  ;;  %1939 = vadd.xlane.f32.xlu2 %v1938_v52  ;;  %1864 = vmax.xlane.f32.xlu0 %v1863_v4 }
 0x2ce   : > { %v5910_v28 = vpop.eup %5909 }
 0x2cf   : > { %v5912_v43 = vpop.eup %5911  ;;  %v1488_v32 = vmul.f32 %v5910_v28, %v7231_v50  ;;  %v1431_v57 = vpop.xlane.xlu1 %1430 }
 0x2d0   : > { %v7362_v12 = vpop.eup %5913  ;;  %v1487_v21 = vmul.f32 %v5912_v43, %v7233_v2  ;;  %5917 = vrcp.f32 %v1431_v57  ;;  %v7372_v50 = vpop.f32.mrf.mxu1  ;;  %v1421_v2 = vmul.f32 1.442695, %v1390_v24  ;;  %v1872_v57 = vsel %vm1326_vm1, %v7318_v35, -inf }
 0x2d1   : > { %v1504_v22 = vpack.c.bf16 %v1488_v32, %v1488_v32  ;;  %v1462_v52 = vsel %vm1326_vm1, %v7362_v12, 0.0  ;;  %9026 = vst [vmem:[#allocation64_spill] sm:$0xff] %v7372_v50  ;;  %v7374_v43 = vpop.xlane.xlu0 %1849 }
 0x2d2   : > { %v7365_v49 = vpop.eup %5915  ;;  %v1503_v15 = vpack.c.bf16 %v1487_v21, %v1487_v21 }
 0x2d3   : > { %v1528_v20 = vunpack.c.l.b16 %v1504_v22  ;;  %v1941_v56 = vsel %vm1326_vm1, %v7365_v49, 0.0 }
 0x2d4   : > { %v1527_v4 = vunpack.c.l.b16 %v1503_v15  ;;  %1942 = vadd.xlane.f32.xlu1 %v1941_v56  ;;  %1463 = vadd.xlane.f32.xlu0 %v1462_v52 }
 0x2d6   : > { %v1535_v28 = vpack.c.b16 %v1528_v20, %v1527_v4  ;;  %v5918_v53 = vpop.eup %5917 }
 0x2d7   : > { %v1434_v32 = vpop.xlane.xlu1 %1433  ;;  %v1489_v17 = vmul.f32 %v5918_v53, %v7244_v38  ;;  %v7391_v53 = vpop.xlane.xlu2 %1852 }
 0x2d8   : > { %5919 = vrcp.f32 %v1434_v32  ;;  %5379 = vmatmul.msk.bf16.vlgmr.msra.gmra.mxu1 %vm1326_vm1, %v1535_v28  ;;  %v7380_v21 = vpop.f32.mrf.mxu1 }
 0x2d9   : > { %5921 = vpow2.f32 %v1421_v2  ;;  %9027 = vst [vmem:[#allocation65_spill] sm:$0xff] %v7380_v21  ;;  %v1505_v22 = vpack.c.bf16 %v1489_v17, %v1489_v17 }
 0x2db   : > { %v1529_v2 = vunpack.c.l.b16 %v1505_v22  ;;  %v1878_v22 = vsel %vm1326_vm1, %v7336_v41, -inf }
 0x2dc   : > { %1873 = vmax.xlane.f32.xlu0 %v1872_v57 }
 0x2de   : > { %v5920_v15 = vpop.eup %5919 }
 0x2df   : > { %v1490_v20 = vmul.f32 %v5920_v15, %v7253_v23  ;;  %v1437_v24 = vpop.xlane.xlu1 %1436  ;;  %v7383_v56 = vpop.xlane.xlu0 %1855 }
 0x2e0   : > { %v7385_v52 = vpop.eup %5921  ;;  %5923 = vrcp.f32 %v1437_v24  ;;  %v7393_v17 = vpop.f32.mrf.mxu1 }
 0x2e1   : > { %v1506_v4 = vpack.c.bf16 %v1490_v20, %v1490_v20  ;;  %v1468_v38 = vsel %vm1326_vm1, %v7385_v52, 0.0  ;;  %9028 = vst [vmem:[#allocation66_spill] sm:$0xff] %v7393_v17 }
 0x2e3   : > { %v1530_v28 = vunpack.c.l.b16 %v1506_v4 }
 0x2e4   : > { %2365 = vrot.lane.b32.xlu2 %v6894_v16, %s6568_s9  ;;  %1469 = vadd.xlane.f32.xlu0 %v1468_v38 }
 0x2e5   : > { %v1536_v32 = vpack.c.b16 %v1530_v28, %v1529_v2  ;;  %v7402_v28 = vpop.f32.mrf.mxu3 }
 0x2e6   : > { %v5924_v57 = vpop.eup %5923 }
 0x2e7   : > { %v1440_v23 = vpop.xlane.xlu0 %1439  ;;  %v1491_v15 = vmul.f32 %v5924_v57, %v7262_v40  ;;  %v1884_v40 = vsel %vm1326_vm1, %v7402_v28, -inf }
 0x2e8   : > { %5380 = vmatmul.msk.bf16.gmra.mxu1 %vm1326_vm1, %v1536_v32  ;;  %5925 = vrcp.f32 %v1440_v23  ;;  %v7404_v21 = vpop.f32.mrf.mxu1 }
 0x2e9   : > { %v1507_v24 = vpack.c.bf16 %v1491_v15, %v1491_v15  ;;  %9029 = vst [vmem:[#allocation67_spill] sm:$0xff] %v7404_v21 }
 0x2eb   : > { %v1531_v32 = vunpack.c.l.b16 %v1507_v24 }
 0x2ec   : > { %1879 = vmax.xlane.f32.xlu0 %v1878_v22  ;;  %v1443_v38 = vpop.xlane.xlu2 %1442 }
 0x2ed   : > { %5927 = vrcp.f32 %v1443_v38  ;;  %v7414_v38 = vpop.xlane.xlu1 %1858 }
 0x2ee   : > { %v5926_v20 = vpop.eup %5925 }
 0x2ef   : > { %v1492_v4 = vmul.f32 %v5926_v20, %v7271_v3  ;;  %v7400_v2 = vpop.xlane.xlu0 %1861  ;;  %v1387_v3 = vsub.f32 %v7200_v51, %v7331_v39 }
 0x2f1   : > { %v1508_v17 = vpack.c.bf16 %v1492_v4, %v1492_v4  ;;  %v7412_v4 = vpop.f32.mrf.mxu1  ;;  %v1415_v50 = vmul.f32 1.442695, %v1387_v3 }
 0x2f2   : > { %9030 = vst [vmem:[#allocation68_spill] sm:$0xff] %v7412_v4 }
 0x2f3   : > { %v1532_v23 = vunpack.c.l.b16 %v1508_v17  ;;  %v5928_v15 = vpop.eup %5927 }
 0x2f4   : > { %1885 = vmax.xlane.f32.xlu0 %v1884_v40  ;;  %v1493_v20 = vmul.f32 %v5928_v15, %v7280_v60 }
 0x2f5   : > { %v1537_v57 = vpack.c.b16 %v1532_v23, %v1531_v32 }
 0x2f6   : > { %v1509_v24 = vpack.c.bf16 %v1493_v20, %v1493_v20 }
 0x2f7   : > { %v1446_v22 = vpop.xlane.xlu0 %1445 }
 0x2f8   : > { %5381 = vmatmul.msk.bf16.gmra.mxu1 %vm1326_vm1, %v1537_v57  ;;  %5929 = vrcp.f32 %v1446_v22  ;;  %v1533_v23 = vunpack.c.l.b16 %v1509_v24 }
 0x2f9   : > { %5931 = vpow2.f32 %v1415_v50  ;;  %v7417_v51 = vpop.f32.mrf.mxu1 }
 0x2fa   : > { %9031 = vst [vmem:[#allocation69_spill] sm:$0xff] %v7417_v51 }
 0x2fe   : > { %v5930_v21 = vpop.eup %5929 }
 0x2ff   : > { %v1494_v17 = vmul.f32 %v5930_v21, %v7289_v33  ;;  %v1449_v40 = vpop.xlane.xlu0 %1448  ;;  %v7419_v60 = vpop.eup %5931 }
 0x300   : > { %5933 = vrcp.f32 %v1449_v40  ;;  %v1459_v3 = vsel %vm1326_vm1, %v7419_v60, 0.0 }
 0x301   : > { %v1510_v32 = vpack.c.bf16 %v1494_v17, %v1494_v17  ;;  %v7428_v24 = vpop.f32.mrf.mxu1 }
 0x302   : > { %9032 = vst [vmem:[#allocation70_spill] sm:$0xff] %v7428_v24 }
 0x303   : > { %v1534_v57 = vunpack.c.l.b16 %v1510_v32 }
 0x304   : > { %v1452_v22 = vpop.xlane.xlu1 %1451 }
 0x305   : > { %5935 = vrcp.f32 %v1452_v22  ;;  %v1538_v39 = vpack.c.b16 %v1534_v57, %v1533_v23 }
 0x306   : > { %v5934_v15 = vpop.eup %5933 }
 0x307   : > { %v1495_v21 = vmul.f32 %v5934_v15, %v7294_v31 }
 0x308   : > { %5382 = vmatmul.msk.bf16.gmra.mxu1 %vm1326_vm1, %v1538_v39  ;;  %2130 = vrot.lane.b32.xlu0 %v7042_v44, %s6567_s7 }
 0x309   : > { %v1511_v17 = vpack.c.bf16 %v1495_v21, %v1495_v21  ;;  %v7431_v39 = vpop.f32.mrf.mxu1 }
 0x30a   : > { %9033 = vst [vmem:[#allocation71_spill] sm:$0xff] %v7431_v39 }
 0x30b   : > { %v5936_v33 = vpop.eup %5935  ;;  %v1612_v23 = vunpack.c.l.b16 %v1511_v17  ;;  %v1890_v17 = vsub.f32 %v7246_v42, %v7374_v43  ;;  %v7449_v43 = vpop.f32.mrf.mxu0 }
 0x30c   : > { %v1496_v50 = vmul.f32 %v5936_v33, %v7301_v6  ;;  %v1455_v40 = vpop.xlane.xlu0 %1454 }
 0x30d   : > { %1460 = vadd.xlane.f32.xlu2 %v1459_v3  ;;  %5937 = vrcp.f32 %v1455_v40 }
 0x30e   : > { %v1512_v20 = vpack.c.bf16 %v1496_v50, %v1496_v50 }
 0x310   : > { %v1613_v32 = vunpack.c.l.b16 %v1512_v20 }
 0x312   : > { %v1620_v22 = vpack.c.b16 %v1613_v32, %v1612_v23  ;;  %v7438_v23 = vpop.f32.mrf.mxu1 }
 0x313   : > { %v5938_v31 = vpop.eup %5937  ;;  %9034 = vst [vmem:[#allocation72_spill] sm:$0xff] %v7438_v23 }
 0x314   : > { %v1458_v57 = vpop.xlane.xlu1 %1457  ;;  %v1497_v15 = vmul.f32 %v5938_v31, %v7308_v14  ;;  %v1891_v14 = vsub.f32 %v7255_v10, %v7391_v53 }
 0x315   : > { %5939 = vrcp.f32 %v1458_v57  ;;  %v1909_v57 = vmul.f32 1.442695, %v1890_v17 }
 0x316   : > { %v1513_v40 = vpack.c.bf16 %v1497_v15, %v1497_v15  ;;  %v1911_v42 = vmul.f32 1.442695, %v1891_v14  ;;  %v7459_v15 = vpop.f32.mrf.mxu0 }
 0x318   : > { %5383 = vmatmul.msk.bf16.vlgmr.msrb.gmra.mxu1 %vm1326_vm1, %v1620_v22  ;;  %v1614_v22 = vunpack.c.l.b16 %v1513_v40 }
 0x31b   : > { %v5940_v6 = vpop.eup %5939 }
 0x31c   : > { %v1498_v33 = vmul.f32 %v5940_v6, %v7314_v18  ;;  %v1868_v50 = vpop.xlane.xlu1 %1867  ;;  %v7447_v18 = vpop.f32.mrf.mxu1  ;;  %v1892_v6 = vsub.f32 %v7264_v55, %v7383_v56 }
 0x31d   : > { %v1896_v21 = vsub.f32 %v7305_v8, %v1868_v50  ;;  %9035 = vst [vmem:[#allocation73_spill] sm:$0xff] %v7447_v18 }
 0x31e   : > { %v1514_v3 = vpack.c.bf16 %v1498_v33, %v1498_v33  ;;  %v1913_v53 = vmul.f32 1.442695, %v1892_v6  ;;  %v1893_v33 = vsub.f32 %v7273_v5, %v7414_v38 }
 0x31f   : > { %v1921_v20 = vmul.f32 1.442695, %v1896_v21 }
 0x320   : > { %v1615_v32 = vunpack.c.l.b16 %v1514_v3  ;;  %v5689_v3 = vld [vmem:[#allocation8 + $0x8] sm:$0xff]  ;;  %v1915_v56 = vmul.f32 1.442695, %v1893_v33 }
 0x321   : > { %5941 = vpow2.f32 %v1921_v20  ;;  %2316 = vmatpush.bf16.msrb.mxu3 %v5689_v3  ;;  %v5688_v20 = vld [vmem:[#allocation8] sm:$0xff] }
 0x322   : > { %v1621_v39 = vpack.c.b16 %v1615_v32, %v1614_v22  ;;  %5943 = vpow2.f32 %v1909_v57  ;;  %v7470_v57 = vpop.f32.mrf.mxu0 }
 0x323   : > { %5945 = vpow2.f32 %v1911_v42  ;;  %v1894_v42 = vsub.f32 %v7284_v30, %v7400_v2 }
 0x324   : > { %v7463_v21 = vpop.f32.mrf.mxu1  ;;  %5947 = vpow2.f32 %v1913_v53  ;;  %v1871_v22 = vpop.xlane.xlu1 %1870 }
 0x325   : > { %9036 = vst [vmem:[#allocation74_spill] sm:$0xff] %v7463_v21  ;;  %2317 = vmatpush.bf16.msrb.mxu3 %v5688_v20  ;;  %v1917_v33 = vmul.f32 1.442695, %v1894_v42 }
 0x327   : > { %v7440_v24 = vpop.eup %5941 }
 0x328   : > { %5384 = vmatmul.msk.bf16.gmra.mxu1 %vm1326_vm1, %v1621_v39  ;;  %v1962_v8 = vsel %vm1326_vm1, %v7440_v24, 0.0  ;;  %v7451_v31 = vpop.eup %5943 }
 0x329   : > { %1963 = vadd.xlane.f32.xlu2 %v1962_v8  ;;  %v1944_v10 = vsel %vm1326_vm1, %v7451_v31, 0.0  ;;  %v7457_v39 = vpop.eup %5945 }
 0x32a   : > { %v1947_v55 = vsel %vm1326_vm1, %v7457_v39, 0.0  ;;  %v7467_v17 = vpop.eup %5947  ;;  %v7488_v2 = vpop.f32.mrf.mxu0 }
 0x32b   : > { %v1950_v14 = vsel %vm1326_vm1, %v7467_v17, 0.0 }
 0x32c   : > { %v7476_v8 = vpop.f32.mrf.mxu1 }
 0x32d   : > { %9037 = vst [vmem:[#allocation75_spill] sm:$0xff] %v7476_v8 }
 0x332   : > { %1945 = vadd.xlane.f32.xlu0 %v1944_v10 }
 0x337   : > { %v1937_v50 = vpop.xlane.xlu0 %1936 }
 0x338   : > { %5949 = vrcp.f32 %v1937_v50 }
 0x339   : > { %5951 = vpow2.f32 %v1915_v56 }
 0x33a   : > { %1948 = vadd.xlane.f32.xlu0 %v1947_v55 }
 0x33e   : > { %v5950_v5 = vpop.eup %5949 }
 0x33f   : > { %v1940_v40 = vpop.xlane.xlu2 %1939  ;;  %v1865_v32 = vpop.xlane.xlu0 %1864  ;;  %v1999_v10 = vmul.f32 %v5950_v5, %v7343_v29 }
 0x340   : > { %5953 = vrcp.f32 %v1940_v40  ;;  %v1895_v38 = vsub.f32 %v7296_v54, %v1865_v32  ;;  %v7481_v54 = vpop.eup %5951  ;;  %v7490_v29 = vpop.xlane.xlu1 %1466 }
 0x341   : > { %2126 = vrot.lane.b32.xlu2 %v7054_v63, %s6567_s7  ;;  %v2015_v50 = vpack.c.bf16 %v1999_v10, %v1999_v10  ;;  %v1953_v56 = vsel %vm1326_vm1, %v7481_v54, 0.0  ;;  %v7492_v5 = vpop.f32.mrf.mxu1  ;;  %v7501_v10 = vpop.f32.mrf.mxu0 }
 0x342   : > { %v1919_v6 = vmul.f32 1.442695, %v1895_v38  ;;  %1951 = vadd.xlane.f32.xlu0 %v1950_v14  ;;  %9038 = vst [vmem:[#allocation76_spill] sm:$0xff] %v7492_v5 }
 0x343   : > { %v2039_v40 = vunpack.c.l.b16 %v2015_v50 }
 0x344   : > { %5955 = vpow2.f32 %v1919_v6 }
 0x345   : > { %5957 = vpow2.f32 %v1917_v33 }
 0x346   : > { %v5954_v53 = vpop.eup %5953 }
 0x347   : > { %v2000_v3 = vmul.f32 %v5954_v53, %v7355_v59  ;;  %v1464_v30 = vpop.xlane.xlu0 %1463  ;;  %v7525_v8 = vpop.permute.xlu2 %2365 }
 0x348   : > { %v1877_v53 = vpop.xlane.xlu1 %1876 }
 0x349   : > { %v2016_v55 = vpack.c.bf16 %v2000_v3, %v2000_v3  ;;  %v1899_v50 = vsub.f32 %v7325_v13, %v1877_v53 }
 0x34a   : > { %v7486_v20 = vpop.eup %5955  ;;  %1954 = vadd.xlane.f32.xlu0 %v1953_v56 }
 0x34b   : > { %v2040_v32 = vunpack.c.l.b16 %v2016_v55  ;;  %v1959_v59 = vsel %vm1326_vm1, %v7486_v20, 0.0  ;;  %v7497_v14 = vpop.eup %5957  ;;  %v1927_v3 = vmul.f32 1.442695, %v1899_v50 }
 0x34c   : > { %1960 = vadd.xlane.f32.xlu1 %v1959_v59  ;;  %v1956_v42 = vsel %vm1326_vm1, %v7497_v14, 0.0 }
 0x34d   : > { %v2047_v38 = vpack.c.b16 %v2040_v32, %v2039_v40  ;;  %v7506_v40 = vpop.f32.mrf.mxu0  ;;  %5959 = vpow2.f32 %v1927_v3 }
 0x34e   : > { %5961 = vrcp.f32 %v1464_v30 }
 0x34f   : > { %5395 = vmatmul.msk.bf16.vlgmr.msra.gmra.mxu0 %vm1326_vm1, %v2047_v38  ;;  %v1874_v6 = vpop.xlane.xlu0 %1873 }
 0x350   : > { %v1898_v30 = vsub.f32 %v7318_v35, %v1874_v6 }
 0x353   : > { %v7509_v38 = vpop.eup %5959 }
 0x354   : > { %1957 = vadd.xlane.f32.xlu1 %v1956_v42  ;;  %v1971_v13 = vsel %vm1326_vm1, %v7509_v38, 0.0 }
 0x355   : > { %v1584_v33 = vpop.f32.mrf.mxu1  ;;  %v7513_v5 = vpop.f32.mrf.mxu0 }
 0x357   : > { %v1470_v56 = vpop.xlane.xlu0 %1469 }
 0x35d   : > { %v1586_v55 = vpop.f32.mrf.mxu1  ;;  %v7522_v3 = vpop.f32.mrf.mxu0 }
 0x35e   : > { %v1689_v59 = vpack.c.bf16 %v1586_v55, %v1584_v33  ;;  %2124 = vrot.lane.b32.xlu0 %v7062_v25, %s6567_s7 }
 0x35f   : > { %v7511_v42 = vpop.xlane.xlu0 %1879 }
 0x360   : > { %5427 = vmatmul.msk.bf16.vlgmr.msrb.gmra.mxu3 %vm1179_vm0, %v1689_v59  ;;  %v1897_v59 = vsub.f32 %v7312_v9, %v1871_v22 }
 0x362   : > { %v1923_v21 = vmul.f32 1.442695, %v1897_v59 }
 0x364   : > { %5963 = vpow2.f32 %v1923_v21 }
 0x365   : > { %v1589_v32 = vpop.f32.mrf.mxu1 }
 0x367   : > { %v7520_v50 = vpop.xlane.xlu0 %1885 }
 0x36a   : > { %1972 = vadd.xlane.f32.xlu2 %v1971_v13  ;;  %v7527_v13 = vpop.f32.mrf.mxu0 }
 0x36d   : > { %v1591_v53 = vpop.f32.mrf.mxu1  ;;  %2128 = vrot.lane.b32.xlu1 %v7044_v62, %s6567_s7 }
 0x36e   : > { %v1690_v33 = vpack.c.bf16 %v1591_v53, %v1589_v32 }
 0x370   : > { %5428 = vmatmul.msk.bf16.gmra.mxu3 %vm1179_vm0, %v1690_v33  ;;  %v5962_v33 = vpop.eup %5961 }
 0x371   : > { %v7532_v9 = vpop.eup %5963  ;;  %v1500_v22 = vmul.f32 %v5962_v33, %v7362_v12 }
 0x372   : > { %v7536_v59 = vpop.f32.mrf.mxu0 }
 0x373   : > { %9039 = vst [vmem:[#allocation77_spill] sm:$0xff] %v7536_v59  ;;  %v1516_v21 = vpack.c.bf16 %v1500_v22, %v1500_v22 }
 0x375   : > { %v1594_v55 = vpop.f32.mrf.mxu1  ;;  %v1617_v12 = vunpack.c.l.b16 %v1516_v21 }
 0x37a   : > { %v2131_v18 = vpop.permute.xlu0 %2130 }
 0x37b   : > { %2152 = vmatpush.bf16.msra.mxu1 %v2131_v18 }
 0x37d   : > { %v1596_v23 = vpop.f32.mrf.mxu1 }
 0x37e   : > { %v1691_v32 = vpack.c.bf16 %v1596_v23, %v1594_v55  ;;  %v1965_v23 = vsel %vm1326_vm1, %v7532_v9, 0.0 }
 0x380   : > { %5429 = vmatmul.msk.bf16.gmra.mxu3 %vm1179_vm0, %v1691_v32  ;;  %v1461_v53 = vpop.xlane.xlu2 %1460  ;;  %v1925_v32 = vmul.f32 1.442695, %v1898_v30  ;;  %v7554_v30 = vpop.xlane.xlu1 %1882 }
 0x381   : > { %5965 = vrcp.f32 %v1461_v53 }
 0x382   : > { %2438 = vrot.lane.b32.xlu2 %v6952_v26, %s6568_s9  ;;  %5967 = vrcp.f32 %v1470_v56 }
 0x383   : > { %5969 = vrcp.f32 %v7490_v29 }
 0x384   : > { %5971 = vpow2.f32 %v1925_v32 }
 0x385   : > { %v1599_v18 = vpop.f32.mrf.mxu1 }
 0x387   : > { %v5966_v51 = vpop.eup %5965 }
 0x388   : > { %v1499_v55 = vmul.f32 %v5966_v51, %v7419_v60  ;;  %1966 = vadd.xlane.f32.xlu0 %v1965_v23  ;;  %v5968_v59 = vpop.eup %5967  ;;  %v7546_v51 = vpop.f32.mrf.mxu0 }
 0x389   : > { %v5970_v60 = vpop.eup %5969  ;;  %v1502_v56 = vmul.f32 %v5968_v59, %v7385_v52 }
 0x38a   : > { %v1515_v53 = vpack.c.bf16 %v1499_v55, %v1499_v55  ;;  %2430 = vrot.lane.b32.xlu2 %v6973_v58, %s6568_s9  ;;  %v7551_v29 = vpop.eup %5971  ;;  %v1501_v22 = vmul.f32 %v5970_v60, %v7329_v19  ;;  %v1943_v19 = vpop.xlane.xlu1 %1942 }
 0x38b   : > { %v1518_v23 = vpack.c.bf16 %v1502_v56, %v1502_v56  ;;  %5973 = vrcp.f32 %v1943_v19 }
 0x38c   : > { %v1616_v35 = vunpack.c.l.b16 %v1515_v53  ;;  %v1517_v21 = vpack.c.bf16 %v1501_v22, %v1501_v22 }
 0x38d   : > { %v1601_v6 = vpop.f32.mrf.mxu1  ;;  %v1619_v52 = vunpack.c.l.b16 %v1518_v23 }
 0x38e   : > { %v1692_v33 = vpack.c.bf16 %v1601_v6, %v1599_v18  ;;  %v1622_v4 = vpack.c.b16 %v1617_v12, %v1616_v35 }
 0x390   : > { %5430 = vmatmul.msk.bf16.gmra.mxu3 %vm1179_vm0, %v1692_v33  ;;  %5385 = vmatmul.msk.bf16.gmra.mxu1 %vm1326_vm1, %v1622_v4  ;;  %v1968_v4 = vsel %vm1326_vm1, %v7551_v29, 0.0  ;;  %v7560_v59 = vpop.f32.mrf.mxu0 }
 0x391   : > { %v5974_v33 = vpop.eup %5973 }
 0x392   : > { %2960 = vrot.lane.b32.xlu2 %v6871_v27, %s6569_s14  ;;  %v1618_v27 = vunpack.c.l.b16 %v1517_v21  ;;  %v2001_v60 = vmul.f32 %v5974_v33, %v7365_v49 }
 0x394   : > { %v1623_v53 = vpack.c.b16 %v1619_v52, %v1618_v27  ;;  %v2017_v22 = vpack.c.bf16 %v2001_v60, %v2001_v60  ;;  %v5691_v27 = vld [vmem:[#allocation8 + $0x18] sm:$0xff] }
 0x395   : > { %v1669_v18 = vpop.f32.mrf.mxu1  ;;  %2231 = vmatpush.bf16.msra.mxu2 %v5691_v27 }
 0x397   : > { %1969 = vadd.xlane.f32.xlu1 %v1968_v4 }
 0x398   : > { %v7570_v35 = vpop.f32.mrf.mxu0 }
 0x39a   : > { %2715 = vrot.lane.b32.xlu2 %v6964_v48, %s6568_s9 }
 0x39c   : > { %2442 = vrot.lane.b32.xlu0 %v6892_v11, %s6568_s9  ;;  %v1964_v27 = vpop.xlane.xlu2 %1963 }
 0x39d   : > { %v1671_v55 = vpop.f32.mrf.mxu1 }
 0x39e   : > { %v1693_v32 = vpack.c.bf16 %v1671_v55, %v1669_v18 }
 0x3a0   : > { %5431 = vmatmul.msk.bf16.gmra.mxu3 %vm1179_vm0, %v1693_v32  ;;  %5386 = vmatmul.msk.bf16.gmra.mxu1 %vm1326_vm1, %v1623_v53  ;;  %v7578_v21 = vpop.f32.mrf.mxu0 }
 0x3a2   : > { %2956 = vrot.lane.b32.xlu2 %v6848_v61, %s6569_s14 }
 0x3a4   : > { %2432 = vrot.lane.b32.xlu0 %v6862_v7, %s6568_s9 }
 0x3a5   : > { %v1674_v12 = vpop.f32.mrf.mxu1  ;;  %v1946_v6 = vpop.xlane.xlu0 %1945 }
 0x3a6   : > { %5975 = vrcp.f32 %v1946_v6 }
 0x3a8   : > { %v7590_v32 = vpop.f32.mrf.mxu0 }
 0x3aa   : > { %2952 = vrot.lane.b32.xlu2 %v6882_v46, %s6569_s14  ;;  %v2041_v46 = vunpack.c.l.b16 %v2017_v22 }
 0x3ac   : > { %v5976_v56 = vpop.eup %5975  ;;  %2958 = vrot.lane.b32.xlu0 %v6852_v1, %s6569_s14 }
 0x3ad   : > { %v2002_v61 = vmul.f32 %v5976_v56, %v7451_v31  ;;  %v1676_v18 = vpop.f32.mrf.mxu1  ;;  %v1949_v23 = vpop.xlane.xlu0 %1948  ;;  %v5690_v31 = vld [vmem:[#allocation8 + $0x10] sm:$0xff] }
 0x3ae   : > { %v1694_v4 = vpack.c.bf16 %v1676_v18, %v1674_v12  ;;  %5977 = vrcp.f32 %v1949_v23  ;;  %2232 = vmatpush.bf16.msra.mxu2 %v5690_v31 }
 0x3af   : > { %v2018_v52 = vpack.c.bf16 %v2002_v61, %v2002_v61 }
 0x3b0   : > { %5432 = vmatmul.msk.bf16.gmra.mxu3 %vm1179_vm0, %v1694_v4  ;;  %2440 = vrot.lane.b32.xlu1 %v6839_v34, %s6568_s9  ;;  %v7598_v18 = vpop.f32.mrf.mxu0 }
 0x3b1   : > { %v2042_v49 = vunpack.c.l.b16 %v2018_v52  ;;  %9040 = vst [vmem:[#allocation78_spill] sm:$0xff] %v7598_v18  ;;  %v1902_v52 = vsub.f32 %v7402_v28, %v7520_v50 }
 0x3b2   : > { %3027 = vrot.lane.b32.xlu2 %v6952_v26, %s6569_s14 }
 0x3b3   : > { %v2048_v1 = vpack.c.b16 %v2042_v49, %v2041_v46 }
 0x3b4   : > { %2434 = vrot.lane.b32.xlu0 %v6908_v36, %s6568_s9  ;;  %v5978_v55 = vpop.eup %5977 }
 0x3b5   : > { %5396 = vmatmul.msk.bf16.gmra.mxu0 %vm1326_vm1, %v2048_v1  ;;  %v1952_v19 = vpop.xlane.xlu0 %1951  ;;  %v2003_v53 = vmul.f32 %v5978_v55, %v7457_v39  ;;  %v1933_v1 = vmul.f32 1.442695, %v1902_v52  ;;  %v9042_v55 = vld [vmem:[#allocation26_spill] sm:$0xff] }
 0x3b6   : > { %5979 = vrcp.f32 %v1952_v19 }
 0x3b7   : > { %v2019_v26 = vpack.c.bf16 %v2003_v53, %v2003_v53 }
 0x3b8   : > { %2436 = vrot.lane.b32.xlu1 %v6962_v47, %s6568_s9 }
 0x3b9   : > { %v2043_v22 = vunpack.c.l.b16 %v2019_v26 }
 0x3bc   : > { %v5980_v12 = vpop.eup %5979  ;;  %2711 = vrot.lane.b32.xlu0 %v6910_v37, %s6568_s9 }
 0x3bd   : > { %v2004_v6 = vmul.f32 %v5980_v12, %v7467_v17  ;;  %v1955_v60 = vpop.xlane.xlu0 %1954  ;;  %v9041_v17 = vld [vmem:[#allocation22_spill] sm:$0xff] }
 0x3be   : > { %5981 = vrcp.f32 %v1955_v60 }
 0x3bf   : > { %v2020_v33 = vpack.c.bf16 %v2004_v6, %v2004_v6  ;;  %v1961_v56 = vpop.xlane.xlu1 %1960 }
 0x3c0   : > { %2428 = vrot.lane.b32.xlu1 %v6988_v45, %s6568_s9 }
 0x3c1   : > { %v2044_v61 = vunpack.c.l.b16 %v2020_v33 }
 0x3c3   : > { %v2049_v23 = vpack.c.b16 %v2044_v61, %v2043_v22 }
 0x3c4   : > { %2950 = vrot.lane.b32.xlu0 %v6850_v0, %s6569_s14  ;;  %v5982_v4 = vpop.eup %5981 }
 0x3c5   : > { %5397 = vmatmul.msk.bf16.gmra.mxu0 %vm1326_vm1, %v2049_v23  ;;  %v2005_v46 = vmul.f32 %v5982_v4, %v7481_v54  ;;  %v2127_v54 = vpop.permute.xlu2 %2126 }
 0x3c7   : > { %v1958_v39 = vpop.xlane.xlu1 %1957  ;;  %v2021_v31 = vpack.c.bf16 %v2005_v46, %v2005_v46 }
 0x3c8   : > { %5983 = vrcp.f32 %v1958_v39  ;;  %2962 = vrot.lane.b32.xlu1 %v9041_v17, %s6569_s14  ;;  %v9044_v39 = vld [vmem:[#allocation21_spill] sm:$0xff] }
 0x3c9   : > { %5985 = vpow2.f32 %v1933_v1  ;;  %v2045_v26 = vunpack.c.l.b16 %v2021_v31  ;;  %v9045_v1 = vld [vmem:[#allocation37_spill] sm:$0xff] }
 0x3ca   : > { %5987 = vrcp.f32 %v1961_v56 }
 0x3cb   : > { %5989 = vrcp.f32 %v1964_v27 }
 0x3cc   : > { %3029 = vrot.lane.b32.xlu0 %v6839_v34, %s6569_s14  ;;  %v2084_v49 = vpop.f32.mrf.mxu0 }
 0x3ce   : > { %v5984_v0 = vpop.eup %5983 }
 0x3cf   : > { %v2006_v19 = vmul.f32 %v5984_v0, %v7497_v14  ;;  %v7615_v6 = vpop.eup %5985  ;;  %v9043_v14 = vld [vmem:[#allocation25_spill] sm:$0xff] }
 0x3d0   : > { %2713 = vrot.lane.b32.xlu1 %v9042_v55, %s6568_s9  ;;  %v5988_v33 = vpop.eup %5987  ;;  %v1980_v60 = vsel %vm1326_vm1, %v7615_v6, 0.0 }
 0x3d1   : > { %v2022_v53 = vpack.c.bf16 %v2006_v19, %v2006_v19  ;;  %v2007_v56 = vmul.f32 %v5988_v33, %v7486_v20  ;;  %v1900_v20 = vsub.f32 %v7336_v41, %v7511_v42 }
 0x3d3   : > { %v2046_v12 = vunpack.c.l.b16 %v2022_v53  ;;  %v2023_v4 = vpack.c.bf16 %v2007_v56, %v2007_v56  ;;  %v1929_v31 = vmul.f32 1.442695, %v1900_v20  ;;  %v9046_v53 = vld [vmem:[#allocation33_spill] sm:$0xff] }
 0x3d4   : > { %2954 = vrot.lane.b32.xlu0 %v6894_v16, %s6569_s14  ;;  %v2086_v28 = vpop.f32.mrf.mxu0  ;;  %v5990_v16 = vpop.eup %5989 }
 0x3d5   : > { %v2177_v34 = vpack.c.bf16 %v2086_v28, %v2084_v49  ;;  %v2050_v50 = vpack.c.b16 %v2046_v12, %v2045_v26  ;;  %v2008_v61 = vmul.f32 %v5990_v16, %v7440_v24  ;;  %v2112_v52 = vunpack.c.l.b16 %v2023_v4  ;;  %v2125_v49 = vpop.permute.xlu0 %2124  ;;  %v9047_v28 = vld [vmem:[#allocation62_spill] sm:$0xff] }
 0x3d6   : > { %5991 = vpow2.f32 %v1929_v31  ;;  %v1901_v41 = vsub.f32 %v9047_v28, %v7554_v30 }
 0x3d7   : > { %5398 = vmatmul.msk.bf16.gmra.mxu0 %vm1326_vm1, %v2050_v50  ;;  %5411 = vmatmul.msk.bf16.vlgmr.msra.gmra.mxu2 %vm1179_vm0, %v2177_v34  ;;  %v2024_v17 = vpack.c.bf16 %v2008_v61, %v2008_v61  ;;  %v9048_v34 = vld [vmem:[#allocation39_spill] sm:$0xff] }
 0x3d8   : > { %2709 = vrot.lane.b32.xlu1 %v9043_v14, %s6568_s9 }
 0x3d9   : > { %v2113_v46 = vunpack.c.l.b16 %v2024_v17 }
 0x3db   : > { %1981 = vadd.xlane.f32.xlu2 %v1980_v60  ;;  %v2120_v24 = vpack.c.b16 %v2113_v46, %v2112_v52 }
 0x3dc   : > { %v7642_v12 = vpop.eup %5991 }
 0x3dd   : > { %v7624_v22 = vpop.xlane.xlu2 %1972 }
 0x3df   : > { %v2129_v23 = vpop.permute.xlu1 %2128 }
 0x3e0   : > { %2948 = vrot.lane.b32.xlu1 %v9044_v39, %s6569_s14  ;;  %2153 = vmatpush.bf16.msra.mxu1 %v2129_v23 }
 0x3e4   : > { %2154 = vmatpush.bf16.msra.mxu1 %v2127_v54  ;;  %v1931_v54 = vmul.f32 1.442695, %v1901_v41 }
 0x3e5   : > { %v2439_v27 = vpop.permute.xlu2 %2438 }
 0x3e6   : > { %v2460_v28 = vsel %vm1179_vm0, %v2439_v27, 0 }
 0x3e7   : > { %5435 = vmatmul.msk.bf16.vlgmr.msrb.gmra.mxu0 %vm1179_vm0, %v9045_v1 }
 0x3e8   : > { %3031 = vrot.lane.b32.xlu1 %v6892_v11, %s6569_s14  ;;  %2155 = vmatpush.bf16.msra.mxu1 %v2125_v49  ;;  %v1974_v11 = vsel %vm1326_vm1, %v7642_v12, 0.0 }
 0x3eb   : > { %5399 = vmatmul.msk.bf16.vlgmr.msra.gmra.mxu1 %vm1326_vm1, %v2120_v24 }
 0x3ed   : > { %v7636_v0 = vpop.permute.xlu2 %2430 }
 0x3f5   : > { %v7638_v19 = vpop.permute.xlu2 %2960 }
 0x3f7   : > { %5436 = vmatmul.msk.bf16.gmra.mxu0 %vm1179_vm0, %v9046_v53 }
 0x3fb   : > { %v1967_v42 = vpop.xlane.xlu0 %1966 }
 0x3fc   : > { %5993 = vrcp.f32 %v1967_v42 }
 0x3fd   : > { %v2716_v26 = vpop.permute.xlu2 %2715  ;;  %5995 = vpow2.f32 %v1931_v54 }
 0x3fe   : > { %2737 = vmatpush.bf16.msra.mxu0 %v2716_v26  ;;  %1975 = vadd.xlane.f32.xlu0 %v1974_v11 }
 0x402   : > { %v5994_v33 = vpop.eup %5993 }
 0x403   : > { %v7650_v16 = vpop.eup %5995  ;;  %v2009_v56 = vmul.f32 %v5994_v33, %v7532_v9 }
 0x404   : > { %v1977_v39 = vsel %vm1326_vm1, %v7650_v16, 0.0 }
 0x405   : > { %v2025_v4 = vpack.c.bf16 %v2009_v56, %v2009_v56 }
 0x407   : > { %5437 = vmatmul.msk.bf16.gmra.mxu0 %vm1179_vm0, %v9048_v34  ;;  %v2114_v9 = vunpack.c.l.b16 %v2025_v4 }
 0x40a   : > { %v1970_v50 = vpop.xlane.xlu1 %1969 }
 0x40b   : > { %5997 = vrcp.f32 %v1970_v50 }
 0x40c   : > { %5999 = vrcp.f32 %v7624_v22 }
 0x40d   : > { %v1679_v60 = vpop.f32.mrf.mxu1 }
 0x40e   : > { %v2443_v61 = vpop.permute.xlu0 %2442 }
 0x40f   : > { %v2466_v23 = vsel %vm1179_vm0, %v2443_v61, 0  ;;  %v2983_v61 = vsel %vm1179_vm0, %v7638_v19, 0 }
 0x410   : > { %2472 = vmatpush.bf16.xpose.msrb.mxu1 %v2466_v23 }
 0x411   : > { %v5998_v30 = vpop.eup %5997 }
 0x412   : > { %v2010_v17 = vmul.f32 %v5998_v30, %v7551_v29  ;;  %1978 = vadd.xlane.f32.xlu1 %v1977_v39  ;;  %3025 = vrot.lane.b32.xlu0 %v6962_v47, %s6569_s14 }
 0x414   : > { %v2026_v52 = vpack.c.bf16 %v2010_v17, %v2010_v17 }
 0x415   : > { %v1681_v46 = vpop.f32.mrf.mxu1 }
 0x416   : > { %v2115_v49 = vunpack.c.l.b16 %v2026_v52  ;;  %v1695_v1 = vpack.c.bf16 %v1681_v46, %v1679_v60  ;;  %v7664_v26 = vpop.permute.xlu0 %2432  ;;  %v2957_v52 = vpop.permute.xlu2 %2956 }
 0x417   : > { %5438 = vmatmul.msk.bf16.gmra.mxu0 %vm1179_vm0, %v7525_v8 }
 0x418   : > { %5433 = vmatmul.msk.bf16.gmra.mxu3 %vm1179_vm0, %v1695_v1  ;;  %v2121_v24 = vpack.c.b16 %v2115_v49, %v2114_v9  ;;  %v2977_v49 = vsel %vm1179_vm0, %v2957_v52, 0 }
 0x41a   : > { %5400 = vmatmul.msk.bf16.gmra.mxu1 %vm1326_vm1, %v2121_v24 }
 0x41d   : > { %v1684_v20 = vpop.f32.mrf.mxu1 }
 0x41e   : > { %v2959_v8 = vpop.permute.xlu0 %2958 }
 0x41f   : > { %v2980_v4 = vsel %vm1179_vm0, %v2959_v8, 0 }
 0x422   : > { %v2441_v31 = vpop.permute.xlu1 %2440 }
 0x423   : > { %v2463_v29 = vsel %vm1179_vm0, %v2441_v31, 0 }
 0x424   : > { %2473 = vmatpush.bf16.xpose.msrb.mxu1 %v2463_v29  ;;  %v2953_v29 = vpop.permute.xlu2 %2952 }
 0x425   : > { %v1686_v53 = vpop.f32.mrf.mxu1 }
 0x426   : > { %v1696_v47 = vpack.c.bf16 %v1686_v53, %v1684_v20  ;;  %v7674_v56 = vpop.permute.xlu0 %2434 }
 0x428   : > { %5434 = vmatmul.msk.bf16.gmra.mxu3 %vm1179_vm0, %v1696_v47 }
 0x42a   : > { %v2437_v11 = vpop.permute.xlu1 %2436 }
 0x42b   : > { %3017 = vrot.lane.b32.xlu1 %v6988_v45, %s6569_s14  ;;  %v2457_v54 = vsel %vm1179_vm0, %v2437_v11, 0 }
 0x42c   : > { %2474 = vmatpush.bf16.xpose.msrb.mxu1 %v2460_v28  ;;  %v3028_v8 = vpop.permute.xlu2 %3027 }
 0x42e   : > { %v2712_v23 = vpop.permute.xlu0 %2711 }
 0x432   : > { %v7670_v41 = vpop.permute.xlu1 %2428  ;;  %v2089_v42 = vpop.f32.mrf.mxu0 }
 0x434   : > { %2475 = vmatpush.bf16.xpose.msrb.mxu1 %v2457_v54 }
 0x436   : > { %v2951_v19 = vpop.permute.xlu0 %2950 }
 0x43a   : > { %v2963_v34 = vpop.permute.xlu1 %2962  ;;  %v2091_v50 = vpop.f32.mrf.mxu0 }
 0x43b   : > { %v2986_v33 = vsel %vm1179_vm0, %v2963_v34, 0  ;;  %v2178_v60 = vpack.c.bf16 %v2091_v50, %v2089_v42  ;;  %v3049_v34 = vsel %vm1179_vm0, %v3028_v8, 0 }
 0x43c   : > { %2992 = vmatpush.bf16.xpose.msra.mxu3 %v2986_v33 }
 0x43d   : > { %5412 = vmatmul.msk.bf16.gmra.mxu2 %vm1179_vm0, %v2178_v60 }
 0x43e   : > { %v3030_v53 = vpop.permute.xlu0 %3029 }
 0x43f   : > { %v3052_v47 = vsel %vm1179_vm0, %v3030_v53, 0 }
 0x442   : > { %v2714_v27 = vpop.permute.xlu1 %2713  ;;  %v2094_v45 = vpop.f32.mrf.mxu0 }
 0x443   : > { %2738 = vmatpush.bf16.msra.mxu0 %v2714_v27 }
 0x444   : > { %2993 = vmatpush.bf16.xpose.msra.mxu3 %v2983_v61  ;;  %v6000_v61 = vpop.eup %5999 }
 0x446   : > { %v2955_v54 = vpop.permute.xlu0 %2954 }
 0x447   : > { %2739 = vmatpush.bf16.msra.mxu0 %v2712_v23 }
 0x44a   : > { %v2710_v30 = vpop.permute.xlu1 %2709  ;;  %v2096_v39 = vpop.f32.mrf.mxu0 }
 0x44b   : > { %v2179_v17 = vpack.c.bf16 %v2096_v39, %v2094_v45  ;;  %2740 = vmatpush.bf16.msra.mxu0 %v2710_v30  ;;  %v2011_v30 = vmul.f32 %v6000_v61, %v7509_v38 }
 0x44c   : > { %2994 = vmatpush.bf16.xpose.msra.mxu3 %v2980_v4 }
 0x44d   : > { %5413 = vmatmul.msk.bf16.gmra.mxu2 %vm1179_vm0, %v2179_v17  ;;  %v2027_v4 = vpack.c.bf16 %v2011_v30, %v2011_v30 }
 0x452   : > { %v2949_v46 = vpop.permute.xlu1 %2948 }
 0x454   : > { %v2099_v1 = vpop.f32.mrf.mxu0  ;;  %2995 = vmatpush.bf16.xpose.msra.mxu3 %v2977_v49  ;;  %v2116_v49 = vunpack.c.l.b16 %v2027_v4 }
 0x45a   : > { %v3032_v9 = vpop.permute.xlu1 %3031 }
 0x45b   : > { %v3055_v24 = vsel %vm1179_vm0, %v3032_v9, 0  ;;  %5467 = vmatmul.msk.bf16.vlgmr.msra.gmra.mxu3 %vm1179_vm0, %v2949_v46 }
 0x45c   : > { %v2101_v20 = vpop.f32.mrf.mxu0  ;;  %3061 = vmatpush.bf16.xpose.msrb.mxu0 %v3055_v24 }
 0x45d   : > { %v2180_v31 = vpack.c.bf16 %v2101_v20, %v2099_v1  ;;  %v1982_v1 = vpop.xlane.xlu2 %1981 }
 0x45f   : > { %5414 = vmatmul.msk.bf16.gmra.mxu2 %vm1179_vm0, %v2180_v31 }
 0x464   : > { %v7686_v11 = vpop.f32.mrf.mxu0  ;;  %3062 = vmatpush.bf16.xpose.msrb.mxu0 %v3052_v47 }
 0x465   : > { %v2497_v28 = vsel %vm1326_vm1, %v7686_v11, -inf }
 0x466   : > { %2498 = vmax.xlane.f32.xlu0 %v2497_v28 }
 0x468   : > { %v2157_v42 = vpop.f32.mrf.mxu1 }
 0x46b   : > { %5468 = vmatmul.msk.bf16.gmra.mxu3 %vm1179_vm0, %v2951_v19 }
 0x46c   : > { %v7693_v50 = vpop.f32.mrf.mxu0  ;;  %3063 = vmatpush.bf16.xpose.msrb.mxu0 %v3049_v34 }
 0x46d   : > { %v2500_v33 = vsel %vm1326_vm1, %v7693_v50, -inf }
 0x46e   : > { %2501 = vmax.xlane.f32.xlu2 %v2500_v33 }
 0x470   : > { %v2159_v60 = vpop.f32.mrf.mxu1 }
 0x471   : > { %v2181_v27 = vpack.c.bf16 %v2159_v60, %v2157_v42  ;;  %v1976_v45 = vpop.xlane.xlu0 %1975 }
 0x472   : > { %6001 = vrcp.f32 %v1976_v45 }
 0x473   : > { %5415 = vmatmul.msk.bf16.gmra.mxu2 %vm1179_vm0, %v2181_v27  ;;  %6003 = vrcp.f32 %v1982_v1 }
 0x474   : > { %v7698_v23 = vpop.f32.mrf.mxu0 }
 0x475   : > { %v2503_v22 = vsel %vm1326_vm1, %v7698_v23, -inf }
 0x476   : > { %2504 = vmax.xlane.f32.xlu1 %v2503_v22 }
 0x478   : > { %v6002_v39 = vpop.eup %6001 }
 0x479   : > { %v2012_v17 = vmul.f32 %v6002_v39, %v7642_v12  ;;  %v6004_v53 = vpop.eup %6003 }
 0x47a   : > { %v2014_v47 = vmul.f32 %v6004_v53, %v7615_v6 }
 0x47b   : > { %v2028_v52 = vpack.c.bf16 %v2012_v17, %v2012_v17  ;;  %5469 = vmatmul.msk.bf16.gmra.mxu3 %vm1179_vm0, %v2953_v29 }
 0x47c   : > { %v7705_v46 = vpop.f32.mrf.mxu0  ;;  %v2030_v42 = vpack.c.bf16 %v2014_v47, %v2014_v47 }
 0x47d   : > { %v2117_v19 = vunpack.c.l.b16 %v2028_v52  ;;  %v2506_v9 = vsel %vm1326_vm1, %v7705_v46, -inf }
 0x47e   : > { %2507 = vmax.xlane.f32.xlu0 %v2506_v9  ;;  %v2119_v27 = vunpack.c.l.b16 %v2030_v42 }
 0x47f   : > { %v2122_v38 = vpack.c.b16 %v2117_v19, %v2116_v49 }
 0x481   : > { %5401 = vmatmul.msk.bf16.gmra.mxu1 %vm1326_vm1, %v2122_v38 }
 0x484   : > { %v3026_v24 = vpop.permute.xlu0 %3025  ;;  %v7710_v20 = vpop.f32.mrf.mxu0 }
 0x485   : > { %v3046_v12 = vsel %vm1179_vm0, %v3026_v24, 0  ;;  %v1979_v31 = vpop.xlane.xlu1 %1978  ;;  %v2509_v29 = vsel %vm1326_vm1, %v7710_v20, -inf }
 0x486   : > { %6005 = vrcp.f32 %v1979_v31  ;;  %3064 = vmatpush.bf16.xpose.msrb.mxu0 %v3046_v12  ;;  %3019 = vrot.lane.b32.xlu2 %v6973_v58, %s6569_s14 }
 0x487   : > { %2510 = vmax.xlane.f32.xlu0 %v2509_v29 }
 0x48b   : > { %5470 = vmatmul.msk.bf16.gmra.mxu3 %vm1179_vm0, %v2955_v54 }
 0x48c   : > { %v6006_v28 = vpop.eup %6005  ;;  %v7719_v8 = vpop.f32.mrf.mxu0 }
 0x48d   : > { %v2013_v34 = vmul.f32 %v6006_v28, %v7650_v16  ;;  %v2512_v33 = vsel %vm1326_vm1, %v7719_v8, -inf }
 0x48f   : > { %v2029_v60 = vpack.c.bf16 %v2013_v34, %v2013_v34  ;;  %2513 = vmax.xlane.f32.xlu0 %v2512_v33 }
 0x491   : > { %v2118_v45 = vunpack.c.l.b16 %v2029_v60 }
 0x493   : > { %v2123_v61 = vpack.c.b16 %v2119_v27, %v2118_v45 }
 0x494   : > { %v7724_v58 = vpop.f32.mrf.mxu0 }
 0x495   : > { %5402 = vmatmul.msk.bf16.gmra.mxu1 %vm1326_vm1, %v2123_v61  ;;  %v2515_v39 = vsel %vm1326_vm1, %v7724_v58, -inf }
 0x497   : > { %v2162_v6 = vpop.f32.mrf.mxu1 }
 0x49c   : > { %v7727_v54 = vpop.f32.mrf.mxu0 }
 0x49d   : > { %v2518_v30 = vsel %vm1326_vm1, %v7727_v54, -inf  ;;  %v7743_v49 = vpop.permute.xlu1 %3017 }
 0x49e   : > { %2519 = vmax.xlane.f32.xlu0 %v2518_v30 }
 0x49f   : > { %v2164_v16 = vpop.f32.mrf.mxu1 }
 0x4a0   : > { %v2182_v22 = vpack.c.bf16 %v2164_v16, %v2162_v6 }
 0x4a2   : > { %5416 = vmatmul.msk.bf16.gmra.mxu2 %vm1179_vm0, %v2182_v22 }
 0x4a5   : > { %5439 = vmatmul.msk.bf16.vlgmr.msrb.gmra.mxu1 %vm1179_vm0, %v7670_v41 }
 0x4af   : > { %2516 = vmax.xlane.f32.xlu2 %v2515_v39 }
 0x4b5   : > { %5440 = vmatmul.msk.bf16.gmra.mxu1 %vm1179_vm0, %v7636_v0 }
 0x4c5   : > { %5441 = vmatmul.msk.bf16.gmra.mxu1 %vm1179_vm0, %v7664_v26 }
 0x4d5   : > { %5442 = vmatmul.msk.bf16.gmra.mxu1 %vm1179_vm0, %v7674_v56 }
 0x4d9   : > { %v2499_v4 = vpop.xlane.xlu0 %2498 }
 0x4da   : > { %v2545_v17 = vsub.f32 %v7686_v11, %v2499_v4 }
 0x4dc   : > { %v2561_v52 = vmul.f32 1.442695, %v2545_v17 }
 0x4de   : > { %6007 = vpow2.f32 %v2561_v52 }
 0x4e1   : > { %v2502_v41 = vpop.xlane.xlu2 %2501 }
 0x4e2   : > { %v2546_v1 = vsub.f32 %v7693_v50, %v2502_v41 }
 0x4e4   : > { %v7746_v19 = vpop.eup %6007  ;;  %v2563_v9 = vmul.f32 1.442695, %v2546_v1 }
 0x4e5   : > { %v2593_v0 = vsel %vm1326_vm1, %v7746_v19, 0.0 }
 0x4e6   : > { %6009 = vpow2.f32 %v2563_v9  ;;  %2594 = vadd.xlane.f32.xlu1 %v2593_v0 }
 0x4e9   : > { %v2505_v26 = vpop.xlane.xlu1 %2504  ;;  %v7780_v39 = vpop.permute.xlu2 %3019 }
 0x4ea   : > { %v2547_v56 = vsub.f32 %v7698_v23, %v2505_v26  ;;  %v7760_v23 = vpop.f32.mrf.mxu3 }
 0x4ec   : > { %v7751_v38 = vpop.eup %6009  ;;  %v2565_v11 = vmul.f32 1.442695, %v2547_v56 }
 0x4ed   : > { %v2596_v24 = vsel %vm1326_vm1, %v7751_v38, 0.0 }
 0x4ee   : > { %6011 = vpow2.f32 %v2565_v11  ;;  %2597 = vadd.xlane.f32.xlu2 %v2596_v24 }
 0x4f1   : > { %v2508_v50 = vpop.xlane.xlu0 %2507 }
 0x4f2   : > { %v2548_v12 = vsub.f32 %v7705_v46, %v2508_v50  ;;  %v7767_v60 = vpop.f32.mrf.mxu3 }
 0x4f3   : > { %9049 = vst [vmem:[#allocation22_spill] sm:$0xff] %v7767_v60 }
 0x4f4   : > { %v7756_v31 = vpop.eup %6011  ;;  %v2567_v29 = vmul.f32 1.442695, %v2548_v12 }
 0x4f5   : > { %v2599_v53 = vsel %vm1326_vm1, %v7756_v31, 0.0 }
 0x4f6   : > { %6013 = vpow2.f32 %v2567_v29  ;;  %2600 = vadd.xlane.f32.xlu2 %v2599_v53 }
 0x4fa   : > { %v2511_v47 = vpop.xlane.xlu0 %2510 }
 0x4fb   : > { %v2549_v28 = vsub.f32 %v7710_v20, %v2511_v47  ;;  %v7774_v20 = vpop.f32.mrf.mxu3 }
 0x4fc   : > { %v7763_v42 = vpop.eup %6013 }
 0x4fd   : > { %v2569_v34 = vmul.f32 1.442695, %v2549_v28  ;;  %v2602_v33 = vsel %vm1326_vm1, %v7763_v42, 0.0 }
 0x4fe   : > { %v2167_v46 = vpop.f32.mrf.mxu1  ;;  %2603 = vadd.xlane.f32.xlu0 %v2602_v33 }
 0x4ff   : > { %6015 = vpow2.f32 %v2569_v34 }
 0x502   : > { %v2514_v22 = vpop.xlane.xlu0 %2513 }
 0x503   : > { %v7778_v16 = vpop.f32.mrf.mxu3  ;;  %v2550_v4 = vsub.f32 %v7719_v8, %v2514_v22 }
 0x504   : > { %9050 = vst [vmem:[#allocation26_spill] sm:$0xff] %v7778_v16 }
 0x505   : > { %v7769_v27 = vpop.eup %6015  ;;  %v2571_v41 = vmul.f32 1.442695, %v2550_v4 }
 0x506   : > { %v2169_v45 = vpop.f32.mrf.mxu1  ;;  %v2605_v61 = vsel %vm1326_vm1, %v7769_v27, 0.0 }
 0x507   : > { %v2183_v6 = vpack.c.bf16 %v2169_v45, %v2167_v46  ;;  %2606 = vadd.xlane.f32.xlu1 %v2605_v61  ;;  %6017 = vpow2.f32 %v2571_v41 }
 0x509   : > { %5417 = vmatmul.msk.bf16.gmra.mxu2 %vm1179_vm0, %v2183_v6 }
 0x50b   : > { %v7786_v1 = vpop.f32.mrf.mxu3 }
 0x50d   : > { %v7793_v56 = vpop.eup %6017 }
 0x511   : > { %v2520_v29 = vpop.xlane.xlu0 %2519 }
 0x512   : > { %v2172_v30 = vpop.f32.mrf.mxu1  ;;  %3021 = vrot.lane.b32.xlu0 %v6862_v7, %s6569_s14  ;;  %v2552_v47 = vsub.f32 %v7727_v54, %v2520_v29 }
 0x513   : > { %v7799_v24 = vpop.f32.mrf.mxu3 }
 0x514   : > { %9051 = vst [vmem:[#allocation25_spill] sm:$0xff] %v7799_v24  ;;  %v2575_v46 = vmul.f32 1.442695, %v2552_v47 }
 0x51a   : > { %v2174_v17 = vpop.f32.mrf.mxu1 }
 0x51b   : > { %v2184_v52 = vpack.c.bf16 %v2174_v17, %v2172_v30  ;;  %v7807_v53 = vpop.f32.mrf.mxu3 }
 0x51d   : > { %5418 = vmatmul.msk.bf16.gmra.mxu2 %vm1179_vm0, %v2184_v52 }
 0x520   : > { %3023 = vrot.lane.b32.xlu1 %v6908_v36, %s6569_s14  ;;  %v2608_v36 = vsel %vm1326_vm1, %v7793_v56, 0.0 }
 0x522   : > { %v7788_v9 = vpop.f32.mrf.mxu1  ;;  %v2517_v7 = vpop.xlane.xlu2 %2516 }
 0x523   : > { %v2551_v0 = vsub.f32 %v7724_v58, %v2517_v7  ;;  %v2521_v26 = vsel %vm1326_vm1, %v7788_v9, -inf  ;;  %v7816_v45 = vpop.f32.mrf.mxu3 }
 0x524   : > { %2522 = vmax.xlane.f32.xlu2 %v2521_v26  ;;  %9052 = vst [vmem:[#allocation21_spill] sm:$0xff] %v7816_v45 }
 0x525   : > { %v2573_v8 = vmul.f32 1.442695, %v2551_v0 }
 0x527   : > { %6019 = vpow2.f32 %v2573_v8 }
 0x528   : > { %6021 = vpow2.f32 %v2575_v46 }
 0x52a   : > { %v7795_v11 = vpop.f32.mrf.mxu1 }
 0x52b   : > { %v2524_v33 = vsel %vm1326_vm1, %v7795_v11, -inf  ;;  %v7826_v22 = vpop.f32.mrf.mxu3 }
 0x52c   : > { %2609 = vadd.xlane.f32.xlu2 %v2608_v36 }
 0x52d   : > { %v7801_v50 = vpop.eup %6019 }
 0x52e   : > { %v2611_v58 = vsel %vm1326_vm1, %v7801_v50, 0.0  ;;  %v7822_v54 = vpop.eup %6021 }
 0x52f   : > { %v2614_v30 = vsel %vm1326_vm1, %v7822_v54, 0.0 }
 0x532   : > { %v7803_v12 = vpop.f32.mrf.mxu1 }
 0x533   : > { %v2527_v17 = vsel %vm1326_vm1, %v7803_v12, -inf  ;;  %v7836_v7 = vpop.f32.mrf.mxu3 }
 0x534   : > { %2612 = vadd.xlane.f32.xlu2 %v2611_v58  ;;  %9053 = vst [vmem:[#allocation37_spill] sm:$0xff] %v7836_v7 }
 0x53a   : > { %v7810_v28 = vpop.f32.mrf.mxu1 }
 0x53b   : > { %v2530_v34 = vsel %vm1326_vm1, %v7810_v28, -inf  ;;  %v7844_v58 = vpop.f32.mrf.mxu3 }
 0x53c   : > { %2531 = vmax.xlane.f32.xlu2 %v2530_v34  ;;  %2525 = vmax.xlane.f32.xlu0 %v2524_v33 }
 0x542   : > { %v7818_v61 = vpop.f32.mrf.mxu1 }
 0x543   : > { %v2533_v6 = vsel %vm1326_vm1, %v7818_v61, -inf  ;;  %v7847_v46 = vpop.f32.mrf.mxu3 }
 0x544   : > { %2534 = vmax.xlane.f32.xlu0 %v2533_v6  ;;  %9054 = vst [vmem:[#allocation33_spill] sm:$0xff] %v7847_v46 }
 0x54a   : > { %2615 = vadd.xlane.f32.xlu1 %v2614_v30  ;;  %v7828_v4 = vpop.f32.mrf.mxu1 }
 0x54b   : > { %v2536_v26 = vsel %vm1326_vm1, %v7828_v4, -inf }
 0x552   : > { %2528 = vmax.xlane.f32.xlu1 %v2527_v17  ;;  %v7832_v52 = vpop.f32.mrf.mxu1 }
 0x553   : > { %v2539_v41 = vsel %vm1326_vm1, %v7832_v52, -inf }
 0x554   : > { %2540 = vmax.xlane.f32.xlu2 %v2539_v41 }
 0x559   : > { %v2595_v0 = vpop.xlane.xlu1 %2594 }
 0x55a   : > { %2537 = vmax.xlane.f32.xlu1 %v2536_v26  ;;  %v7840_v8 = vpop.f32.mrf.mxu1  ;;  %6023 = vrcp.f32 %v2595_v0 }
 0x55b   : > { %v2542_v36 = vsel %vm1326_vm1, %v7840_v8, -inf }
 0x55c   : > { %2543 = vmax.xlane.f32.xlu0 %v2542_v36  ;;  %v7850_v36 = vpop.f32.mrf.mxu3 }
 0x55d   : > { %9055 = vst [vmem:[#allocation62_spill] sm:$0xff] %v7850_v36 }
 0x560   : > { %v6024_v47 = vpop.eup %6023 }
 0x561   : > { %v2598_v29 = vpop.xlane.xlu2 %2597  ;;  %v2657_v34 = vmul.f32 %v6024_v47, %v7746_v19 }
 0x562   : > { %6025 = vrcp.f32 %v2598_v29 }
 0x563   : > { %v2673_v6 = vpack.c.bf16 %v2657_v34, %v2657_v34 }
 0x565   : > { %v2697_v26 = vunpack.c.l.b16 %v2673_v6 }
 0x568   : > { %v6026_v33 = vpop.eup %6025 }
 0x569   : > { %v2658_v30 = vmul.f32 %v6026_v33, %v7751_v38  ;;  %v2601_v17 = vpop.xlane.xlu2 %2600 }
 0x56a   : > { %6027 = vrcp.f32 %v2601_v17 }
 0x56b   : > { %v2674_v41 = vpack.c.bf16 %v2658_v30, %v2658_v30  ;;  %v7857_v30 = vpop.f32.mrf.mxu3 }
 0x56c   : > { %9056 = vst [vmem:[#allocation39_spill] sm:$0xff] %v7857_v30 }
 0x56d   : > { %v2698_v45 = vunpack.c.l.b16 %v2674_v41 }
 0x56f   : > { %v2705_v0 = vpack.c.b16 %v2698_v45, %v2697_v26 }
 0x570   : > { %2788 = vrot.lane.b32.xlu0 %v7042_v44, %s6568_s9  ;;  %v6028_v29 = vpop.eup %6027 }
 0x571   : > { %5443 = vmatmul.msk.bf16.vlgmr.msra.gmra.mxu0 %vm1326_vm1, %v2705_v0  ;;  %v2604_v19 = vpop.xlane.xlu0 %2603  ;;  %v2659_v47 = vmul.f32 %v6028_v29, %v7756_v31 }
 0x572   : > { %6029 = vrcp.f32 %v2604_v19 }
 0x573   : > { %v2675_v38 = vpack.c.bf16 %v2659_v47, %v2659_v47  ;;  %v7860_v26 = vpop.f32.mrf.mxu3 }
 0x574   : > { %9057 = vst [vmem:[#allocation79_spill] sm:$0xff] %v7860_v26 }
 0x575   : > { %v2699_v45 = vunpack.c.l.b16 %v2675_v38 }
 0x578   : > { %v6030_v34 = vpop.eup %6029 }
 0x579   : > { %v2660_v33 = vmul.f32 %v6030_v34, %v7763_v42 }
 0x57a   : > { %v2607_v19 = vpop.xlane.xlu1 %2606 }
 0x57b   : > { %v2676_v6 = vpack.c.bf16 %v2660_v33, %v2660_v33  ;;  %v7862_v0 = vpop.f32.mrf.mxu3  ;;  %6031 = vrcp.f32 %v2607_v19 }
 0x57c   : > { %9058 = vst [vmem:[#allocation80_spill] sm:$0xff] %v7862_v0 }
 0x57d   : > { %v2700_v17 = vunpack.c.l.b16 %v2676_v6 }
 0x57f   : > { %v2706_v41 = vpack.c.b16 %v2700_v17, %v2699_v45 }
 0x581   : > { %5444 = vmatmul.msk.bf16.gmra.mxu0 %vm1326_vm1, %v2706_v41  ;;  %v6032_v38 = vpop.eup %6031 }
 0x582   : > { %v2661_v6 = vmul.f32 %v6032_v38, %v7769_v27 }
 0x583   : > { %v7864_v46 = vpop.f32.mrf.mxu3 }
 0x584   : > { %v3086_v42 = vsel %vm1326_vm1, %v7864_v46, -inf  ;;  %v2677_v41 = vpack.c.bf16 %v2661_v6, %v2661_v6 }
 0x592   : > { %v7884_v30 = vpop.permute.xlu1 %3023 }
 0x597   : > { %v2523_v31 = vpop.xlane.xlu2 %2522 }
 0x598   : > { %v2553_v29 = vsub.f32 %v7788_v9, %v2523_v31  ;;  %v7874_v9 = vpop.f32.mrf.mxu3  ;;  %v7876_v31 = vpop.permute.xlu0 %3021 }
 0x59a   : > { %v2577_v47 = vmul.f32 1.442695, %v2553_v29  ;;  %3087 = vmax.xlane.f32.xlu0 %v3086_v42 }
 0x59c   : > { %6033 = vpow2.f32 %v2577_v47  ;;  %v2701_v47 = vunpack.c.l.b16 %v2677_v41 }
 0x59f   : > { %v2610_v34 = vpop.xlane.xlu2 %2609 }
 0x5a0   : > { %6035 = vrcp.f32 %v2610_v34  ;;  %v7880_v38 = vpop.f32.mrf.mxu3 }
 0x5a2   : > { %v7869_v33 = vpop.eup %6033 }
 0x5a3   : > { %v2617_v45 = vsel %vm1326_vm1, %v7869_v33, 0.0 }
 0x5a4   : > { %2618 = vadd.xlane.f32.xlu1 %v2617_v45 }
 0x5a6   : > { %v6036_v17 = vpop.eup %6035 }
 0x5a7   : > { %v2662_v19 = vmul.f32 %v6036_v17, %v7793_v56  ;;  %v2613_v29 = vpop.xlane.xlu2 %2612 }
 0x5a8   : > { %v7888_v41 = vpop.f32.mrf.mxu3 }
 0x5a9   : > { %v2678_v42 = vpack.c.bf16 %v2662_v19, %v2662_v19 }
 0x5ab   : > { %v2702_v34 = vunpack.c.l.b16 %v2678_v42 }
 0x5ad   : > { %v2707_v24 = vpack.c.b16 %v2702_v34, %v2701_v47 }
 0x5af   : > { %v2532_v16 = vpop.xlane.xlu2 %2531  ;;  %5445 = vmatmul.msk.bf16.gmra.mxu0 %vm1326_vm1, %v2707_v24  ;;  %v2526_v27 = vpop.xlane.xlu0 %2525 }
 0x5b0   : > { %v2556_v45 = vsub.f32 %v7810_v28, %v2532_v16  ;;  %v2554_v60 = vsub.f32 %v7795_v11, %v2526_v27  ;;  %v7902_v47 = vpop.f32.mrf.mxu3 }
 0x5b2   : > { %v2583_v6 = vmul.f32 1.442695, %v2556_v45  ;;  %v2579_v0 = vmul.f32 1.442695, %v2554_v60 }
 0x5b4   : > { %6037 = vpow2.f32 %v2583_v6 }
 0x5b5   : > { %6039 = vpow2.f32 %v2579_v0 }
 0x5b6   : > { %6041 = vrcp.f32 %v2613_v29 }
 0x5b7   : > { %v2535_v56 = vpop.xlane.xlu0 %2534 }
 0x5b8   : > { %v2557_v24 = vsub.f32 %v7818_v61, %v2535_v56  ;;  %v3092_v61 = vsel %vm1326_vm1, %v7880_v38, -inf }
 0x5ba   : > { %v7886_v17 = vpop.eup %6037  ;;  %v2585_v0 = vmul.f32 1.442695, %v2557_v24 }
 0x5bb   : > { %v7891_v19 = vpop.eup %6039  ;;  %v2626_v16 = vsel %vm1326_vm1, %v7886_v17, 0.0 }
 0x5bc   : > { %2627 = vadd.xlane.f32.xlu0 %v2626_v16  ;;  %v2620_v60 = vsel %vm1326_vm1, %v7891_v19, 0.0  ;;  %v6042_v28 = vpop.eup %6041 }
 0x5bd   : > { %v2616_v11 = vpop.xlane.xlu1 %2615  ;;  %2621 = vadd.xlane.f32.xlu2 %v2620_v60  ;;  %2786 = vrot.lane.b32.xlu1 %v7044_v62, %s6568_s9  ;;  %v2663_v29 = vmul.f32 %v6042_v28, %v7801_v50  ;;  %v7912_v60 = vpop.f32.mrf.mxu3  ;;  %v5692_v28 = vld [vmem:[#allocation8 + $0x20] sm:$0xff] }
 0x5be   : > { %6043 = vrcp.f32 %v2616_v11  ;;  %v5693_v11 = vld [vmem:[#allocation8 + $0x28] sm:$0xff] }
 0x5bf   : > { %6045 = vpow2.f32 %v2585_v0  ;;  %v2679_v34 = vpack.c.bf16 %v2663_v29, %v2663_v29  ;;  %2889 = vmatpush.bf16.msrb.mxu2 %v5693_v11  ;;  %v3098_v11 = vsel %vm1326_vm1, %v7902_v47, -inf }
 0x5c1   : > { %v2703_v56 = vunpack.c.l.b16 %v2679_v34 }
 0x5c3   : > { %2890 = vmatpush.bf16.msrb.mxu2 %v5692_v28 }
 0x5c4   : > { %v6044_v42 = vpop.eup %6043  ;;  %3093 = vmax.xlane.f32.xlu0 %v3092_v61 }
 0x5c5   : > { %v2664_v27 = vmul.f32 %v6044_v42, %v7822_v54  ;;  %2782 = vrot.lane.b32.xlu1 %v7062_v25, %s6568_s9  ;;  %v7907_v6 = vpop.eup %6045  ;;  %v3101_v54 = vsel %vm1326_vm1, %v7912_v60, -inf  ;;  %v7918_v0 = vpop.f32.mrf.mxu3 }
 0x5c6   : > { %v2629_v16 = vsel %vm1326_vm1, %v7907_v6, 0.0  ;;  %v2529_v29 = vpop.xlane.xlu1 %2528  ;;  %v3104_v42 = vsel %vm1326_vm1, %v7918_v0, -inf }
 0x5c7   : > { %v2680_v45 = vpack.c.bf16 %v2664_v27, %v2664_v27  ;;  %v2555_v34 = vsub.f32 %v7803_v12, %v2529_v29 }
 0x5c9   : > { %v2704_v24 = vunpack.c.l.b16 %v2680_v45  ;;  %v2581_v27 = vmul.f32 1.442695, %v2555_v34 }
 0x5cb   : > { %v2708_v50 = vpack.c.b16 %v2704_v24, %v2703_v56  ;;  %6047 = vpow2.f32 %v2581_v27  ;;  %v7925_v56 = vpop.f32.mrf.mxu2 }
 0x5cc   : > { %2630 = vadd.xlane.f32.xlu0 %v2629_v16 }
 0x5cd   : > { %5446 = vmatmul.msk.bf16.gmra.mxu0 %vm1326_vm1, %v2708_v50 }
 0x5cf   : > { %v2544_v61 = vpop.xlane.xlu0 %2543 }
 0x5d1   : > { %v7927_v24 = vpop.eup %6047 }
 0x5d2   : > { %v2623_v16 = vsel %vm1326_vm1, %v7927_v24, 0.0 }
 0x5d4   : > { %3102 = vmax.xlane.f32.xlu0 %v3101_v54 }
 0x5d5   : > { %2784 = vrot.lane.b32.xlu2 %v7054_v63, %s6568_s9 }
 0x5dc   : > { %3105 = vmax.xlane.f32.xlu0 %v3104_v42  ;;  %v3095_v42 = vsel %vm1326_vm1, %v7888_v41, -inf }
 0x5dd   : > { %5471 = vmatmul.msk.bf16.vlgmr.msrb.gmra.mxu0 %vm1179_vm0, %v7743_v49  ;;  %v7935_v49 = vpop.f32.mrf.mxu2 }
 0x5de   : > { %9059 = vst [vmem:[#allocation81_spill] sm:$0xff] %v7935_v49 }
 0x5e2   : > { %v2789_v45 = vpop.permute.xlu0 %2788 }
 0x5e3   : > { %2810 = vmatpush.bf16.msra.mxu1 %v2789_v45  ;;  %v7951_v45 = vpop.f32.mrf.mxu3 }
 0x5e5   : > { %v7940_v28 = vpop.f32.mrf.mxu2 }
 0x5ed   : > { %5472 = vmatmul.msk.bf16.gmra.mxu0 %vm1179_vm0, %v7780_v39  ;;  %v3089_v39 = vsel %vm1326_vm1, %v7874_v9, -inf  ;;  %v7946_v29 = vpop.f32.mrf.mxu2 }
 0x5ee   : > { %v2742_v50 = vpop.f32.mrf.mxu0  ;;  %9060 = vst [vmem:[#allocation82_spill] sm:$0xff] %v7946_v29 }
 0x5ef   : > { %2624 = vadd.xlane.f32.xlu1 %v2623_v16 }
 0x5f0   : > { %3300 = vrot.lane.b32.xlu0 %v6910_v37, %s6569_s14 }
 0x5f6   : > { %v2744_v12 = vpop.f32.mrf.mxu0 }
 0x5f7   : > { %v2835_v54 = vpack.c.bf16 %v2744_v12, %v2742_v50  ;;  %3099 = vmax.xlane.f32.xlu1 %v3098_v11  ;;  %v7957_v50 = vpop.f32.mrf.mxu2  ;;  %v2538_v12 = vpop.xlane.xlu1 %2537 }
 0x5f9   : > { %5459 = vmatmul.msk.bf16.vlgmr.msrb.gmra.mxu2 %vm1179_vm0, %v2835_v54 }
 0x5fd   : > { %5473 = vmatmul.msk.bf16.gmra.mxu0 %vm1179_vm0, %v7876_v31  ;;  %v3107_v31 = vsel %vm1326_vm1, %v7951_v45, -inf }
 0x5fe   : > { %3090 = vmax.xlane.f32.xlu2 %v3089_v39  ;;  %v2747_v37 = vpop.f32.mrf.mxu0  ;;  %v2541_v39 = vpop.xlane.xlu2 %2540 }
 0x5ff   : > { %v7963_v16 = vpop.f32.mrf.mxu2 }
 0x600   : > { %9061 = vst [vmem:[#allocation83_spill] sm:$0xff] %v7963_v16 }
 0x606   : > { %3096 = vmax.xlane.f32.xlu2 %v3095_v42  ;;  %v2749_v34 = vpop.f32.mrf.mxu0 }
 0x607   : > { %v2836_v27 = vpack.c.bf16 %v2749_v34, %v2747_v37  ;;  %v7965_v11 = vpop.f32.mrf.mxu2  ;;  %v2560_v34 = vsub.f32 %v7840_v8, %v2544_v61 }
 0x609   : > { %5460 = vmatmul.msk.bf16.gmra.mxu2 %vm1179_vm0, %v2836_v27  ;;  %v2591_v16 = vmul.f32 1.442695, %v2560_v34 }
 0x60d   : > { %5474 = vmatmul.msk.bf16.gmra.mxu0 %vm1179_vm0, %v7884_v30  ;;  %v3088_v30 = vpop.xlane.xlu0 %3087 }
 0x60e   : > { %3108 = vmax.xlane.f32.xlu2 %v3107_v31 }
 0x60f   : > { %v7969_v37 = vpop.f32.mrf.mxu2 }
 0x610   : > { %3302 = vrot.lane.b32.xlu1 %v9042_v55, %s6569_s14  ;;  %9062 = vst [vmem:[#allocation84_spill] sm:$0xff] %v7969_v37 }
 0x617   : > { %v2619_v54 = vpop.xlane.xlu1 %2618 }
 0x618   : > { %3377 = vrot.lane.b32.xlu1 %v7042_v44, %s6569_s14  ;;  %6049 = vrcp.f32 %v2619_v54 }
 0x61e   : > { %v6050_v31 = vpop.eup %6049 }
 0x61f   : > { %v2665_v29 = vmul.f32 %v6050_v31, %v7869_v33 }
 0x621   : > { %v2681_v26 = vpack.c.bf16 %v2665_v29, %v2665_v29  ;;  %v2558_v29 = vsub.f32 %v7828_v4, %v2538_v12 }
 0x623   : > { %v2770_v36 = vunpack.c.l.b16 %v2681_v26 }
 0x626   : > { %3304 = vrot.lane.b32.xlu2 %v6964_v48, %s6569_s14  ;;  %v7976_v48 = vpop.f32.mrf.mxu2 }
 0x62c   : > { %v2752_v42 = vpop.f32.mrf.mxu0 }
 0x62e   : > { %3298 = vrot.lane.b32.xlu2 %v9043_v14, %s6569_s14  ;;  %v3134_v14 = vsub.f32 %v7864_v46, %v3088_v30  ;;  %v7982_v33 = vpop.f32.mrf.mxu2  ;;  %v2587_v30 = vmul.f32 1.442695, %v2558_v29 }
 0x62f   : > { %v2787_v55 = vpop.permute.xlu1 %2786  ;;  %v7973_v44 = vpop.xlane.xlu0 %2627 }
 0x630   : > { %v2622_v27 = vpop.xlane.xlu2 %2621  ;;  %2811 = vmatpush.bf16.msra.mxu1 %v2787_v55 }
 0x631   : > { %6051 = vrcp.f32 %v2622_v27  ;;  %v3150_v27 = vmul.f32 1.442695, %v3134_v14  ;;  %v2559_v14 = vsub.f32 %v7832_v52, %v2541_v39 }
 0x632   : > { %6053 = vpow2.f32 %v2591_v16 }
 0x633   : > { %6055 = vpow2.f32 %v3150_v27 }
 0x634   : > { %v2754_v37 = vpop.f32.mrf.mxu0 }
 0x635   : > { %v2837_v54 = vpack.c.bf16 %v2754_v37, %v2752_v42 }
 0x637   : > { %v6052_v49 = vpop.eup %6051  ;;  %v3094_v7 = vpop.xlane.xlu0 %3093  ;;  %5461 = vmatmul.msk.bf16.gmra.mxu2 %vm1179_vm0, %v2837_v54 }
 0x638   : > { %v2666_v8 = vmul.f32 %v6052_v49, %v7891_v19  ;;  %v2785_v61 = vpop.permute.xlu2 %2784  ;;  %v2783_v18 = vpop.permute.xlu1 %2782  ;;  %v3136_v46 = vsub.f32 %v7880_v38, %v3094_v7 }
 0x639   : > { %2812 = vmatpush.bf16.msra.mxu1 %v2785_v61  ;;  %v7984_v37 = vpop.eup %6053  ;;  %v7992_v49 = vpop.f32.mrf.mxu2 }
 0x63a   : > { %v2682_v55 = vpack.c.bf16 %v2666_v8, %v2666_v8  ;;  %v2638_v19 = vsel %vm1326_vm1, %v7984_v37, 0.0  ;;  %v3154_v26 = vmul.f32 1.442695, %v3136_v46 }
 0x63c   : > { %v2771_v34 = vunpack.c.l.b16 %v2682_v55  ;;  %6057 = vpow2.f32 %v3154_v26  ;;  %v2589_v55 = vmul.f32 1.442695, %v2559_v14 }
 0x63d   : > { %2813 = vmatpush.bf16.msra.mxu1 %v2783_v18  ;;  %v7995_v18 = vpop.eup %6055  ;;  %6059 = vpow2.f32 %v2587_v30 }
 0x63e   : > { %v2778_v42 = vpack.c.b16 %v2771_v34, %v2770_v36  ;;  %v3182_v7 = vsel %vm1326_vm1, %v7995_v18, 0.0 }
 0x63f   : > { %v7986_v31 = vpop.xlane.xlu0 %2630 }
 0x640   : > { %5447 = vmatmul.msk.bf16.vlgmr.msra.gmra.mxu1 %vm1326_vm1, %v2778_v42 }
 0x641   : > { %v8003_v61 = vpop.f32.mrf.mxu2 }
 0x642   : > { %2639 = vadd.xlane.f32.xlu1 %v2638_v19  ;;  %v8001_v8 = vpop.eup %6057  ;;  %9063 = vst [vmem:[#allocation85_spill] sm:$0xff] %v8003_v61 }
 0x643   : > { %v8008_v34 = vpop.eup %6059 }
 0x644   : > { %v2632_v39 = vsel %vm1326_vm1, %v8008_v34, 0.0 }
 0x647   : > { %v3103_v16 = vpop.xlane.xlu0 %3102 }
 0x648   : > { %v3139_v36 = vsub.f32 %v7912_v60, %v3103_v16  ;;  %v3188_v60 = vsel %vm1326_vm1, %v8001_v8, 0.0 }
 0x649   : > { %v8015_v19 = vpop.f32.mrf.mxu2 }
 0x64a   : > { %v2757_v38 = vpop.f32.mrf.mxu0  ;;  %3183 = vadd.xlane.f32.xlu1 %v3182_v7  ;;  %v3160_v54 = vmul.f32 1.442695, %v3139_v36 }
 0x64c   : > { %6061 = vpow2.f32 %v3160_v54 }
 0x64d   : > { %6063 = vpow2.f32 %v2589_v55 }
 0x64f   : > { %v3106_v4 = vpop.xlane.xlu0 %3105 }
 0x650   : > { %v3140_v12 = vsub.f32 %v7918_v0, %v3106_v4 }
 0x651   : > { %v8028_v30 = vpop.f32.mrf.mxu2 }
 0x652   : > { %v2759_v27 = vpop.f32.mrf.mxu0  ;;  %3189 = vadd.xlane.f32.xlu1 %v3188_v60  ;;  %v3162_v46 = vmul.f32 1.442695, %v3140_v12  ;;  %v8011_v52 = vpop.eup %6061 }
 0x653   : > { %v2838_v42 = vpack.c.bf16 %v2759_v27, %v2757_v38  ;;  %v3197_v0 = vsel %vm1326_vm1, %v8011_v52, 0.0  ;;  %v8021_v29 = vpop.eup %6063 }
 0x654   : > { %6065 = vpow2.f32 %v3162_v46  ;;  %v2635_v36 = vsel %vm1326_vm1, %v8021_v29, 0.0 }
 0x655   : > { %5462 = vmatmul.msk.bf16.gmra.mxu2 %vm1179_vm0, %v2838_v42  ;;  %6067 = vrcp.f32 %v7973_v44 }
 0x657   : > { %2633 = vadd.xlane.f32.xlu2 %v2632_v39 }
 0x659   : > { %v8035_v12 = vpop.f32.mrf.mxu2 }
 0x65a   : > { %v8019_v26 = vpop.f32.mrf.mxu0  ;;  %3198 = vadd.xlane.f32.xlu1 %v3197_v0  ;;  %v8024_v16 = vpop.eup %6065 }
 0x65b   : > { %v3200_v7 = vsel %vm1326_vm1, %v8024_v16, 0.0  ;;  %v6068_v14 = vpop.eup %6067 }
 0x65c   : > { %v2668_v4 = vmul.f32 %v6068_v14, %v7886_v17 }
 0x65e   : > { %v2684_v55 = vpack.c.bf16 %v2668_v4, %v2668_v4 }
 0x65f   : > { %2636 = vadd.xlane.f32.xlu2 %v2635_v36 }
 0x660   : > { %v2773_v46 = vunpack.c.l.b16 %v2684_v55 }
 0x662   : > { %v8032_v38 = vpop.f32.mrf.mxu0  ;;  %v2625_v54 = vpop.xlane.xlu1 %2624  ;;  %3201 = vadd.xlane.f32.xlu1 %v3200_v7 }
 0x663   : > { %6069 = vrcp.f32 %v2625_v54  ;;  %v8046_v54 = vpop.f32.mrf.mxu2 }
 0x664   : > { %9064 = vst [vmem:[#allocation86_spill] sm:$0xff] %v8046_v54 }
 0x669   : > { %v6070_v44 = vpop.eup %6069 }
 0x66a   : > { %v2667_v60 = vmul.f32 %v6070_v44, %v7927_v24  ;;  %v8038_v27 = vpop.f32.mrf.mxu0  ;;  %v3100_v24 = vpop.xlane.xlu1 %3099 }
 0x66c   : > { %v2683_v42 = vpack.c.bf16 %v2667_v60, %v2667_v60 }
 0x66e   : > { %v2772_v39 = vunpack.c.l.b16 %v2683_v42  ;;  %v3138_v42 = vsub.f32 %v7902_v47, %v3100_v24  ;;  %v3110_v24 = vsel %vm1326_vm1, %v8019_v26, -inf }
 0x670   : > { %v2779_v0 = vpack.c.b16 %v2773_v46, %v2772_v39 }
 0x671   : > { %v3091_v36 = vpop.xlane.xlu2 %3090 }
 0x672   : > { %v3135_v61 = vsub.f32 %v7874_v9, %v3091_v36  ;;  %v8041_v7 = vpop.f32.mrf.mxu0  ;;  %5448 = vmatmul.msk.bf16.gmra.mxu1 %vm1326_vm1, %v2779_v0  ;;  %v2320_v9 = vadd.f32 %v7760_v23, %v7925_v56  ;;  %v3158_v36 = vmul.f32 1.442695, %v3138_v42 }
 0x673   : > { %v3119_v17 = vsel %vm1326_vm1, %v8041_v7, -inf }
 0x674   : > { %v3152_v14 = vmul.f32 1.442695, %v3135_v61  ;;  %3120 = vmax.xlane.f32.xlu1 %v3119_v17 }
 0x676   : > { %6071 = vpow2.f32 %v3152_v14 }
 0x679   : > { %v3097_v4 = vpop.xlane.xlu2 %3096 }
 0x67a   : > { %v3137_v44 = vsub.f32 %v7888_v41, %v3097_v4  ;;  %v8049_v55 = vpop.f32.mrf.mxu0 }
 0x67c   : > { %v8053_v60 = vpop.eup %6071  ;;  %v3156_v46 = vmul.f32 1.442695, %v3137_v44  ;;  %v2892_v39 = vpop.f32.mrf.mxu2 }
 0x67d   : > { %v8056_v0 = vadd.f32 %v2892_v39, %v2320_v9  ;;  %v3185_v61 = vsel %vm1326_vm1, %v8053_v60, 0.0 }
 0x67e   : > { %6073 = vpow2.f32 %v3156_v46  ;;  %3186 = vadd.xlane.f32.xlu0 %v3185_v61 }
 0x67f   : > { %6075 = vpow2.f32 %v3158_v36 }
 0x681   : > { %v3109_v41 = vpop.xlane.xlu2 %3108 }
 0x682   : > { %v8060_v17 = vpop.f32.mrf.mxu0  ;;  %v3303_v14 = vpop.permute.xlu1 %3302  ;;  %v3141_v23 = vsub.f32 %v7951_v45, %v3109_v41  ;;  %v2325_v45 = vadd.f32 %v7774_v20, %v7940_v28 }
 0x684   : > { %v8062_v4 = vpop.eup %6073  ;;  %v8065_v47 = vpop.f32.mrf.mxu2  ;;  %v3164_v44 = vmul.f32 1.442695, %v3141_v23  ;;  %v3113_v23 = vsel %vm1326_vm1, %v8032_v38, -inf }
 0x685   : > { %9065 = vst [vmem:[#allocation87_spill] sm:$0xff] %v8065_v47  ;;  %v3191_v56 = vsel %vm1326_vm1, %v8062_v4, 0.0  ;;  %v8071_v42 = vpop.eup %6075 }
 0x686   : > { %3192 = vadd.xlane.f32.xlu2 %v3191_v56  ;;  %3111 = vmax.xlane.f32.xlu0 %v3110_v24  ;;  %6077 = vpow2.f32 %v3164_v44  ;;  %v3194_v41 = vsel %vm1326_vm1, %v8071_v42, 0.0  ;;  %v3301_v24 = vpop.permute.xlu0 %3300  ;;  %v3116_v44 = vsel %vm1326_vm1, %v8038_v27, -inf }
 0x687   : > { %6079 = vrcp.f32 %v7986_v31 }
 0x689   : > { %v3305_v9 = vpop.permute.xlu2 %3304 }
 0x68a   : > { %v8073_v46 = vpop.f32.mrf.mxu0  ;;  %3326 = vmatpush.bf16.msrb.mxu1 %v3305_v9  ;;  %v3378_v39 = vpop.permute.xlu1 %3377 }
 0x68b   : > { %3399 = vmatpush.bf16.msrb.mxu3 %v3378_v39 }
 0x68c   : > { %v2897_v61 = vpop.f32.mrf.mxu2  ;;  %v8083_v56 = vpop.eup %6077 }
 0x68d   : > { %v8077_v36 = vadd.f32 %v2897_v61, %v2325_v45  ;;  %v3203_v28 = vsel %vm1326_vm1, %v8083_v56, 0.0  ;;  %v3125_v45 = vsel %vm1326_vm1, %v8060_v17, -inf  ;;  %v3128_v61 = vsel %vm1326_vm1, %v8073_v46, -inf }
 0x68e   : > { %3195 = vadd.xlane.f32.xlu2 %v3194_v41  ;;  %3114 = vmax.xlane.f32.xlu0 %v3113_v23  ;;  %v2330_v23 = vadd.f32 %v7786_v1, %v7957_v50 }
 0x68f   : > { %3327 = vmatpush.bf16.msrb.mxu1 %v3303_v14  ;;  %v3122_v14 = vsel %vm1326_vm1, %v8049_v55, -inf }
 0x691   : > { %v3299_v39 = vpop.permute.xlu2 %3298 }
 0x692   : > { %v8085_v9 = vpop.f32.mrf.mxu0 }
 0x693   : > { %3328 = vmatpush.bf16.msrb.mxu1 %v3301_v24  ;;  %v3131_v20 = vsel %vm1326_vm1, %v8085_v9, -inf }
 0x694   : > { %3132 = vmax.xlane.f32.xlu1 %v3131_v20  ;;  %v8101_v41 = vpop.f32.mrf.mxu2 }
 0x695   : > { %9066 = vst [vmem:[#allocation88_spill] sm:$0xff] %v8101_v41 }
 0x696   : > { %3204 = vadd.xlane.f32.xlu2 %v3203_v28  ;;  %3117 = vmax.xlane.f32.xlu0 %v3116_v44 }
 0x697   : > { %3329 = vmatpush.bf16.msrb.mxu1 %v3299_v39 }
 0x69e   : > { %3123 = vmax.xlane.f32.xlu2 %v3122_v14  ;;  %3126 = vmax.xlane.f32.xlu0 %v3125_v45  ;;  %v6080_v45 = vpop.eup %6079 }
 0x6a6   : > { %3129 = vmax.xlane.f32.xlu0 %v3128_v61 }
 0x6ad   : > { %3371 = vrot.lane.b32.xlu1 %v7062_v25, %s6569_s14  ;;  %v2669_v25 = vmul.f32 %v6080_v45, %v7907_v6 }
 0x6af   : > { %v2685_v47 = vpack.c.bf16 %v2669_v25, %v2669_v25 }
 0x6b1   : > { %v2774_v31 = vunpack.c.l.b16 %v2685_v47 }
 0x6b5   : > { %v2640_v1 = vpop.xlane.xlu1 %2639 }
 0x6ba   : > { %v2902_v24 = vpop.f32.mrf.mxu2 }
 0x6bb   : > { %v8105_v20 = vadd.f32 %v2902_v24, %v2330_v23 }
 0x6bd   : > { %v2815_v28 = vpop.f32.mrf.mxu1 }
 0x6c2   : > { %v8110_v61 = vpop.f32.mrf.mxu2 }
 0x6c5   : > { %v2817_v44 = vpop.f32.mrf.mxu1 }
 0x6c6   : > { %v2839_v39 = vpack.c.bf16 %v2817_v44, %v2815_v28  ;;  %v2335_v44 = vadd.f32 %v7807_v53, %v7965_v11 }
 0x6c8   : > { %5463 = vmatmul.msk.bf16.gmra.mxu2 %vm1179_vm0, %v2839_v39 }
 0x6ca   : > { %v2634_v14 = vpop.xlane.xlu2 %2633 }
 0x6cb   : > { %6081 = vrcp.f32 %v2634_v14 }
 0x6d1   : > { %v6082_v41 = vpop.eup %6081 }
 0x6d2   : > { %v2670_v50 = vmul.f32 %v6082_v41, %v8008_v34  ;;  %v2637_v23 = vpop.xlane.xlu2 %2636 }
 0x6d3   : > { %6083 = vrcp.f32 %v2637_v23 }
 0x6d4   : > { %v2686_v24 = vpack.c.bf16 %v2670_v50, %v2670_v50  ;;  %6085 = vrcp.f32 %v2640_v1  ;;  %v3184_v1 = vpop.xlane.xlu1 %3183 }
 0x6d5   : > { %6087 = vrcp.f32 %v3184_v1 }
 0x6d6   : > { %v2775_v28 = vunpack.c.l.b16 %v2686_v24 }
 0x6d8   : > { %v2907_v39 = vpop.f32.mrf.mxu2  ;;  %v2780_v14 = vpack.c.b16 %v2775_v28, %v2774_v31 }
 0x6d9   : > { %v6084_v54 = vpop.eup %6083  ;;  %v8115_v6 = vadd.f32 %v2907_v39, %v2335_v44 }
 0x6da   : > { %5449 = vmatmul.msk.bf16.gmra.mxu1 %vm1326_vm1, %v2780_v14  ;;  %v6086_v45 = vpop.eup %6085  ;;  %v2671_v25 = vmul.f32 %v6084_v54, %v8021_v29 }
 0x6db   : > { %v2672_v34 = vmul.f32 %v6086_v45, %v7984_v37  ;;  %v6088_v28 = vpop.eup %6087 }
 0x6dc   : > { %v2687_v41 = vpack.c.bf16 %v2671_v25, %v2671_v25  ;;  %v3190_v53 = vpop.xlane.xlu1 %3189  ;;  %v3246_v44 = vmul.f32 %v6088_v28, %v7995_v18  ;;  %v5703_v28 = vld [vmem:[#allocation10 + $0x38] sm:$0xff] }
 0x6dd   : > { %v2688_v50 = vpack.c.bf16 %v2672_v34, %v2672_v34  ;;  %4401 = vmatpush.bf16.msra.mxu1 %v5703_v28 }
 0x6de   : > { %v2776_v47 = vunpack.c.l.b16 %v2687_v41  ;;  %v3262_v14 = vpack.c.bf16 %v3246_v44, %v3246_v44 }
 0x6df   : > { %v2777_v23 = vunpack.c.l.b16 %v2688_v50 }
 0x6e1   : > { %v2781_v24 = vpack.c.b16 %v2777_v23, %v2776_v47  ;;  %v3286_v47 = vunpack.c.l.b16 %v3262_v14 }
 0x6e4   : > { %v3199_v39 = vpop.xlane.xlu1 %3198 }
 0x6ea   : > { %5450 = vmatmul.msk.bf16.gmra.mxu1 %vm1326_vm1, %v2781_v24 }
 0x6ef   : > { %v2820_v11 = vpop.f32.mrf.mxu1 }
 0x6f1   : > { %v3187_v31 = vpop.xlane.xlu0 %3186 }
 0x6f2   : > { %6089 = vrcp.f32 %v3187_v31  ;;  %v3202_v31 = vpop.xlane.xlu1 %3201 }
 0x6f7   : > { %v2822_v29 = vpop.f32.mrf.mxu1 }
 0x6f8   : > { %v6090_v54 = vpop.eup %6089  ;;  %v2840_v37 = vpack.c.bf16 %v2822_v29, %v2820_v11 }
 0x6f9   : > { %v3247_v45 = vmul.f32 %v6090_v54, %v8053_v60  ;;  %v3193_v25 = vpop.xlane.xlu2 %3192  ;;  %v3112_v34 = vpop.xlane.xlu0 %3111 }
 0x6fa   : > { %6091 = vrcp.f32 %v3193_v25  ;;  %v3142_v41 = vsub.f32 %v8019_v26, %v3112_v34  ;;  %5464 = vmatmul.msk.bf16.gmra.mxu2 %vm1179_vm0, %v2840_v37  ;;  %v5701_v34 = vld [vmem:[#allocation10 + $0x28] sm:$0xff] }
 0x6fb   : > { %v3263_v50 = vpack.c.bf16 %v3247_v45, %v3247_v45  ;;  %6093 = vrcp.f32 %v3190_v53  ;;  %v5702_v45 = vld [vmem:[#allocation10 + $0x30] sm:$0xff] }
 0x6fc   : > { %v3166_v1 = vmul.f32 1.442695, %v3142_v41  ;;  %4402 = vmatpush.bf16.msra.mxu1 %v5702_v45 }
 0x6fd   : > { %v3287_v23 = vunpack.c.l.b16 %v3263_v50  ;;  %v8133_v50 = vpop.xlane.xlu1 %3120 }
 0x6fe   : > { %6095 = vpow2.f32 %v3166_v1  ;;  %v5700_v1 = vld [vmem:[#allocation10 + $0x20] sm:$0xff] }
 0x6ff   : > { %v3294_v18 = vpack.c.b16 %v3287_v23, %v3286_v47 }
 0x700   : > { %v6092_v24 = vpop.eup %6091  ;;  %4403 = vmatpush.bf16.msra.mxu1 %v5701_v34  ;;  %v9068_v34 = vld [vmem:[#allocation24_spill] sm:$0xff] }
 0x701   : > { %v3196_v11 = vpop.xlane.xlu2 %3195  ;;  %5475 = vmatmul.msk.bf16.vlgmr.msrb.gmra.mxu1 %vm1326_vm1, %v3294_v18  ;;  %v3115_v60 = vpop.xlane.xlu0 %3114  ;;  %v3249_v26 = vmul.f32 %v6092_v24, %v8062_v4 }
 0x702   : > { %v6094_v44 = vpop.eup %6093  ;;  %v3143_v29 = vsub.f32 %v8032_v38, %v3115_v60 }
 0x703   : > { %v3248_v37 = vmul.f32 %v6094_v44, %v8001_v8  ;;  %v3265_v25 = vpack.c.bf16 %v3249_v26, %v3249_v26  ;;  %v5699_v44 = vld [vmem:[#allocation10 + $0x18] sm:$0xff] }
 0x704   : > { %v8128_v54 = vpop.eup %6095  ;;  %v3168_v53 = vmul.f32 1.442695, %v3143_v29  ;;  %4404 = vmatpush.bf16.msra.mxu1 %v5700_v1  ;;  %v5697_v1 = vld [vmem:[#allocation10 + $0x8] sm:$0xff] }
 0x705   : > { %v3206_v14 = vsel %vm1326_vm1, %v8128_v54, 0.0  ;;  %v3264_v41 = vpack.c.bf16 %v3248_v37, %v3248_v37  ;;  %v3289_v4 = vunpack.c.l.b16 %v3265_v25 }
 0x706   : > { %6097 = vpow2.f32 %v3168_v53  ;;  %3207 = vadd.xlane.f32.xlu2 %v3206_v14  ;;  %v9067_v14 = vld [vmem:[#allocation23_spill] sm:$0xff] }
 0x707   : > { %6099 = vrcp.f32 %v3196_v11  ;;  %v3288_v8 = vunpack.c.l.b16 %v3264_v41  ;;  %v3133_v60 = vpop.xlane.xlu1 %3132  ;;  %v3537_v45 = vmul.f32 %v9067_v14, %v9067_v14  ;;  %v3541_v41 = vmul.f32 %v9068_v34, %v9068_v34 }
 0x708   : > { %6101 = vrcp.f32 %v3199_v39  ;;  %4405 = vmatpush.bf16.msra.mxu1 %v5699_v44  ;;  %v5698_v39 = vld [vmem:[#allocation10 + $0x10] sm:$0xff]  ;;  %v3149_v53 = vsub.f32 %v8085_v9, %v3133_v60 }
 0x709   : > { %v3205_v38 = vpop.xlane.xlu2 %3204  ;;  %v3295_v18 = vpack.c.b16 %v3289_v4, %v3288_v8 }
 0x70c   : > { %v8135_v47 = vpop.eup %6097  ;;  %4406 = vmatpush.bf16.msra.mxu1 %v5698_v39 }
 0x70d   : > { %v3209_v23 = vsel %vm1326_vm1, %v8135_v47, 0.0  ;;  %v6100_v24 = vpop.eup %6099 }
 0x70e   : > { %3210 = vadd.xlane.f32.xlu0 %v3209_v23  ;;  %v6102_v11 = vpop.eup %6101  ;;  %v3250_v26 = vmul.f32 %v6100_v24, %v8071_v42  ;;  %v3601_v42 = vmul.f32 %v3537_v45, %v9067_v14  ;;  %v3605_v23 = vmul.f32 %v3541_v41, %v9068_v34  ;;  %v9069_v45 = vld [vmem:[#allocation27_spill] sm:$0xff] }
 0x70f   : > { %v3251_v25 = vmul.f32 %v6102_v11, %v8011_v52 }
 0x710   : > { %v3266_v4 = vpack.c.bf16 %v3250_v26, %v3250_v26  ;;  %4407 = vmatpush.bf16.msra.mxu1 %v5697_v1  ;;  %v3665_v52 = vmul.f32 0.044715, %v3601_v42  ;;  %v3669_v44 = vmul.f32 0.044715, %v3605_v23  ;;  %v9070_v1 = vld [vmem:[#allocation28_spill] sm:$0xff] }
 0x711   : > { %v3124_v28 = vpop.xlane.xlu2 %3123  ;;  %5476 = vmatmul.msk.bf16.gmra.mxu1 %vm1326_vm1, %v3295_v18  ;;  %v3267_v8 = vpack.c.bf16 %v3251_v25, %v3251_v25  ;;  %v5696_v18 = vld [vmem:[#allocation10] sm:$0xff] }
 0x712   : > { %v3146_v29 = vsub.f32 %v8049_v55, %v3124_v28  ;;  %v3180_v55 = vmul.f32 1.442695, %v3149_v53  ;;  %v3290_v9 = vunpack.c.l.b16 %v3266_v4  ;;  %v3733_v39 = vadd.f32 %v3669_v44, %v9068_v34 }
 0x713   : > { %v3291_v60 = vunpack.c.l.b16 %v3267_v8 }
 0x714   : > { %v3174_v37 = vmul.f32 1.442695, %v3146_v29  ;;  %4408 = vmatpush.bf16.msra.mxu1 %v5696_v18  ;;  %v3729_v29 = vadd.f32 %v3665_v52, %v9067_v14  ;;  %v3797_v4 = vmul.f32 0.7978846, %v3733_v39  ;;  %v9071_v39 = vld [vmem:[#allocation29_spill] sm:$0xff] }
 0x715   : > { %v3296_v11 = vpack.c.b16 %v3291_v60, %v3290_v9  ;;  %v3118_v9 = vpop.xlane.xlu0 %3117 }
 0x716   : > { %6103 = vpow2.f32 %v3174_v37  ;;  %v3793_v37 = vmul.f32 0.7978846, %v3729_v29 }
 0x717   : > { %6105 = vrcp.f32 %v3205_v38 }
 0x718   : > { %6107 = vrcp.f32 %v3202_v31 }
 0x719   : > { %6109 = vpow2.f32 %v3180_v55  ;;  %v3549_v55 = vmul.f32 %v9070_v1, %v9070_v1 }
 0x71a   : > { %6111 = vtanh.f32 %v3793_v37 }
 0x71b   : > { %6113 = vtanh.f32 %v3797_v4 }
 0x71c   : > { %v8150_v24 = vpop.eup %6103 }
 0x71d   : > { %v3218_v28 = vsel %vm1326_vm1, %v8150_v24, 0.0  ;;  %v6106_v38 = vpop.eup %6105  ;;  %v3127_v4 = vpop.xlane.xlu0 %3126 }
 0x71e   : > { %3219 = vadd.xlane.f32.xlu1 %v3218_v28  ;;  %3375 = vrot.lane.b32.xlu2 %v7044_v62, %s6569_s14  ;;  %v6108_v31 = vpop.eup %6107  ;;  %v3253_v53 = vmul.f32 %v6106_v38, %v8083_v56  ;;  %v3545_v62 = vmul.f32 %v9069_v45, %v9069_v45  ;;  %v3613_v56 = vmul.f32 %v3549_v55, %v9070_v1 }
 0x71f   : > { %v8158_v26 = vpop.eup %6109  ;;  %v3252_v25 = vmul.f32 %v6108_v31, %v8024_v16 }
 0x720   : > { %v3227_v41 = vsel %vm1326_vm1, %v8158_v26, 0.0  ;;  %v3269_v42 = vpack.c.bf16 %v3253_v53, %v3253_v53  ;;  %v3677_v52 = vmul.f32 0.044715, %v3613_v56  ;;  %v6112_v60 = vpop.eup %6111  ;;  %v3553_v53 = vmul.f32 %v9071_v39, %v9071_v39 }
 0x721   : > { %5477 = vmatmul.msk.bf16.gmra.mxu1 %vm1326_vm1, %v3296_v11  ;;  %v3268_v8 = vpack.c.bf16 %v3252_v25, %v3252_v25  ;;  %v6114_v44 = vpop.eup %6113  ;;  %v3921_v31 = vadd.f32 1.0, %v6112_v60 }
 0x722   : > { %3373 = vrot.lane.b32.xlu0 %v7054_v63, %s6569_s14  ;;  %v3609_v63 = vmul.f32 %v3545_v62, %v9069_v45  ;;  %v3293_v23 = vunpack.c.l.b16 %v3269_v42  ;;  %v3741_v38 = vadd.f32 %v3677_v52, %v9070_v1  ;;  %v3925_v29 = vadd.f32 1.0, %v6114_v44  ;;  %v9072_v62 = vld [vmem:[#allocation30_spill] sm:$0xff] }
 0x723   : > { %v3292_v16 = vunpack.c.l.b16 %v3268_v8  ;;  %v3557_v25 = vmul.f32 %v9072_v62, %v9072_v62  ;;  %v3985_v42 = vmul.f32 0.5, %v3921_v31  ;;  %v3617_v8 = vmul.f32 %v3553_v53, %v9071_v39 }
 0x724   : > { %v3673_v18 = vmul.f32 0.044715, %v3609_v63  ;;  %v3805_v55 = vmul.f32 0.7978846, %v3741_v38  ;;  %v3989_v63 = vmul.f32 0.5, %v3925_v29 }
 0x725   : > { %v3297_v28 = vpack.c.b16 %v3293_v23, %v3292_v16  ;;  %v3621_v56 = vmul.f32 %v3557_v25, %v9072_v62  ;;  %v4049_v16 = vmul.f32 %v3985_v42, %v9067_v14  ;;  %v3681_v60 = vmul.f32 0.044715, %v3617_v8  ;;  %v3130_v38 = vpop.xlane.xlu0 %3129  ;;  %v5711_v14 = vld [vmem:[#allocation10 + $0x78] sm:$0xff]  ;;  %v8193_v25 = vpop.f32.mrf.mxu2 }
 0x726   : > { %3228 = vadd.xlane.f32.xlu1 %v3227_v41  ;;  %v3737_v11 = vadd.f32 %v3673_v18, %v9069_v45  ;;  %v3145_v41 = vsub.f32 %v8041_v7, %v8133_v50  ;;  %v3144_v18 = vsub.f32 %v8038_v27, %v3118_v9  ;;  %v4053_v52 = vmul.f32 %v3989_v63, %v9068_v34  ;;  %v9075_v63 = vld [vmem:[#allocation32_spill] sm:$0xff] }
 0x727   : > { %v3147_v7 = vsub.f32 %v8060_v17, %v3127_v4  ;;  %v3745_v29 = vadd.f32 %v3681_v60, %v9071_v39  ;;  %v3148_v27 = vsub.f32 %v8073_v46, %v3130_v38  ;;  %9073 = vst [vmem:[#allocation23_spill] sm:$0xff] %v8193_v25  ;;  %4450 = vmatpush.bf16.msra.mxu2 %v5711_v14  ;;  %v5709_v60 = vld [vmem:[#allocation10 + $0x68] sm:$0xff] }
 0x728   : > { %v3801_v37 = vmul.f32 0.7978846, %v3737_v11  ;;  %v3172_v23 = vmul.f32 1.442695, %v3145_v41  ;;  %v3170_v50 = vmul.f32 1.442695, %v3144_v18  ;;  %v4113_v11 = vpack.c.bf16 %v4053_v52, %v4049_v16 }
 0x729   : > { %v3809_v41 = vmul.f32 0.7978846, %v3745_v29  ;;  %v3565_v8 = vmul.f32 %v9075_v63, %v9075_v63 }
 0x72a   : > { %6115 = vtanh.f32 %v3801_v37  ;;  %v3176_v37 = vmul.f32 1.442695, %v3147_v7 }
 0x72b   : > { %6117 = vtanh.f32 %v3805_v55  ;;  %v9074_v55 = vld [vmem:[#allocation31_spill] sm:$0xff]  ;;  %v3629_v7 = vmul.f32 %v3565_v8, %v9075_v63 }
 0x72c   : > { %6119 = vpow2.f32 %v3172_v23  ;;  %v3561_v42 = vmul.f32 %v9074_v55, %v9074_v55  ;;  %v5710_v23 = vld [vmem:[#allocation10 + $0x70] sm:$0xff] }
 0x72d   : > { %6121 = vpow2.f32 %v3170_v50  ;;  %4451 = vmatpush.bf16.msra.mxu2 %v5710_v23  ;;  %v2340_v50 = vadd.f32 %v7826_v22, %v7976_v48  ;;  %v3693_v14 = vmul.f32 0.044715, %v3629_v7  ;;  %v5708_v48 = vld [vmem:[#allocation10 + $0x60] sm:$0xff] }
 0x72e   : > { %6123 = vpow2.f32 %v3176_v37 }
 0x72f   : > { %6125 = vtanh.f32 %v3809_v41 }
 0x730   : > { %v6116_v44 = vpop.eup %6115 }
 0x731   : > { %5478 = vmatmul.msk.bf16.gmra.mxu1 %vm1326_vm1, %v3297_v28  ;;  %v3685_v28 = vmul.f32 0.044715, %v3621_v56  ;;  %v6118_v31 = vpop.eup %6117  ;;  %v3929_v9 = vadd.f32 1.0, %v6116_v44  ;;  %v3178_v56 = vmul.f32 1.442695, %v3148_v27  ;;  %4452 = vmatpush.bf16.msra.mxu2 %v5709_v60  ;;  %v9077_v60 = vld [vmem:[#allocation35_spill] sm:$0xff] }
 0x732   : > { %v8191_v34 = vpop.eup %6119  ;;  %v3933_v17 = vadd.f32 1.0, %v6118_v31 }
 0x733   : > { %v3749_v53 = vadd.f32 %v3685_v28, %v9072_v62  ;;  %v3215_v46 = vsel %vm1326_vm1, %v8191_v34, 0.0  ;;  %v3993_v18 = vmul.f32 0.5, %v3929_v9  ;;  %v8201_v52 = vpop.eup %6121  ;;  %v3625_v28 = vmul.f32 %v3561_v42, %v9074_v55 }
 0x734   : > { %v3997_v16 = vmul.f32 0.5, %v3933_v17  ;;  %v8207_v44 = vpop.eup %6123  ;;  %v3212_v31 = vsel %vm1326_vm1, %v8201_v52, 0.0 }
 0x735   : > { %v3813_v4 = vmul.f32 0.7978846, %v3749_v53  ;;  %v3689_v37 = vmul.f32 0.044715, %v3625_v28  ;;  %v6126_v27 = vpop.eup %6125  ;;  %v3221_v22 = vsel %vm1326_vm1, %v8207_v44, 0.0  ;;  %4453 = vmatpush.bf16.msra.mxu2 %v5708_v48  ;;  %v3573_v28 = vmul.f32 %v9077_v60, %v9077_v60 }
 0x736   : > { %v4061_v29 = vmul.f32 %v3997_v16, %v9070_v1  ;;  %v3757_v1 = vadd.f32 %v3693_v14, %v9075_v63  ;;  %v3937_v42 = vadd.f32 1.0, %v6126_v27 }
 0x737   : > { %6127 = vtanh.f32 %v3813_v4  ;;  %v3753_v41 = vadd.f32 %v3689_v37, %v9074_v55  ;;  %v5707_v4 = vld [vmem:[#allocation10 + $0x58] sm:$0xff]  ;;  %v3637_v27 = vmul.f32 %v3573_v28, %v9077_v60 }
 0x738   : > { %6129 = vpow2.f32 %v3178_v56  ;;  %v3821_v7 = vmul.f32 0.7978846, %v3757_v1 }
 0x739   : > { %4454 = vmatpush.bf16.msra.mxu2 %v5707_v4  ;;  %v3817_v16 = vmul.f32 0.7978846, %v3753_v41  ;;  %v3701_v1 = vmul.f32 0.044715, %v3637_v27  ;;  %v9078_v27 = vld [vmem:[#allocation36_spill] sm:$0xff] }
 0x73b   : > { %6131 = vtanh.f32 %v3817_v16 }
 0x73c   : > { %6133 = vtanh.f32 %v3821_v7 }
 0x73d   : > { %v6128_v9 = vpop.eup %6127 }
 0x73e   : > { %v8217_v17 = vpop.eup %6129  ;;  %v3941_v56 = vadd.f32 1.0, %v6128_v9 }
 0x73f   : > { %v3224_v8 = vsel %vm1326_vm1, %v8217_v17, 0.0 }
 0x741   : > { %4409 = vmatmul.bf16.vlgmr.msra.gmra.mxu1 %v4113_v11  ;;  %v4057_v11 = vmul.f32 %v3993_v18, %v9069_v45  ;;  %v5706_v18 = vld [vmem:[#allocation10 + $0x50] sm:$0xff] }
 0x742   : > { %4455 = vmatpush.bf16.msra.mxu2 %v5706_v18 }
 0x743   : > { %v4117_v45 = vpack.c.bf16 %v4061_v29, %v4057_v11  ;;  %v4001_v11 = vmul.f32 0.5, %v3937_v42  ;;  %v4005_v29 = vmul.f32 0.5, %v3941_v56  ;;  %v5704_v42 = vld [vmem:[#allocation10 + $0x40] sm:$0xff] }
 0x745   : > { %v4065_v48 = vmul.f32 %v4001_v11, %v9071_v39  ;;  %v3765_v39 = vadd.f32 %v3701_v1, %v9077_v60 }
 0x747   : > { %3216 = vadd.xlane.f32.xlu2 %v3215_v46  ;;  %v9076_v46 = vld [vmem:[#allocation34_spill] sm:$0xff] }
 0x748   : > { %v3569_v23 = vmul.f32 %v9076_v46, %v9076_v46 }
 0x74a   : > { %v3633_v37 = vmul.f32 %v3569_v23, %v9076_v46 }
 0x74b   : > { %v2912_v38 = vpop.f32.mrf.mxu2 }
 0x74c   : > { %v8213_v53 = vadd.f32 %v2912_v38, %v2340_v50  ;;  %3213 = vadd.xlane.f32.xlu0 %v3212_v31  ;;  %v3538_v50 = vmul.f32 %v7449_v43, %v7449_v43  ;;  %v3542_v38 = vmul.f32 %v7459_v15, %v7459_v15  ;;  %v3697_v41 = vmul.f32 0.044715, %v3633_v37 }
 0x74e   : > { %v3602_v14 = vmul.f32 %v3538_v50, %v7449_v43  ;;  %v3606_v9 = vmul.f32 %v3542_v38, %v7459_v15  ;;  %v3761_v28 = vadd.f32 %v3697_v41, %v9076_v46  ;;  %v5695_v50 = vld [vmem:[#allocation8 + $0x38] sm:$0xff]  ;;  %v3546_v41 = vmul.f32 %v7470_v57, %v7470_v57 }
 0x74f   : > { %3222 = vadd.xlane.f32.xlu2 %v3221_v22  ;;  %v5705_v22 = vld [vmem:[#allocation10 + $0x48] sm:$0xff]  ;;  %3478 = vmatpush.bf16.msra.mxu0 %v5695_v50 }
 0x750   : > { %4456 = vmatpush.bf16.msra.mxu2 %v5705_v22  ;;  %v3666_v4 = vmul.f32 0.044715, %v3602_v14  ;;  %v3670_v56 = vmul.f32 0.044715, %v3606_v9  ;;  %v3825_v37 = vmul.f32 0.7978846, %v3761_v28  ;;  %v3577_v14 = vmul.f32 %v9078_v27, %v9078_v27 }
 0x751   : > { %4414 = vmatmul.bf16.gmra.mxu1 %v4117_v45  ;;  %v4069_v45 = vmul.f32 %v4005_v29, %v9072_v62  ;;  %v3829_v22 = vmul.f32 0.7978846, %v3765_v39  ;;  %v5694_v9 = vld [vmem:[#allocation8 + $0x30] sm:$0xff] }
 0x752   : > { %v3730_v62 = vadd.f32 %v3666_v4, %v7449_v43  ;;  %v3734_v38 = vadd.f32 %v3670_v56, %v7459_v15  ;;  %6135 = vtanh.f32 %v3825_v37 }
 0x753   : > { %v4121_v18 = vpack.c.bf16 %v4069_v45, %v4065_v48  ;;  %3479 = vmatpush.bf16.msra.mxu0 %v5694_v9  ;;  %6137 = vtanh.f32 %v3829_v22 }
 0x754   : > { %3225 = vadd.xlane.f32.xlu0 %v3224_v8  ;;  %v6132_v8 = vpop.eup %6131  ;;  %4457 = vmatpush.bf16.msra.mxu2 %v5704_v42  ;;  %v3794_v45 = vmul.f32 0.7978846, %v3730_v62  ;;  %v3798_v4 = vmul.f32 0.7978846, %v3734_v38  ;;  %v3550_v42 = vmul.f32 %v7488_v2, %v7488_v2 }
 0x755   : > { %v6134_v16 = vpop.eup %6133  ;;  %v3945_v11 = vadd.f32 1.0, %v6132_v8 }
 0x756   : > { %v3949_v29 = vadd.f32 1.0, %v6134_v16  ;;  %6139 = vtanh.f32 %v3794_v45  ;;  %v3610_v16 = vmul.f32 %v3546_v41, %v7470_v57 }
 0x757   : > { %v2825_v31 = vpop.f32.mrf.mxu1  ;;  %v4009_v1 = vmul.f32 0.5, %v3945_v11  ;;  %6141 = vtanh.f32 %v3798_v4 }
 0x758   : > { %v4013_v56 = vmul.f32 0.5, %v3949_v29  ;;  %v6136_v11 = vpop.eup %6135  ;;  %v3674_v38 = vmul.f32 0.044715, %v3610_v16 }
 0x759   : > { %v4073_v28 = vmul.f32 %v4009_v1, %v9074_v55  ;;  %v6138_v29 = vpop.eup %6137 }
 0x75a   : > { %v4077_v39 = vmul.f32 %v4013_v56, %v9075_v63  ;;  %v3738_v1 = vadd.f32 %v3674_v38, %v7470_v57  ;;  %v3953_v63 = vadd.f32 1.0, %v6136_v11  ;;  %v3554_v38 = vmul.f32 %v7501_v10, %v7501_v10 }
 0x75c   : > { %v4125_v22 = vpack.c.bf16 %v4077_v39, %v4073_v28  ;;  %v6140_v9 = vpop.eup %6139  ;;  %v4017_v11 = vmul.f32 0.5, %v3953_v63 }
 0x75d   : > { %v6142_v41 = vpop.eup %6141  ;;  %v3922_v16 = vadd.f32 1.0, %v6140_v9 }
 0x75e   : > { %v3926_v28 = vadd.f32 1.0, %v6142_v41 }
 0x75f   : > { %v2827_v23 = vpop.f32.mrf.mxu1  ;;  %v3986_v9 = vmul.f32 0.5, %v3922_v16  ;;  %v2345_v16 = vadd.f32 %v7844_v58, %v7992_v49 }
 0x760   : > { %v2841_v7 = vpack.c.bf16 %v2827_v23, %v2825_v31  ;;  %v9079_v31 = vld [vmem:[#allocation38_spill] sm:$0xff]  ;;  %v3641_v23 = vmul.f32 %v3577_v14, %v9078_v27 }
 0x761   : > { %4419 = vmatmul.bf16.gmra.mxu1 %v4121_v18  ;;  %v3581_v48 = vmul.f32 %v9079_v31, %v9079_v31 }
 0x762   : > { %5465 = vmatmul.msk.bf16.gmra.mxu2 %vm1179_vm0, %v2841_v7  ;;  %v3614_v7 = vmul.f32 %v3550_v42, %v7488_v2  ;;  %v3705_v50 = vmul.f32 0.044715, %v3641_v23  ;;  %v3957_v42 = vadd.f32 1.0, %v6138_v29  ;;  %v9080_v23 = vld [vmem:[#allocation40_spill] sm:$0xff]  ;;  %v3558_v29 = vmul.f32 %v7506_v40, %v7506_v40 }
 0x763   : > { %v3645_v18 = vmul.f32 %v3581_v48, %v9079_v31 }
 0x764   : > { %v3678_v37 = vmul.f32 0.044715, %v3614_v7  ;;  %v3769_v48 = vadd.f32 %v3705_v50, %v9078_v27  ;;  %v8265_v50 = vpop.f32.mrf.mxu2  ;;  %v3622_v63 = vmul.f32 %v3558_v29, %v7506_v40 }
 0x765   : > { %v3709_v62 = vmul.f32 0.044715, %v3645_v18  ;;  %v3585_v18 = vmul.f32 %v9080_v23, %v9080_v23 }
 0x766   : > { %v3742_v4 = vadd.f32 %v3678_v37, %v7488_v2  ;;  %v3833_v56 = vmul.f32 0.7978846, %v3769_v48  ;;  %v4021_v37 = vmul.f32 0.5, %v3957_v42  ;;  %v3990_v48 = vmul.f32 0.5, %v3926_v28 }
 0x767   : > { %v2830_v8 = vpop.f32.mrf.mxu1  ;;  %v3773_v55 = vadd.f32 %v3709_v62, %v9079_v31  ;;  %v3802_v62 = vmul.f32 0.7978846, %v3738_v1  ;;  %v4081_v1 = vmul.f32 %v4017_v11, %v9076_v46 }
 0x768   : > { %6143 = vtanh.f32 %v3833_v56  ;;  %v4050_v56 = vmul.f32 %v3986_v9, %v7449_v43 }
 0x769   : > { %v3837_v7 = vmul.f32 0.7978846, %v3773_v55  ;;  %v3618_v55 = vmul.f32 %v3554_v38, %v7501_v10 }
 0x76b   : > { %6145 = vtanh.f32 %v3837_v7 }
 0x76c   : > { %6147 = vtanh.f32 %v3802_v62  ;;  %v3682_v62 = vmul.f32 0.044715, %v3618_v55 }
 0x76e   : > { %v3746_v49 = vadd.f32 %v3682_v62, %v7501_v10 }
 0x76f   : > { %v2832_v14 = vpop.f32.mrf.mxu1 }
 0x770   : > { %v2842_v45 = vpack.c.bf16 %v2832_v14, %v2830_v8  ;;  %v9081_v8 = vld [vmem:[#allocation42_spill] sm:$0xff]  ;;  %v3806_v14 = vmul.f32 0.7978846, %v3742_v4  ;;  %v4085_v4 = vmul.f32 %v4021_v37, %v9077_v60 }
 0x771   : > { %4424 = vmatmul.bf16.gmra.mxu1 %v4125_v22  ;;  %v3589_v39 = vmul.f32 %v9081_v8, %v9081_v8  ;;  %v3649_v22 = vmul.f32 %v3585_v18, %v9080_v23  ;;  %v4054_v18 = vmul.f32 %v3990_v48, %v7459_v15 }
 0x772   : > { %5466 = vmatmul.msk.bf16.gmra.mxu2 %vm1179_vm0, %v2842_v45  ;;  %6149 = vtanh.f32 %v3806_v14  ;;  %v3686_v14 = vmul.f32 0.044715, %v3622_v63  ;;  %v4129_v29 = vpack.c.bf16 %v4085_v4, %v4081_v1  ;;  %v9082_v1 = vld [vmem:[#allocation44_spill] sm:$0xff] }
 0x773   : > { %v3653_v45 = vmul.f32 %v3589_v39, %v9081_v8  ;;  %v3713_v42 = vmul.f32 0.044715, %v3649_v22  ;;  %v6144_v39 = vpop.eup %6143  ;;  %v4114_v37 = vpack.c.bf16 %v4054_v18, %v4050_v56  ;;  %v3593_v63 = vmul.f32 %v9082_v1, %v9082_v1  ;;  %v9083_v18 = vld [vmem:[#allocation46_spill] sm:$0xff] }
 0x774   : > { %v6146_v11 = vpop.eup %6145  ;;  %v3961_v58 = vadd.f32 1.0, %v6144_v39  ;;  %v3562_v39 = vmul.f32 %v7513_v5, %v7513_v5 }
 0x775   : > { %v3717_v28 = vmul.f32 0.044715, %v3653_v45  ;;  %v6148_v25 = vpop.eup %6147  ;;  %v3777_v60 = vadd.f32 %v3713_v42, %v9080_v23  ;;  %v3965_v48 = vadd.f32 1.0, %v6146_v11  ;;  %v3750_v45 = vadd.f32 %v3686_v14, %v7506_v40 }
 0x776   : > { %v3930_v4 = vadd.f32 1.0, %v6148_v25  ;;  %v3566_v14 = vmul.f32 %v7522_v3, %v7522_v3  ;;  %v3657_v25 = vmul.f32 %v3593_v63, %v9082_v1 }
 0x777   : > { %v3781_v15 = vadd.f32 %v3717_v28, %v9081_v8  ;;  %v3841_v55 = vmul.f32 0.7978846, %v3777_v60  ;;  %v4025_v28 = vmul.f32 0.5, %v3961_v58  ;;  %v4029_v11 = vmul.f32 0.5, %v3965_v48 }
 0x778   : > { %v6150_v43 = vpop.eup %6149 }
 0x779   : > { %v3208_v41 = vpop.xlane.xlu2 %3207  ;;  %v3934_v42 = vadd.f32 1.0, %v6150_v43  ;;  %v3845_v56 = vmul.f32 0.7978846, %v3781_v15 }
 0x77b   : > { %v3998_v43 = vmul.f32 0.5, %v3934_v42 }
 0x77d   : > { %v2917_v7 = vpop.f32.mrf.mxu2 }
 0x77e   : > { %v8281_v38 = vadd.f32 %v2917_v7, %v2345_v16  ;;  %v3331_v46 = vpop.f32.mrf.mxu1  ;;  %v3597_v16 = vmul.f32 %v9083_v18, %v9083_v18  ;;  %v3810_v7 = vmul.f32 0.7978846, %v3746_v49  ;;  %v4089_v49 = vmul.f32 %v4025_v28, %v9078_v27 }
 0x780   : > { %v3661_v15 = vmul.f32 %v3597_v16, %v9083_v18 }
 0x781   : > { %4429 = vmatmul.bf16.gmra.mxu1 %v4129_v29  ;;  %v3376_v22 = vpop.permute.xlu2 %3375  ;;  %v3211_v9 = vpop.xlane.xlu0 %3210  ;;  %v3814_v29 = vmul.f32 0.7978846, %v3750_v45  ;;  %v4062_v45 = vmul.f32 %v3998_v43, %v7488_v2 }
 0x782   : > { %3400 = vmatpush.bf16.msrb.mxu3 %v3376_v22  ;;  %4458 = vmatmul.bf16.vlgmr.msra.gmra.mxu2 %v4114_v37  ;;  %6151 = vrcp.f32 %v3211_v9  ;;  %v3994_v37 = vmul.f32 0.5, %v3930_v4  ;;  %v3626_v22 = vmul.f32 %v3562_v39, %v7513_v5  ;;  %v3721_v9 = vmul.f32 0.044715, %v3657_v25 }
 0x783   : > { %6153 = vrcp.f32 %v3208_v41  ;;  %v3630_v41 = vmul.f32 %v3566_v14, %v7522_v3  ;;  %v3725_v63 = vmul.f32 0.044715, %v3661_v15 }
 0x784   : > { %6155 = vtanh.f32 %v3841_v55  ;;  %v4058_v48 = vmul.f32 %v3994_v37, %v7470_v57  ;;  %v3690_v42 = vmul.f32 0.044715, %v3626_v22 }
 0x785   : > { %6157 = vtanh.f32 %v3845_v56  ;;  %v3694_v39 = vmul.f32 0.044715, %v3630_v41  ;;  %v3789_v57 = vadd.f32 %v3725_v63, %v9083_v18 }
 0x786   : > { %v3333_v62 = vpop.f32.mrf.mxu1  ;;  %6159 = vtanh.f32 %v3810_v7  ;;  %v3754_v14 = vadd.f32 %v3690_v42, %v7513_v5 }
 0x787   : > { %v3424_v60 = vpack.c.bf16 %v3333_v62, %v3331_v46  ;;  %6161 = vtanh.f32 %v3814_v29  ;;  %v4093_v46 = vmul.f32 %v4029_v11, %v9079_v31  ;;  %v3785_v62 = vadd.f32 %v3721_v9, %v9082_v1 }
 0x788   : > { %v6152_v58 = vpop.eup %6151  ;;  %v4118_v11 = vpack.c.bf16 %v4062_v45, %v4058_v48  ;;  %v3818_v41 = vmul.f32 0.7978846, %v3754_v14 }
 0x789   : > { %5491 = vmatmul.msk.bf16.vlgmr.msra.gmra.mxu0 %vm1179_vm0, %v3424_v60  ;;  %v6154_v55 = vpop.eup %6153  ;;  %v3255_v56 = vmul.f32 %v6152_v58, %v8135_v47  ;;  %v4133_v27 = vpack.c.bf16 %v4093_v46, %v4089_v49  ;;  %v3758_v47 = vadd.f32 %v3694_v39, %v7522_v3  ;;  %v3849_v37 = vmul.f32 0.7978846, %v3785_v62 }
 0x78a   : > { %v6156_v4 = vpop.eup %6155  ;;  %v3254_v31 = vmul.f32 %v6154_v55, %v8128_v54  ;;  %v3853_v49 = vmul.f32 0.7978846, %v3789_v57  ;;  %v3570_v46 = vmul.f32 %v7527_v13, %v7527_v13  ;;  %v9084_v55 = vld [vmem:[#allocation77_spill] sm:$0xff] }
 0x78b   : > { %v6158_v7 = vpop.eup %6157  ;;  %v3969_v2 = vadd.f32 1.0, %v6156_v4  ;;  %v3271_v60 = vpack.c.bf16 %v3255_v56, %v3255_v56  ;;  %v3822_v45 = vmul.f32 0.7978846, %v3758_v47  ;;  %v3574_v63 = vmul.f32 %v9084_v55, %v9084_v55 }
 0x78c   : > { %v6160_v28 = vpop.eup %6159  ;;  %v3973_v25 = vadd.f32 1.0, %v6158_v7  ;;  %v3270_v15 = vpack.c.bf16 %v3254_v31, %v3254_v31  ;;  %6163 = vtanh.f32 %v3849_v37  ;;  %v3372_v7 = vpop.permute.xlu1 %3371 }
 0x78d   : > { %v6162_v29 = vpop.eup %6161  ;;  %v3938_v43 = vadd.f32 1.0, %v6160_v28  ;;  %v4033_v54 = vmul.f32 0.5, %v3969_v2  ;;  %v3360_v9 = vunpack.c.l.b16 %v3271_v60  ;;  %6165 = vtanh.f32 %v3853_v49 }
 0x78e   : > { %v3336_v16 = vpop.f32.mrf.mxu1  ;;  %v3942_v58 = vadd.f32 1.0, %v6162_v29  ;;  %v4037_v42 = vmul.f32 0.5, %v3973_v25  ;;  %v3359_v39 = vunpack.c.l.b16 %v3270_v15  ;;  %6167 = vtanh.f32 %v3818_v41 }
 0x78f   : > { %v4002_v56 = vmul.f32 0.5, %v3938_v43  ;;  %v3634_v28 = vmul.f32 %v3570_v46, %v7527_v13  ;;  %v4097_v31 = vmul.f32 %v4033_v54, %v9080_v23  ;;  %6169 = vtanh.f32 %v3822_v45 }
 0x790   : > { %v3367_v62 = vpack.c.b16 %v3360_v9, %v3359_v39  ;;  %v3582_v46 = vmul.f32 %v7560_v59, %v7560_v59 }
 0x791   : > { %4434 = vmatmul.bf16.gmra.mxu1 %v4133_v27  ;;  %v4006_v27 = vmul.f32 0.5, %v3942_v58  ;;  %v4066_v29 = vmul.f32 %v4002_v56, %v7501_v10  ;;  %v3698_v14 = vmul.f32 0.044715, %v3634_v28 }
 0x792   : > { %4463 = vmatmul.bf16.gmra.mxu2 %v4118_v11  ;;  %v3638_v11 = vmul.f32 %v3574_v63, %v9084_v55  ;;  %v6164_v2 = vpop.eup %6163  ;;  %v3646_v39 = vmul.f32 %v3582_v46, %v7560_v59 }
 0x793   : > { %v4070_v57 = vmul.f32 %v4006_v27, %v7506_v40  ;;  %v6166_v47 = vpop.eup %6165  ;;  %v3578_v40 = vmul.f32 %v7546_v51, %v7546_v51 }
 0x794   : > { %v3374_v22 = vpop.permute.xlu0 %3373  ;;  %v3702_v25 = vmul.f32 0.044715, %v3638_v11  ;;  %v6168_v43 = vpop.eup %6167  ;;  %v3981_v58 = vadd.f32 1.0, %v6166_v47 }
 0x795   : > { %3401 = vmatpush.bf16.msrb.mxu3 %v3374_v22  ;;  %v4122_v15 = vpack.c.bf16 %v4070_v57, %v4066_v29  ;;  %v6170_v23 = vpop.eup %6169  ;;  %v3762_v22 = vadd.f32 %v3698_v14, %v7527_v13  ;;  %v3946_v49 = vadd.f32 1.0, %v6168_v43 }
 0x796   : > { %v3338_v48 = vpop.f32.mrf.mxu1  ;;  %v3766_v10 = vadd.f32 %v3702_v25, %v9084_v55  ;;  %v3950_v54 = vadd.f32 1.0, %v6170_v23 }
 0x797   : > { %v3425_v4 = vpack.c.bf16 %v3338_v48, %v3336_v16  ;;  %v4101_v16 = vmul.f32 %v4037_v42, %v9081_v8  ;;  %v3977_v8 = vadd.f32 1.0, %v6164_v2  ;;  %v3826_v41 = vmul.f32 0.7978846, %v3762_v22 }
 0x798   : > { %v3830_v45 = vmul.f32 0.7978846, %v3766_v10  ;;  %v4010_v42 = vmul.f32 0.5, %v3946_v49  ;;  %v4014_v56 = vmul.f32 0.5, %v3950_v54 }
 0x799   : > { %3402 = vmatpush.bf16.msrb.mxu3 %v3372_v7  ;;  %5492 = vmatmul.msk.bf16.gmra.mxu0 %vm1179_vm0, %v3425_v4  ;;  %v4137_v37 = vpack.c.bf16 %v4101_v16, %v4097_v31  ;;  %v4041_v48 = vmul.f32 0.5, %v3977_v8  ;;  %v4045_v4 = vmul.f32 0.5, %v3981_v58  ;;  %v3642_v7 = vmul.f32 %v3578_v40, %v7546_v51 }
 0x79a   : > { %6171 = vtanh.f32 %v3826_v41  ;;  %v4078_v31 = vmul.f32 %v4014_v56, %v7522_v3  ;;  %v3710_v16 = vmul.f32 0.044715, %v3646_v39 }
 0x79b   : > { %v4105_v27 = vmul.f32 %v4041_v48, %v9082_v1  ;;  %6173 = vtanh.f32 %v3830_v45  ;;  %v4109_v28 = vmul.f32 %v4045_v4, %v9083_v18  ;;  %v3706_v11 = vmul.f32 0.044715, %v3642_v7  ;;  %v5719_v45 = vld [vmem:[#allocation10 + $0xb8] sm:$0xff]  ;;  %v5718_v7 = vld [vmem:[#allocation10 + $0xb0] sm:$0xff] }
 0x79c   : > { %5479 = vmatmul.msk.bf16.vlgmr.msrb.gmra.mxu3 %vm1326_vm1, %v3367_v62  ;;  %v4074_v62 = vmul.f32 %v4010_v42, %v7513_v5  ;;  %v3774_v25 = vadd.f32 %v3710_v16, %v7560_v59  ;;  %v3586_v5 = vmul.f32 %v7570_v35, %v7570_v35  ;;  %v5717_v16 = vld [vmem:[#allocation10 + $0xa8] sm:$0xff] }
 0x79d   : > { %v4141_v57 = vpack.c.bf16 %v4109_v28, %v4105_v27  ;;  %v3770_v47 = vadd.f32 %v3706_v11, %v7546_v51  ;;  %4499 = vmatpush.bf16.msra.mxu3 %v5719_v45  ;;  %v9087_v45 = vld [vmem:[#allocation61_spill] sm:$0xff] }
 0x79e   : > { %v3341_v60 = vpop.f32.mrf.mxu1  ;;  %v4126_v14 = vpack.c.bf16 %v4078_v31, %v4074_v62  ;;  %v3838_v3 = vmul.f32 0.7978846, %v3774_v25  ;;  %v3650_v10 = vmul.f32 %v3586_v5, %v7570_v35  ;;  %v3594_v62 = vmul.f32 %v7590_v32, %v7590_v32 }
 0x79f   : > { %v3834_v18 = vmul.f32 0.7978846, %v3770_v47 }
 0x7a0   : > { %v6172_v2 = vpop.eup %6171  ;;  %v3714_v41 = vmul.f32 0.044715, %v3650_v10 }
 0x7a1   : > { %4439 = vmatmul.bf16.gmra.mxu1 %v4137_v37  ;;  %v3954_v1 = vadd.f32 1.0, %v6172_v2  ;;  %6175 = vtanh.f32 %v3834_v18  ;;  %4500 = vmatpush.bf16.msra.mxu3 %v5718_v7  ;;  %v5716_v18 = vld [vmem:[#allocation10 + $0xa0] sm:$0xff] }
 0x7a2   : > { %4468 = vmatmul.bf16.gmra.mxu2 %v4122_v15  ;;  %v3590_v15 = vmul.f32 %v7578_v21, %v7578_v21  ;;  %6177 = vtanh.f32 %v3838_v3  ;;  %v3778_v56 = vadd.f32 %v3714_v41, %v7570_v35 }
 0x7a3   : > { %v4018_v22 = vmul.f32 0.5, %v3954_v1  ;;  %v3658_v1 = vmul.f32 %v3594_v62, %v7590_v32 }
 0x7a4   : > { %v3654_v49 = vmul.f32 %v3590_v15, %v7578_v21  ;;  %v3842_v28 = vmul.f32 0.7978846, %v3778_v56 }
 0x7a5   : > { %v4082_v54 = vmul.f32 %v4018_v22, %v7527_v13  ;;  %4501 = vmatpush.bf16.msra.mxu3 %v5717_v16 }
 0x7a6   : > { %v3343_v9 = vpop.f32.mrf.mxu1 }
 0x7a7   : > { %v3426_v63 = vpack.c.bf16 %v3343_v9, %v3341_v60  ;;  %v6174_v60 = vpop.eup %6173  ;;  %v3718_v9 = vmul.f32 0.044715, %v3654_v49  ;;  %v5715_v49 = vld [vmem:[#allocation10 + $0x98] sm:$0xff] }
 0x7a8   : > { %v3958_v37 = vadd.f32 1.0, %v6174_v60  ;;  %v6176_v46 = vpop.eup %6175 }
 0x7a9   : > { %5493 = vmatmul.msk.bf16.gmra.mxu0 %vm1179_vm0, %v3426_v63  ;;  %v6178_v63 = vpop.eup %6177  ;;  %v3782_v39 = vadd.f32 %v3718_v9, %v7578_v21  ;;  %v3962_v27 = vadd.f32 1.0, %v6176_v46  ;;  %4502 = vmatpush.bf16.msra.mxu3 %v5716_v18 }
 0x7aa   : > { %v4022_v8 = vmul.f32 0.5, %v3958_v37 }
 0x7ab   : > { %v4026_v25 = vmul.f32 0.5, %v3962_v27 }
 0x7ac   : > { %v4086_v40 = vmul.f32 %v4022_v8, %v9084_v55  ;;  %v3966_v55 = vadd.f32 1.0, %v6178_v63  ;;  %v3543_v63 = vmul.f32 %v9087_v45, %v9087_v45 }
 0x7ad   : > { %v4090_v15 = vmul.f32 %v4026_v25, %v7546_v51  ;;  %4503 = vmatpush.bf16.msra.mxu3 %v5715_v49  ;;  %v5714_v51 = vld [vmem:[#allocation10 + $0x90] sm:$0xff]  ;;  %v9089_v49 = vld [vmem:[#allocation64_spill] sm:$0xff] }
 0x7ae   : > { %v3346_v29 = vpop.f32.mrf.mxu1  ;;  %v4130_v4 = vpack.c.bf16 %v4086_v40, %v4082_v54 }
 0x7b1   : > { %4444 = vmatmul.bf16.gmra.mxu1 %v4141_v57  ;;  %v9085_v57 = vld [vmem:[#allocation78_spill] sm:$0xff]  ;;  %4504 = vmatpush.bf16.msra.mxu3 %v5714_v51 }
 0x7b2   : > { %4473 = vmatmul.bf16.gmra.mxu2 %v4126_v14  ;;  %v3598_v2 = vmul.f32 %v9085_v57, %v9085_v57  ;;  %v3220_v14 = vpop.xlane.xlu1 %3219 }
 0x7b4   : > { %v3662_v5 = vmul.f32 %v3598_v2, %v9085_v57 }
 0x7b6   : > { %v3348_v43 = vpop.f32.mrf.mxu1 }
 0x7b7   : > { %v3427_v23 = vpack.c.bf16 %v3348_v43, %v3346_v29  ;;  %v3846_v29 = vmul.f32 0.7978846, %v3782_v39 }
 0x7b9   : > { %5494 = vmatmul.msk.bf16.gmra.mxu0 %vm1179_vm0, %v3427_v23 }
 0x7ba   : > { %v3217_v58 = vpop.xlane.xlu2 %3216 }
 0x7bb   : > { %6179 = vrcp.f32 %v3217_v58  ;;  %v3726_v58 = vmul.f32 0.044715, %v3662_v5 }
 0x7bf   : > { %v3214_v48 = vpop.xlane.xlu0 %3213 }
 0x7c0   : > { %6181 = vrcp.f32 %v3214_v48 }
 0x7c1   : > { %v6180_v42 = vpop.eup %6179 }
 0x7c2   : > { %4478 = vmatmul.bf16.gmra.mxu2 %v4130_v4  ;;  %v3257_v13 = vmul.f32 %v6180_v42, %v8191_v34  ;;  %v3223_v31 = vpop.xlane.xlu2 %3222  ;;  %v4030_v34 = vmul.f32 0.5, %v3966_v55  ;;  %v3790_v4 = vadd.f32 %v3726_v58, %v9085_v57 }
 0x7c3   : > { %6183 = vrcp.f32 %v3223_v31 }
 0x7c4   : > { %v3273_v60 = vpack.c.bf16 %v3257_v13, %v3257_v13  ;;  %6185 = vtanh.f32 %v3842_v28  ;;  %v4094_v23 = vmul.f32 %v4030_v34, %v7560_v59  ;;  %v9086_v59 = vld [vmem:[#allocation60_spill] sm:$0xff]  ;;  %v3607_v28 = vmul.f32 %v3543_v63, %v9087_v45 }
 0x7c5   : > { %6187 = vrcp.f32 %v3220_v14  ;;  %v3539_v48 = vmul.f32 %v9086_v59, %v9086_v59  ;;  %v3854_v62 = vmul.f32 0.7978846, %v3790_v4 }
 0x7c6   : > { %v6182_v11 = vpop.eup %6181  ;;  %6189 = vtanh.f32 %v3846_v29  ;;  %v3362_v3 = vunpack.c.l.b16 %v3273_v60  ;;  %v4134_v40 = vpack.c.bf16 %v4094_v23, %v4090_v15  ;;  %v3671_v60 = vmul.f32 0.044715, %v3607_v28 }
 0x7c7   : > { %v3256_v47 = vmul.f32 %v6182_v11, %v8201_v52  ;;  %v3722_v52 = vmul.f32 0.044715, %v3658_v1  ;;  %v3226_v27 = vpop.xlane.xlu0 %3225  ;;  %v3603_v55 = vmul.f32 %v3539_v48, %v9086_v59  ;;  %v3229_v11 = vpop.xlane.xlu1 %3228 }
 0x7c8   : > { %6191 = vrcp.f32 %v3226_v27  ;;  %v8371_v1 = vpop.f32.mrf.mxu2 }
 0x7c9   : > { %v3272_v37 = vpack.c.bf16 %v3256_v47, %v3256_v47  ;;  %v6184_v8 = vpop.eup %6183  ;;  %v3786_v46 = vadd.f32 %v3722_v52, %v7590_v32  ;;  %v3667_v14 = vmul.f32 0.044715, %v3603_v55 }
 0x7ca   : > { %v6186_v10 = vpop.eup %6185  ;;  %v3259_v9 = vmul.f32 %v6184_v8, %v8207_v44  ;;  %v5713_v44 = vld [vmem:[#allocation10 + $0x88] sm:$0xff]  ;;  %v9088_v8 = vld [vmem:[#allocation63_spill] sm:$0xff] }
 0x7cb   : > { %v3361_v43 = vunpack.c.l.b16 %v3272_v37  ;;  %v6188_v54 = vpop.eup %6187  ;;  %v3970_v56 = vadd.f32 1.0, %v6186_v10  ;;  %v3850_v39 = vmul.f32 0.7978846, %v3786_v46  ;;  %4505 = vmatpush.bf16.msra.mxu3 %v5713_v44  ;;  %v3547_v10 = vmul.f32 %v9088_v8, %v9088_v8 }
 0x7cc   : > { %v6190_v41 = vpop.eup %6189  ;;  %v3258_v42 = vmul.f32 %v6188_v54, %v8150_v24  ;;  %v3275_v13 = vpack.c.bf16 %v3259_v9, %v3259_v9  ;;  %v5712_v24 = vld [vmem:[#allocation10 + $0x80] sm:$0xff]  ;;  %v3551_v54 = vmul.f32 %v9089_v49, %v9089_v49 }
 0x7cd   : > { %v3368_v22 = vpack.c.b16 %v3362_v3, %v3361_v43  ;;  %v3974_v7 = vadd.f32 1.0, %v6190_v41  ;;  %v4034_v16 = vmul.f32 0.5, %v3970_v56  ;;  %6193 = vtanh.f32 %v3850_v39  ;;  %v9090_v41 = vld [vmem:[#allocation62_spill] sm:$0xff] }
 0x7ce   : > { %v3274_v31 = vpack.c.bf16 %v3258_v42, %v3258_v42  ;;  %v3364_v2 = vunpack.c.l.b16 %v3275_v13  ;;  %6195 = vrcp.f32 %v3229_v11  ;;  %v6192_v18 = vpop.eup %6191  ;;  %v3731_v3 = vadd.f32 %v3667_v14, %v9086_v59 }
 0x7cf   : > { %5480 = vmatmul.msk.bf16.gmra.mxu3 %vm1326_vm1, %v3368_v22  ;;  %v4038_v29 = vmul.f32 0.5, %v3974_v7  ;;  %6197 = vtanh.f32 %v3854_v62  ;;  %v4098_v25 = vmul.f32 %v4034_v16, %v7570_v35  ;;  %v3735_v43 = vadd.f32 %v3671_v60, %v9087_v45  ;;  %v9091_v60 = vld [vmem:[#allocation65_spill] sm:$0xff] }
 0x7d0   : > { %v3363_v47 = vunpack.c.l.b16 %v3274_v31  ;;  %4506 = vmatpush.bf16.msra.mxu3 %v5712_v24  ;;  %v3260_v22 = vmul.f32 %v6192_v18, %v8217_v17  ;;  %v3795_v35 = vmul.f32 0.7978846, %v3731_v3  ;;  %v2350_v46 = vadd.f32 %v9090_v41, %v8015_v19 }
 0x7d1   : > { %v4102_v34 = vmul.f32 %v4038_v29, %v7578_v21  ;;  %v3799_v21 = vmul.f32 0.7978846, %v3735_v43  ;;  %v3611_v17 = vmul.f32 %v3547_v10, %v9088_v8  ;;  %v3615_v42 = vmul.f32 %v3551_v54, %v9089_v49 }
 0x7d2   : > { %4483 = vmatmul.bf16.gmra.mxu2 %v4134_v40  ;;  %v3369_v37 = vpack.c.b16 %v3364_v2, %v3363_v47  ;;  %v3276_v51 = vpack.c.bf16 %v3260_v22, %v3260_v22  ;;  %6199 = vtanh.f32 %v3795_v35  ;;  %v9092_v47 = vld [vmem:[#allocation66_spill] sm:$0xff] }
 0x7d3   : > { %v6194_v5 = vpop.eup %6193  ;;  %v4138_v23 = vpack.c.bf16 %v4102_v34, %v4098_v25  ;;  %6201 = vtanh.f32 %v3799_v21  ;;  %v3675_v39 = vmul.f32 0.044715, %v3611_v17  ;;  %v3679_v27 = vmul.f32 0.044715, %v3615_v42  ;;  %v9093_v34 = vld [vmem:[#allocation79_spill] sm:$0xff] }
 0x7d4   : > { %v6196_v15 = vpop.eup %6195  ;;  %v3978_v40 = vadd.f32 1.0, %v6194_v5  ;;  %v3365_v7 = vunpack.c.l.b16 %v3276_v51  ;;  %v3559_v25 = vmul.f32 %v9092_v47, %v9092_v47  ;;  %v9094_v51 = vld [vmem:[#allocation67_spill] sm:$0xff] }
 0x7d5   : > { %v6198_v52 = vpop.eup %6197  ;;  %v3261_v58 = vmul.f32 %v6196_v15, %v8158_v26  ;;  %v3739_v11 = vadd.f32 %v3675_v39, %v9088_v8  ;;  %v3743_v16 = vadd.f32 %v3679_v27, %v9089_v49 }
 0x7d6   : > { %v3982_v9 = vadd.f32 1.0, %v6198_v52  ;;  %v4042_v26 = vmul.f32 0.5, %v3978_v40 }
 0x7d7   : > { %v3277_v4 = vpack.c.bf16 %v3261_v58, %v3261_v58  ;;  %v3803_v14 = vmul.f32 0.7978846, %v3739_v11 }
 0x7d8   : > { %v4046_v56 = vmul.f32 0.5, %v3982_v9  ;;  %v4106_v19 = vmul.f32 %v4042_v26, %v7590_v32  ;;  %v6200_v55 = vpop.eup %6199  ;;  %v3555_v32 = vmul.f32 %v9091_v60, %v9091_v60 }
 0x7d9   : > { %v3366_v13 = vunpack.c.l.b16 %v3277_v4  ;;  %v6202_v31 = vpop.eup %6201  ;;  %v3923_v2 = vadd.f32 1.0, %v6200_v55  ;;  %6203 = vtanh.f32 %v3803_v14  ;;  %v9096_v14 = vld [vmem:[#allocation69_spill] sm:$0xff] }
 0x7da   : > { %v4110_v44 = vmul.f32 %v4046_v56, %v9085_v57  ;;  %v3927_v24 = vadd.f32 1.0, %v6202_v31  ;;  %v3807_v57 = vmul.f32 0.7978846, %v3743_v16  ;;  %v3619_v15 = vmul.f32 %v3555_v32, %v9091_v60 }
 0x7db   : > { %v3370_v62 = vpack.c.b16 %v3366_v13, %v3365_v7  ;;  %v3987_v18 = vmul.f32 0.5, %v3923_v2 }
 0x7dc   : > { %v4142_v29 = vpack.c.bf16 %v4110_v44, %v4106_v19  ;;  %v3991_v5 = vmul.f32 0.5, %v3927_v24  ;;  %6205 = vtanh.f32 %v3807_v57  ;;  %v3683_v35 = vmul.f32 0.044715, %v3619_v15 }
 0x7dd   : > { %v4051_v52 = vmul.f32 %v3987_v18, %v9086_v59  ;;  %v9095_v59 = vld [vmem:[#allocation68_spill] sm:$0xff] }
 0x7de   : > { %v4055_v22 = vmul.f32 %v3991_v5, %v9087_v45  ;;  %v3747_v54 = vadd.f32 %v3683_v35, %v9091_v60  ;;  %v3567_v45 = vmul.f32 %v9095_v59, %v9095_v59 }
 0x7df   : > { %5481 = vmatmul.msk.bf16.gmra.mxu3 %vm1326_vm1, %v3369_v37  ;;  %v2355_v37 = vadd.f32 %v9093_v34, %v8035_v12  ;;  %v6204_v10 = vpop.eup %6203 }
 0x7e0   : > { %v4115_v58 = vpack.c.bf16 %v4055_v22, %v4051_v52  ;;  %v3931_v41 = vadd.f32 1.0, %v6204_v10  ;;  %v3811_v9 = vmul.f32 0.7978846, %v3747_v54  ;;  %v3631_v39 = vmul.f32 %v3567_v45, %v9095_v59 }
 0x7e2   : > { %4488 = vmatmul.bf16.gmra.mxu2 %v4138_v23  ;;  %v3623_v23 = vmul.f32 %v3559_v25, %v9092_v47  ;;  %v6206_v12 = vpop.eup %6205  ;;  %v3995_v4 = vmul.f32 0.5, %v3931_v41  ;;  %6207 = vtanh.f32 %v3811_v9  ;;  %v3695_v44 = vmul.f32 0.044715, %v3631_v39  ;;  %v9098_v9 = vld [vmem:[#allocation71_spill] sm:$0xff] }
 0x7e4   : > { %v3687_v21 = vmul.f32 0.044715, %v3623_v23  ;;  %v4059_v13 = vmul.f32 %v3995_v4, %v9088_v8  ;;  %v3571_v8 = vmul.f32 %v9096_v14, %v9096_v14 }
 0x7e5   : > { %v2922_v48 = vpop.f32.mrf.mxu2 }
 0x7e6   : > { %v8384_v63 = vadd.f32 %v2922_v48, %v2350_v46  ;;  %v3751_v40 = vadd.f32 %v3687_v21, %v9092_v47  ;;  %v3935_v46 = vadd.f32 1.0, %v6206_v12  ;;  %v3563_v48 = vmul.f32 %v9094_v51, %v9094_v51 }
 0x7e7   : > { %v3635_v18 = vmul.f32 %v3571_v8, %v9096_v14 }
 0x7e8   : > { %v3815_v17 = vmul.f32 0.7978846, %v3751_v40  ;;  %v3999_v42 = vmul.f32 0.5, %v3935_v46  ;;  %v3627_v56 = vmul.f32 %v3563_v48, %v9094_v51  ;;  %v6208_v55 = vpop.eup %6207  ;;  %v9099_v48 = vld [vmem:[#allocation72_spill] sm:$0xff] }
 0x7e9   : > { %v3699_v52 = vmul.f32 0.044715, %v3635_v18 }
 0x7ea   : > { %6209 = vtanh.f32 %v3815_v17  ;;  %v4063_v27 = vmul.f32 %v3999_v42, %v9089_v49  ;;  %v3691_v19 = vmul.f32 0.044715, %v3627_v56  ;;  %v9097_v49 = vld [vmem:[#allocation70_spill] sm:$0xff]  ;;  %v3583_v17 = vmul.f32 %v9099_v48, %v9099_v48 }
 0x7eb   : > { %v3575_v57 = vmul.f32 %v9097_v49, %v9097_v49  ;;  %v3763_v12 = vadd.f32 %v3699_v52, %v9096_v14 }
 0x7ec   : > { %v3755_v16 = vadd.f32 %v3691_v19, %v9094_v51 }
 0x7ed   : > { %v8390_v28 = vpop.f32.mrf.mxu2  ;;  %v3827_v46 = vmul.f32 0.7978846, %v3763_v12 }
 0x7ee   : > { %v3819_v24 = vmul.f32 0.7978846, %v3755_v16 }
 0x7ef   : > { %5482 = vmatmul.msk.bf16.gmra.mxu3 %vm1326_vm1, %v3370_v62  ;;  %v4119_v62 = vpack.c.bf16 %v4063_v27, %v4059_v13  ;;  %v3647_v13 = vmul.f32 %v3583_v17, %v9099_v48 }
 0x7f0   : > { %v6210_v31 = vpop.eup %6209  ;;  %6211 = vtanh.f32 %v3819_v24 }
 0x7f1   : > { %v3943_v2 = vadd.f32 1.0, %v6210_v31 }
 0x7f2   : > { %4493 = vmatmul.bf16.gmra.mxu2 %v4142_v29  ;;  %v3939_v29 = vadd.f32 1.0, %v6208_v55 }
 0x7f3   : > { %v4007_v34 = vmul.f32 0.5, %v3943_v2 }
 0x7f4   : > { %v4003_v25 = vmul.f32 0.5, %v3939_v29 }
 0x7f5   : > { %v2927_v3 = vpop.f32.mrf.mxu2  ;;  %v4071_v23 = vmul.f32 %v4007_v34, %v9092_v47 }
 0x7f6   : > { %v8401_v43 = vadd.f32 %v2927_v3, %v2355_v37  ;;  %v3639_v3 = vmul.f32 %v3575_v57, %v9097_v49  ;;  %v4067_v15 = vmul.f32 %v4003_v25, %v9091_v60  ;;  %v6212_v35 = vpop.eup %6211  ;;  %v3579_v60 = vmul.f32 %v9098_v9, %v9098_v9  ;;  %v9101_v25 = vld [vmem:[#allocation74_spill] sm:$0xff] }
 0x7f7   : > { %v3947_v40 = vadd.f32 1.0, %v6212_v35  ;;  %v3591_v34 = vmul.f32 %v9101_v25, %v9101_v25 }
 0x7f8   : > { %v3703_v22 = vmul.f32 0.044715, %v3639_v3  ;;  %v4123_v21 = vpack.c.bf16 %v4071_v23, %v4067_v15 }
 0x7f9   : > { %v4011_v45 = vmul.f32 0.5, %v3947_v40  ;;  %v3655_v52 = vmul.f32 %v3591_v34, %v9101_v25  ;;  %v5725_v34 = vld [vmem:[#allocation10 + $0xe8] sm:$0xff] }
 0x7fb   : > { %v4075_v19 = vmul.f32 %v4011_v45, %v9094_v51  ;;  %v9100_v51 = vld [vmem:[#allocation73_spill] sm:$0xff] }
 0x7ff   : > { %4507 = vmatmul.bf16.vlgmr.msra.gmra.mxu3 %v4115_v58 }
 0x806   : > { %v3481_v26 = vpop.f32.mrf.mxu0 }
 0x807   : > { %v8415_v7 = vadd.f32 %v3481_v26, %v8056_v0  ;;  %v3759_v0 = vadd.f32 %v3695_v44, %v9095_v59  ;;  %v3643_v26 = vmul.f32 %v3579_v60, %v9098_v9 }
 0x809   : > { %v3823_v32 = vmul.f32 0.7978846, %v3759_v0  ;;  %v3707_v55 = vmul.f32 0.044715, %v3643_v26 }
 0x80b   : > { %6213 = vtanh.f32 %v3823_v32 }
 0x80c   : > { %6215 = vtanh.f32 %v3827_v46 }
 0x80e   : > { %v8420_v11 = vpop.f32.mrf.mxu0 }
 0x80f   : > { %4512 = vmatmul.bf16.gmra.mxu3 %v4119_v62  ;;  %v3711_v62 = vmul.f32 0.044715, %v3647_v13 }
 0x811   : > { %v6214_v10 = vpop.eup %6213  ;;  %v3775_v2 = vadd.f32 %v3711_v62, %v9099_v48 }
 0x812   : > { %v3951_v41 = vadd.f32 1.0, %v6214_v10  ;;  %v6216_v31 = vpop.eup %6215  ;;  %v3719_v10 = vmul.f32 0.044715, %v3655_v52 }
 0x813   : > { %v3955_v24 = vadd.f32 1.0, %v6216_v31  ;;  %v3839_v57 = vmul.f32 0.7978846, %v3775_v2  ;;  %v5727_v31 = vld [vmem:[#allocation10 + $0xf8] sm:$0xff] }
 0x814   : > { %v4015_v4 = vmul.f32 0.5, %v3951_v41  ;;  %v3783_v41 = vadd.f32 %v3719_v10, %v9101_v25  ;;  %4548 = vmatpush.bf16.msrb.mxu0 %v5727_v31 }
 0x816   : > { %v3486_v37 = vpop.f32.mrf.mxu0  ;;  %v4079_v44 = vmul.f32 %v4015_v4, %v9095_v59  ;;  %v3587_v59 = vmul.f32 %v9100_v51, %v9100_v51  ;;  %v3847_v45 = vmul.f32 0.7978846, %v3783_v41  ;;  %v9105_v41 = vld [vmem:[#allocation43_spill] sm:$0xff] }
 0x817   : > { %v8430_v5 = vadd.f32 %v3486_v37, %v8077_v36  ;;  %v3767_v36 = vadd.f32 %v3703_v22, %v9097_v49  ;;  %v4019_v37 = vmul.f32 0.5, %v3955_v24 }
 0x818   : > { %v4127_v16 = vpack.c.bf16 %v4079_v44, %v4075_v19  ;;  %v3651_v15 = vmul.f32 %v3587_v59, %v9100_v51 }
 0x819   : > { %v3831_v47 = vmul.f32 0.7978846, %v3767_v36  ;;  %v4083_v22 = vmul.f32 %v4019_v37, %v9096_v14  ;;  %v9103_v14 = vld [vmem:[#allocation76_spill] sm:$0xff] }
 0x81b   : > { %6217 = vtanh.f32 %v3831_v47  ;;  %v9102_v47 = vld [vmem:[#allocation75_spill] sm:$0xff] }
 0x81c   : > { %v3595_v17 = vmul.f32 %v9102_v47, %v9102_v47 }
 0x81e   : > { %v8435_v58 = vpop.f32.mrf.mxu0  ;;  %v3659_v26 = vmul.f32 %v3595_v17, %v9102_v47 }
 0x81f   : > { %v3404_v54 = vpop.f32.mrf.mxu3  ;;  %4517 = vmatmul.bf16.gmra.mxu3 %v4123_v21  ;;  %v3715_v21 = vmul.f32 0.044715, %v3651_v15 }
 0x820   : > { %v3723_v19 = vmul.f32 0.044715, %v3659_v26 }
 0x821   : > { %v6218_v0 = vpop.eup %6217  ;;  %v3779_v40 = vadd.f32 %v3715_v21, %v9100_v51  ;;  %v5723_v21 = vld [vmem:[#allocation10 + $0xd8] sm:$0xff] }
 0x822   : > { %v3959_v8 = vadd.f32 1.0, %v6218_v0  ;;  %v3787_v0 = vadd.f32 %v3723_v19, %v9102_v47 }
 0x823   : > { %v3843_v60 = vmul.f32 0.7978846, %v3779_v40 }
 0x824   : > { %v4023_v18 = vmul.f32 0.5, %v3959_v8  ;;  %v5726_v8 = vld [vmem:[#allocation10 + $0xf0] sm:$0xff]  ;;  %v3851_v59 = vmul.f32 0.7978846, %v3787_v0 }
 0x825   : > { %4549 = vmatpush.bf16.msrb.mxu0 %v5726_v8 }
 0x826   : > { %v3491_v42 = vpop.f32.mrf.mxu0  ;;  %v4087_v35 = vmul.f32 %v4023_v18, %v9097_v49  ;;  %v3599_v49 = vmul.f32 %v9103_v14, %v9103_v14 }
 0x827   : > { %v8445_v56 = vadd.f32 %v3491_v42, %v8105_v20  ;;  %v3406_v39 = vpop.f32.mrf.mxu3  ;;  %v3771_v20 = vadd.f32 %v3707_v55, %v9098_v9 }
 0x828   : > { %v3428_v27 = vpack.c.bf16 %v3406_v39, %v3404_v54  ;;  %v4131_v54 = vpack.c.bf16 %v4087_v35, %v4083_v22  ;;  %v3663_v39 = vmul.f32 %v3599_v49, %v9103_v14 }
 0x829   : > { %v3835_v32 = vmul.f32 0.7978846, %v3771_v20  ;;  %4550 = vmatpush.bf16.msrb.mxu0 %v5725_v34 }
 0x82a   : > { %5495 = vmatmul.msk.bf16.gmra.mxu0 %vm1179_vm0, %v3428_v27  ;;  %v3727_v44 = vmul.f32 0.044715, %v3663_v39  ;;  %v5720_v39 = vld [vmem:[#allocation10 + $0xc0] sm:$0xff] }
 0x82b   : > { %6219 = vtanh.f32 %v3835_v32 }
 0x82c   : > { %6221 = vtanh.f32 %v3839_v57  ;;  %v3791_v20 = vadd.f32 %v3727_v44, %v9103_v14 }
 0x82d   : > { %6223 = vtanh.f32 %v3843_v60 }
 0x82e   : > { %v8451_v29 = vpop.f32.mrf.mxu0  ;;  %6225 = vtanh.f32 %v3847_v45 }
 0x82f   : > { %4522 = vmatmul.bf16.gmra.mxu3 %v4127_v16  ;;  %6227 = vtanh.f32 %v3851_v59 }
 0x831   : > { %v6220_v12 = vpop.eup %6219 }
 0x832   : > { %v6222_v36 = vpop.eup %6221  ;;  %v3963_v46 = vadd.f32 1.0, %v6220_v12  ;;  %v9104_v12 = vld [vmem:[#allocation41_spill] sm:$0xff] }
 0x833   : > { %v6224_v55 = vpop.eup %6223 }
 0x834   : > { %v4027_v4 = vmul.f32 0.5, %v3963_v46  ;;  %v6226_v16 = vpop.eup %6225  ;;  %v3971_v2 = vadd.f32 1.0, %v6224_v55 }
 0x835   : > { %v3975_v24 = vadd.f32 1.0, %v6226_v16  ;;  %v6228_v22 = vpop.eup %6227  ;;  %v9106_v16 = vld [vmem:[#allocation45_spill] sm:$0xff] }
 0x836   : > { %v3496_v3 = vpop.f32.mrf.mxu0  ;;  %v4091_v13 = vmul.f32 %v4027_v4, %v9098_v9  ;;  %v3855_v9 = vmul.f32 0.7978846, %v3791_v20  ;;  %v3548_v0 = vmul.f32 %v9106_v16, %v9106_v16  ;;  %v9107_v20 = vld [vmem:[#allocation47_spill] sm:$0xff] }
 0x837   : > { %v8461_v23 = vadd.f32 %v3496_v3, %v8115_v6  ;;  %v3967_v6 = vadd.f32 1.0, %v6222_v36  ;;  %v4039_v57 = vmul.f32 0.5, %v3975_v24  ;;  %v5724_v3 = vld [vmem:[#allocation10 + $0xe0] sm:$0xff]  ;;  %v3979_v36 = vadd.f32 1.0, %v6228_v22  ;;  %v9108_v22 = vld [vmem:[#allocation48_spill] sm:$0xff] }
 0x838   : > { %6229 = vtanh.f32 %v3855_v9  ;;  %4551 = vmatpush.bf16.msrb.mxu0 %v5724_v3  ;;  %v3612_v24 = vmul.f32 %v3548_v0, %v9106_v16 }
 0x839   : > { %v4031_v42 = vmul.f32 0.5, %v3967_v6  ;;  %v4103_v18 = vmul.f32 %v4039_v57, %v9101_v25  ;;  %v3544_v25 = vmul.f32 %v9105_v41, %v9105_v41  ;;  %v5721_v6 = vld [vmem:[#allocation10 + $0xc8] sm:$0xff]  ;;  %v4043_v17 = vmul.f32 0.5, %v3979_v36 }
 0x83b   : > { %v4095_v27 = vmul.f32 %v4031_v42, %v9099_v48  ;;  %v4035_v48 = vmul.f32 0.5, %v3971_v2  ;;  %v3608_v49 = vmul.f32 %v3544_v25, %v9105_v41  ;;  %v4107_v42 = vmul.f32 %v4043_v17, %v9102_v47 }
 0x83c   : > { %4552 = vmatpush.bf16.msrb.mxu0 %v5723_v21 }
 0x83d   : > { %v4135_v62 = vpack.c.bf16 %v4095_v27, %v4091_v13  ;;  %v4099_v37 = vmul.f32 %v4035_v48, %v9100_v51  ;;  %v5722_v51 = vld [vmem:[#allocation10 + $0xd0] sm:$0xff]  ;;  %v3672_v13 = vmul.f32 0.044715, %v3608_v49 }
 0x83e   : > { %v6230_v10 = vpop.eup %6229 }
 0x83f   : > { %4527 = vmatmul.bf16.gmra.mxu3 %v4131_v54  ;;  %v4139_v35 = vpack.c.bf16 %v4103_v18, %v4099_v37  ;;  %v3540_v54 = vmul.f32 %v9104_v12, %v9104_v12  ;;  %v3983_v40 = vadd.f32 1.0, %v6230_v10  ;;  %v9109_v10 = vld [vmem:[#allocation49_spill] sm:$0xff] }
 0x840   : > { %4553 = vmatpush.bf16.msrb.mxu0 %v5722_v51 }
 0x841   : > { %v3604_v60 = vmul.f32 %v3540_v54, %v9104_v12  ;;  %v4047_v45 = vmul.f32 0.5, %v3983_v40  ;;  %v3560_v54 = vmul.f32 %v9109_v10, %v9109_v10 }
 0x843   : > { %v3668_v4 = vmul.f32 0.044715, %v3604_v60  ;;  %v4111_v26 = vmul.f32 %v4047_v45, %v9103_v14  ;;  %v3552_v14 = vmul.f32 %v9107_v20, %v9107_v20  ;;  %v3624_v25 = vmul.f32 %v3560_v54, %v9109_v10 }
 0x844   : > { %4554 = vmatpush.bf16.msrb.mxu0 %v5721_v6 }
 0x845   : > { %v3732_v44 = vadd.f32 %v3668_v4, %v9104_v12  ;;  %v4143_v55 = vpack.c.bf16 %v4111_v26, %v4107_v42  ;;  %v3616_v8 = vmul.f32 %v3552_v14, %v9107_v20  ;;  %v3688_v17 = vmul.f32 0.044715, %v3624_v25 }
 0x847   : > { %v3796_v31 = vmul.f32 0.7978846, %v3732_v44  ;;  %v3680_v59 = vmul.f32 0.044715, %v3616_v8  ;;  %v3752_v26 = vadd.f32 %v3688_v17, %v9109_v10 }
 0x848   : > { %4555 = vmatpush.bf16.msrb.mxu0 %v5720_v39 }
 0x849   : > { %6231 = vtanh.f32 %v3796_v31  ;;  %v3744_v18 = vadd.f32 %v3680_v59, %v9107_v20 }
 0x84b   : > { %v3808_v21 = vmul.f32 0.7978846, %v3744_v18 }
 0x84f   : > { %4532 = vmatmul.bf16.gmra.mxu3 %v4135_v62  ;;  %v3736_v62 = vadd.f32 %v3672_v13, %v9105_v41  ;;  %v6232_v48 = vpop.eup %6231 }
 0x850   : > { %v3924_v3 = vadd.f32 1.0, %v6232_v48 }
 0x851   : > { %v3800_v47 = vmul.f32 0.7978846, %v3736_v62 }
 0x852   : > { %v3409_v32 = vpop.f32.mrf.mxu3  ;;  %v3988_v36 = vmul.f32 0.5, %v3924_v3 }
 0x853   : > { %6233 = vtanh.f32 %v3800_v47 }
 0x859   : > { %v6234_v34 = vpop.eup %6233 }
 0x85a   : > { %v3411_v15 = vpop.f32.mrf.mxu3 }
 0x85b   : > { %v3429_v52 = vpack.c.bf16 %v3411_v15, %v3409_v32  ;;  %v3676_v32 = vmul.f32 0.044715, %v3612_v24  ;;  %v3928_v15 = vadd.f32 1.0, %v6234_v34 }
 0x85d   : > { %5496 = vmatmul.msk.bf16.gmra.mxu0 %vm1179_vm0, %v3429_v52  ;;  %v3740_v37 = vadd.f32 %v3676_v32, %v9106_v16  ;;  %v3992_v40 = vmul.f32 0.5, %v3928_v15  ;;  %v9112_v15 = vld [vmem:[#allocation52_spill] sm:$0xff] }
 0x85f   : > { %4537 = vmatmul.bf16.gmra.mxu3 %v4139_v35  ;;  %v3804_v52 = vmul.f32 0.7978846, %v3740_v37  ;;  %v3556_v35 = vmul.f32 %v9108_v22, %v9108_v22  ;;  %v4056_v6 = vmul.f32 %v3992_v40, %v9105_v41  ;;  %v8521_v37 = vpop.f32.mrf.mxu0 }
 0x861   : > { %6235 = vtanh.f32 %v3804_v52  ;;  %v3620_v51 = vmul.f32 %v3556_v35, %v9108_v22 }
 0x862   : > { %v3414_v46 = vpop.f32.mrf.mxu3  ;;  %6237 = vtanh.f32 %v3808_v21 }
 0x863   : > { %v3684_v60 = vmul.f32 0.044715, %v3620_v51 }
 0x865   : > { %v3748_v42 = vadd.f32 %v3684_v60, %v9108_v22 }
 0x867   : > { %v6236_v45 = vpop.eup %6235 }
 0x868   : > { %v6238_v4 = vpop.eup %6237  ;;  %v3932_v39 = vadd.f32 1.0, %v6236_v45 }
 0x869   : > { %v3936_v13 = vadd.f32 1.0, %v6238_v4 }
 0x86a   : > { %v3416_v27 = vpop.f32.mrf.mxu3  ;;  %v3996_v62 = vmul.f32 0.5, %v3932_v39 }
 0x86b   : > { %v3430_v19 = vpack.c.bf16 %v3416_v27, %v3414_v46  ;;  %v4052_v46 = vmul.f32 %v3988_v36, %v9104_v12  ;;  %v3812_v27 = vmul.f32 0.7978846, %v3748_v42  ;;  %v9111_v12 = vld [vmem:[#allocation51_spill] sm:$0xff]  ;;  %v4000_v31 = vmul.f32 0.5, %v3936_v13  ;;  %v9114_v42 = vld [vmem:[#allocation37_spill] sm:$0xff] }
 0x86c   : > { %v3568_v41 = vmul.f32 %v9111_v12, %v9111_v12  ;;  %v4060_v14 = vmul.f32 %v3996_v62, %v9106_v16  ;;  %v3572_v16 = vmul.f32 %v9112_v15, %v9112_v15 }
 0x86d   : > { %5497 = vmatmul.msk.bf16.gmra.mxu0 %vm1179_vm0, %v3430_v19  ;;  %v4116_v49 = vpack.c.bf16 %v4056_v6, %v4052_v46  ;;  %v9110_v19 = vld [vmem:[#allocation50_spill] sm:$0xff]  ;;  %6239 = vtanh.f32 %v3812_v27 }
 0x86e   : > { %v3564_v44 = vmul.f32 %v9110_v19, %v9110_v19  ;;  %v3632_v47 = vmul.f32 %v3568_v41, %v9111_v12  ;;  %v3636_v36 = vmul.f32 %v3572_v16, %v9112_v15  ;;  %v9115_v41 = vld [vmem:[#allocation54_spill] sm:$0xff] }
 0x86f   : > { %4542 = vmatmul.bf16.gmra.mxu3 %v4143_v55  ;;  %v3816_v55 = vmul.f32 0.7978846, %v3752_v26  ;;  %v2342_v26 = vadd.f32 %v9114_v42, %v7982_v33  ;;  %v3580_v62 = vmul.f32 %v9115_v41, %v9115_v41 }
 0x870   : > { %v3628_v0 = vmul.f32 %v3564_v44, %v9110_v19  ;;  %v3696_v8 = vmul.f32 0.044715, %v3632_v47  ;;  %v3700_v60 = vmul.f32 0.044715, %v3636_v36 }
 0x871   : > { %6241 = vtanh.f32 %v3816_v55 }
 0x872   : > { %v3419_v2 = vpop.f32.mrf.mxu3  ;;  %v3692_v24 = vmul.f32 0.044715, %v3628_v0  ;;  %v3764_v39 = vadd.f32 %v3700_v60, %v9112_v15  ;;  %v9116_v0 = vld [vmem:[#allocation55_spill] sm:$0xff] }
 0x873   : > { %v6240_v32 = vpop.eup %6239  ;;  %v3584_v33 = vmul.f32 %v9116_v0, %v9116_v0 }
 0x874   : > { %v3756_v48 = vadd.f32 %v3692_v24, %v9110_v19  ;;  %v3940_v34 = vadd.f32 1.0, %v6240_v32  ;;  %v3828_v55 = vmul.f32 0.7978846, %v3764_v39 }
 0x876   : > { %v3820_v3 = vmul.f32 0.7978846, %v3756_v48  ;;  %v4004_v21 = vmul.f32 0.5, %v3940_v34 }
 0x878   : > { %6243 = vtanh.f32 %v3820_v3  ;;  %v4068_v51 = vmul.f32 %v4004_v21, %v9108_v22  ;;  %v2941_v22 = vadd.f32 %v8265_v50, %v2342_v26  ;;  %v3648_v50 = vmul.f32 %v3584_v33, %v9116_v0 }
 0x87a   : > { %v3421_v9 = vpop.f32.mrf.mxu3 }
 0x87b   : > { %v3431_v57 = vpack.c.bf16 %v3421_v9, %v3419_v2  ;;  %v4064_v2 = vmul.f32 %v4000_v31, %v9107_v20  ;;  %v6242_v9 = vpop.eup %6241  ;;  %v9113_v20 = vld [vmem:[#allocation53_spill] sm:$0xff] }
 0x87c   : > { %v3944_v18 = vadd.f32 1.0, %v6242_v9  ;;  %v3576_v35 = vmul.f32 %v9113_v20, %v9113_v20 }
 0x87d   : > { %5498 = vmatmul.msk.bf16.gmra.mxu0 %vm1179_vm0, %v3431_v57  ;;  %v4120_v59 = vpack.c.bf16 %v4064_v2, %v4060_v14  ;;  %v3760_v57 = vadd.f32 %v3696_v8, %v9111_v12  ;;  %v3644_v2 = vmul.f32 %v3580_v62, %v9115_v41 }
 0x87e   : > { %v4008_v54 = vmul.f32 0.5, %v3944_v18  ;;  %v3640_v40 = vmul.f32 %v3576_v35, %v9113_v20  ;;  %v6244_v45 = vpop.eup %6243  ;;  %v9117_v35 = vld [vmem:[#allocation56_spill] sm:$0xff] }
 0x87f   : > { %v3824_v52 = vmul.f32 0.7978846, %v3760_v57  ;;  %v3948_v27 = vadd.f32 1.0, %v6244_v45  ;;  %v3708_v32 = vmul.f32 0.044715, %v3644_v2  ;;  %v3588_v21 = vmul.f32 %v9117_v35, %v9117_v35 }
 0x880   : > { %v4072_v46 = vmul.f32 %v4008_v54, %v9109_v10  ;;  %v3704_v17 = vmul.f32 0.044715, %v3640_v40 }
 0x881   : > { %6245 = vtanh.f32 %v3824_v52  ;;  %v4012_v47 = vmul.f32 0.5, %v3948_v27  ;;  %v3772_v34 = vadd.f32 %v3708_v32, %v9115_v41 }
 0x882   : > { %v3768_v13 = vadd.f32 %v3704_v17, %v9113_v20  ;;  %6247 = vtanh.f32 %v3828_v55 }
 0x883   : > { %v4076_v24 = vmul.f32 %v4012_v47, %v9110_v19  ;;  %v3836_v52 = vmul.f32 0.7978846, %v3772_v34  ;;  %v9118_v19 = vld [vmem:[#allocation57_spill] sm:$0xff] }
 0x884   : > { %v3832_v31 = vmul.f32 0.7978846, %v3768_v13 }
 0x886   : > { %6249 = vtanh.f32 %v3832_v31 }
 0x887   : > { %v6246_v4 = vpop.eup %6245  ;;  %6251 = vtanh.f32 %v3836_v52 }
 0x888   : > { %v3952_v44 = vadd.f32 1.0, %v6246_v4  ;;  %v6248_v9 = vpop.eup %6247 }
 0x889   : > { %v3956_v3 = vadd.f32 1.0, %v6248_v9 }
 0x88a   : > { %v4016_v14 = vmul.f32 0.5, %v3952_v44 }
 0x88b   : > { %v4020_v36 = vmul.f32 0.5, %v3956_v3 }
 0x88c   : > { %v4080_v8 = vmul.f32 %v4016_v14, %v9111_v12  ;;  %v6250_v57 = vpop.eup %6249  ;;  %v3592_v12 = vmul.f32 %v9118_v19, %v9118_v19 }
 0x88d   : > { %4556 = vmatmul.bf16.vlgmr.msrb.gmra.mxu0 %v4116_v49  ;;  %v4124_v49 = vpack.c.bf16 %v4072_v46, %v4068_v51  ;;  %v3960_v16 = vadd.f32 1.0, %v6250_v57  ;;  %v3652_v51 = vmul.f32 %v3588_v21, %v9117_v35  ;;  %v4084_v46 = vmul.f32 %v4020_v36, %v9112_v15  ;;  %v9120_v15 = vld [vmem:[#allocation59_spill] sm:$0xff]  ;;  %v2929_v57 = vpop.f32.mrf.mxu2  ;;  %v4410_v36 = vpop.f32.mrf.mxu1 }
 0x88e   : > { %v4128_v48 = vpack.c.bf16 %v4080_v8, %v4076_v24 }
 0x88f   : > { %v4024_v40 = vmul.f32 0.5, %v3960_v16  ;;  %v3716_v17 = vmul.f32 0.044715, %v3652_v51  ;;  %v4508_v51 = vpop.f32.mrf.mxu3 }
 0x891   : > { %v4088_v60 = vmul.f32 %v4024_v40, %v9113_v20  ;;  %v3780_v26 = vadd.f32 %v3716_v17, %v9117_v35  ;;  %v3600_v20 = vmul.f32 %v9120_v15, %v9120_v15 }
 0x893   : > { %v4132_v4 = vpack.c.bf16 %v4088_v60, %v4084_v46  ;;  %v3844_v27 = vmul.f32 0.7978846, %v3780_v26  ;;  %v3664_v47 = vmul.f32 %v3600_v20, %v9120_v15 }
 0x895   : > { %v3728_v24 = vmul.f32 0.044715, %v3664_v47 }
 0x89d   : > { %4561 = vmatmul.bf16.gmra.mxu0 %v4120_v59  ;;  %v3712_v59 = vmul.f32 0.044715, %v3648_v50 }
 0x89f   : > { %v3776_v18 = vadd.f32 %v3712_v59, %v9116_v0 }
 0x8a1   : > { %v3840_v54 = vmul.f32 0.7978846, %v3776_v18  ;;  %v3792_v18 = vadd.f32 %v3728_v24, %v9120_v15 }
 0x8a3   : > { %6253 = vtanh.f32 %v3840_v54  ;;  %v3856_v52 = vmul.f32 0.7978846, %v3792_v18 }
 0x8a4   : > { %6255 = vtanh.f32 %v3844_v27 }
 0x8a7   : > { %v3501_v25 = vpop.f32.mrf.mxu0 }
 0x8a8   : > { %v8532_v6 = vadd.f32 %v3501_v25, %v8213_v53  ;;  %v3656_v25 = vmul.f32 %v3592_v12, %v9118_v19 }
 0x8aa   : > { %v3720_v45 = vmul.f32 0.044715, %v3656_v25 }
 0x8ac   : > { %v3784_v39 = vadd.f32 %v3720_v45, %v9118_v19 }
 0x8ad   : > { %4566 = vmatmul.bf16.gmra.mxu0 %v4124_v49  ;;  %v6252_v49 = vpop.eup %6251 }
 0x8ae   : > { %v6254_v42 = vpop.eup %6253  ;;  %v3964_v13 = vadd.f32 1.0, %v6252_v49  ;;  %v3848_v55 = vmul.f32 0.7978846, %v3784_v39 }
 0x8af   : > { %v3503_v10 = vpop.f32.mrf.mxu0  ;;  %v6256_v32 = vpop.eup %6255 }
 0x8b0   : > { %v8539_v53 = vadd.f32 %v3503_v10, %v2941_v22  ;;  %v3968_v22 = vadd.f32 1.0, %v6254_v42  ;;  %v9119_v10 = vld [vmem:[#allocation58_spill] sm:$0xff]  ;;  %v4028_v62 = vmul.f32 0.5, %v3964_v13  ;;  %6257 = vtanh.f32 %v3848_v55  ;;  %v4412_v13 = vpop.f32.mrf.mxu1 }
 0x8b1   : > { %v3596_v44 = vmul.f32 %v9119_v10, %v9119_v10  ;;  %v3972_v3 = vadd.f32 1.0, %v6256_v32 }
 0x8b2   : > { %v4032_v31 = vmul.f32 0.5, %v3968_v22  ;;  %v4092_v14 = vmul.f32 %v4028_v62, %v9115_v41  ;;  %v4510_v22 = vpop.f32.mrf.mxu3 }
 0x8b3   : > { %v3660_v33 = vmul.f32 %v3596_v44, %v9119_v10  ;;  %v4036_v21 = vmul.f32 0.5, %v3972_v3 }
 0x8b4   : > { %v4096_v2 = vmul.f32 %v4032_v31, %v9116_v0 }
 0x8b5   : > { %v3724_v50 = vmul.f32 0.044715, %v3660_v33  ;;  %v4100_v12 = vmul.f32 %v4036_v21, %v9117_v35 }
 0x8b6   : > { %v4136_v9 = vpack.c.bf16 %v4096_v2, %v4092_v14  ;;  %v9123_v2 = vld [vmem:[#allocation80_spill] sm:$0xff] }
 0x8b7   : > { %v3788_v34 = vadd.f32 %v3724_v50, %v9119_v10 }
 0x8b8   : > { %v4415_v33 = vpop.f32.mrf.mxu1 }
 0x8b9   : > { %v3852_v41 = vmul.f32 0.7978846, %v3788_v34 }
 0x8ba   : > { %v4513_v14 = vpop.f32.mrf.mxu3 }
 0x8bb   : > { %6259 = vtanh.f32 %v3852_v41  ;;  %v9124_v41 = vld [vmem:[#allocation81_spill] sm:$0xff] }
 0x8bc   : > { %6261 = vtanh.f32 %v3856_v52  ;;  %v9125_v52 = vld [vmem:[#allocation22_spill] sm:$0xff] }
 0x8bd   : > { %4571 = vmatmul.bf16.gmra.mxu0 %v4128_v48  ;;  %v6258_v48 = vpop.eup %6257  ;;  %v2322_v21 = vadd.f32 %v9125_v52, %v9124_v41 }
 0x8be   : > { %v3976_v16 = vadd.f32 1.0, %v6258_v48 }
 0x8c0   : > { %v4040_v54 = vmul.f32 0.5, %v3976_v16 }
 0x8c1   : > { %v6260_v46 = vpop.eup %6259 }
 0x8c2   : > { %v4104_v40 = vmul.f32 %v4040_v54, %v9118_v19  ;;  %v6262_v45 = vpop.eup %6261  ;;  %v3980_v49 = vadd.f32 1.0, %v6260_v46  ;;  %v4515_v48 = vpop.f32.mrf.mxu3 }
 0x8c3   : > { %v3984_v26 = vadd.f32 1.0, %v6262_v45 }
 0x8c4   : > { %v4140_v17 = vpack.c.bf16 %v4104_v40, %v4100_v12  ;;  %v4044_v27 = vmul.f32 0.5, %v3980_v49  ;;  %v9126_v40 = vld [vmem:[#allocation87_spill] sm:$0xff] }
 0x8c5   : > { %v4048_v55 = vmul.f32 0.5, %v3984_v26 }
 0x8c7   : > { %v4112_v20 = vmul.f32 %v4048_v55, %v9120_v15 }
 0x8cd   : > { %4576 = vmatmul.bf16.gmra.mxu0 %v4132_v4  ;;  %v9121_v4 = vld [vmem:[#allocation39_spill] sm:$0xff] }
 0x8ce   : > { %v2352_v42 = vadd.f32 %v9121_v4, %v8028_v30 }
 0x8d0   : > { %v2945_v35 = vadd.f32 %v8390_v28, %v2352_v42  ;;  %v9122_v28 = vld [vmem:[#allocation86_spill] sm:$0xff] }
 0x8d1   : > { %v2357_v50 = vadd.f32 %v9123_v2, %v9122_v28 }
 0x8d3   : > { %v2947_v24 = vadd.f32 %v2929_v57, %v2357_v50  ;;  %v4518_v57 = vpop.f32.mrf.mxu3 }
 0x8da   : > { %v3506_v8 = vpop.f32.mrf.mxu0 }
 0x8db   : > { %v8570_v59 = vadd.f32 %v3506_v8, %v8281_v38  ;;  %v4459_v38 = vpop.f32.mrf.mxu2  ;;  %v4520_v42 = vpop.f32.mrf.mxu3 }
 0x8dc   : > { %v4460_v15 = vadd.f32 %v4459_v38, %v4410_v36 }
 0x8dd   : > { %4581 = vmatmul.bf16.gmra.mxu0 %v4136_v9 }
 0x8de   : > { %v4509_v34 = vadd.f32 %v4508_v51, %v4460_v15  ;;  %v9130_v15 = vld [vmem:[#allocation83_spill] sm:$0xff] }
 0x8e2   : > { %v8574_v0 = vpop.f32.mrf.mxu0 }
 0x8e3   : > { %v4461_v39 = vpop.f32.mrf.mxu2 }
 0x8e4   : > { %v4462_v12 = vadd.f32 %v4461_v39, %v4412_v13 }
 0x8e6   : > { %v4511_v46 = vadd.f32 %v4510_v22, %v4462_v12  ;;  %v9128_v22 = vld [vmem:[#allocation26_spill] sm:$0xff] }
 0x8ea   : > { %v3511_v25 = vpop.f32.mrf.mxu0 }
 0x8eb   : > { %v8579_v60 = vadd.f32 %v3511_v25, %v8384_v63  ;;  %v4108_v63 = vmul.f32 %v4044_v27, %v9119_v10  ;;  %v4464_v62 = vpop.f32.mrf.mxu2  ;;  %v4417_v10 = vpop.f32.mrf.mxu1  ;;  %v2933_v25 = vadd.f32 %v9126_v40, %v2322_v21 }
 0x8ed   : > { %4586 = vmatmul.bf16.gmra.mxu0 %v4140_v17  ;;  %v4144_v47 = vpack.c.bf16 %v4112_v20, %v4108_v63  ;;  %v3522_v38 = vadd.f32 %v8420_v11, %v2933_v25  ;;  %v9129_v11 = vld [vmem:[#allocation88_spill] sm:$0xff] }
 0x8f2   : > { %v3513_v19 = vpop.f32.mrf.mxu0 }
 0x8f3   : > { %v8584_v44 = vadd.f32 %v3513_v19, %v2945_v35  ;;  %v4466_v9 = vpop.f32.mrf.mxu2  ;;  %v4420_v54 = vpop.f32.mrf.mxu1  ;;  %v9127_v35 = vld [vmem:[#allocation82_spill] sm:$0xff] }
 0x8f4   : > { %v2327_v19 = vadd.f32 %v9128_v22, %v9127_v35  ;;  %v4467_v27 = vadd.f32 %v4466_v9, %v4417_v10 }
 0x8f6   : > { %v2935_v55 = vadd.f32 %v9129_v11, %v2327_v19  ;;  %v4516_v63 = vadd.f32 %v4515_v48, %v4467_v27 }
 0x8fa   : > { %v3516_v31 = vpop.f32.mrf.mxu0 }
 0x8fb   : > { %v8589_v30 = vadd.f32 %v3516_v31, %v8401_v43  ;;  %v4469_v16 = vpop.f32.mrf.mxu2  ;;  %v4422_v49 = vpop.f32.mrf.mxu1 }
 0x8fd   : > { %4591 = vmatmul.bf16.gmra.mxu0 %v4144_v47 }
 0x902   : > { %v3518_v8 = vpop.f32.mrf.mxu0 }
 0x903   : > { %v8593_v32 = vadd.f32 %v3518_v8, %v2947_v24  ;;  %v4471_v45 = vpop.f32.mrf.mxu2  ;;  %v4425_v31 = vpop.f32.mrf.mxu1 }
 0x90a   : > { %v4557_v18 = vpop.f32.mrf.mxu0 }
 0x90b   : > { %v4558_v3 = vadd.f32 %v4557_v18, %v4509_v34  ;;  %v4474_v20 = vpop.f32.mrf.mxu2  ;;  %v4427_v9 = vpop.f32.mrf.mxu1  ;;  %v9131_v34 = vld [vmem:[#allocation25_spill] sm:$0xff] }
 0x90c   : > { %v2332_v18 = vadd.f32 %v9131_v34, %v9130_v15 }
 0x90d   : > { %v8596_v43 = vadd.f32 %v4558_v3, %v8415_v7  ;;  %v4465_v7 = vadd.f32 %v4464_v62, %v4415_v33  ;;  %v3524_v33 = vadd.f32 %v8435_v58, %v2935_v55  ;;  %v4472_v58 = vadd.f32 %v4471_v45, %v4422_v49  ;;  %v9134_v49 = vld [vmem:[#allocation23_spill] sm:$0xff] }
 0x90e   : > { %v2937_v3 = vadd.f32 %v8110_v61, %v2332_v18  ;;  %v9132_v61 = vld [vmem:[#allocation84_spill] sm:$0xff] }
 0x90f   : > { %4613 = vadd.xlane.f32.xlu2 %v8596_v43  ;;  %v4514_v4 = vadd.f32 %v4513_v14, %v4465_v7  ;;  %v4523_v14 = vpop.f32.mrf.mxu3 }
 0x910   : > { %v3526_v52 = vadd.f32 %v8451_v29, %v2937_v3  ;;  %v9136_v3 = vld [vmem:[#allocation33_spill] sm:$0xff] }
 0x912   : > { %v4559_v17 = vpop.f32.mrf.mxu0 }
 0x913   : > { %v4560_v36 = vadd.f32 %v4559_v17, %v4511_v46  ;;  %v4476_v8 = vpop.f32.mrf.mxu2 }
 0x914   : > { %v4477_v45 = vadd.f32 %v4476_v8, %v4427_v9 }
 0x915   : > { %v8603_v51 = vadd.f32 %v4560_v36, %v3522_v38  ;;  %v9133_v36 = vld [vmem:[#allocation21_spill] sm:$0xff] }
 0x916   : > { %v2337_v7 = vadd.f32 %v9133_v36, %v9132_v61 }
 0x917   : > { %4615 = vadd.xlane.f32.xlu0 %v8603_v51  ;;  %v4525_v48 = vpop.f32.mrf.mxu3 }
 0x91a   : > { %v4562_v26 = vpop.f32.mrf.mxu0 }
 0x91b   : > { %v4563_v39 = vadd.f32 %v4562_v26, %v4514_v4  ;;  %v4479_v12 = vpop.f32.mrf.mxu2  ;;  %v2939_v4 = vadd.f32 %v9134_v49, %v2337_v7  ;;  %v4526_v26 = vadd.f32 %v4525_v48, %v4477_v45 }
 0x91d   : > { %v8607_v13 = vadd.f32 %v4563_v39, %v8430_v5  ;;  %v4470_v5 = vadd.f32 %v4469_v16, %v4420_v54  ;;  %v4521_v16 = vadd.f32 %v4520_v42, %v4472_v58  ;;  %v3528_v22 = vadd.f32 %v8521_v37, %v2939_v4  ;;  %v9135_v58 = vld [vmem:[#allocation85_spill] sm:$0xff] }
 0x91f   : > { %4617 = vadd.xlane.f32.xlu1 %v8607_v13  ;;  %v4519_v2 = vadd.f32 %v4518_v57, %v4470_v5  ;;  %v4430_v57 = vpop.f32.mrf.mxu1  ;;  %v4528_v40 = vpop.f32.mrf.mxu3 }
 0x922   : > { %v4564_v62 = vpop.f32.mrf.mxu0 }
 0x923   : > { %v4565_v47 = vadd.f32 %v4564_v62, %v4516_v63  ;;  %v4481_v29 = vpop.f32.mrf.mxu2 }
 0x925   : > { %v8614_v28 = vadd.f32 %v4565_v47, %v3524_v33 }
 0x927   : > { %4619 = vadd.xlane.f32.xlu2 %v8614_v28  ;;  %v4432_v42 = vpop.f32.mrf.mxu1  ;;  %v4530_v39 = vpop.f32.mrf.mxu3 }
 0x928   : > { %v4482_v47 = vadd.f32 %v4481_v29, %v4432_v42 }
 0x92a   : > { %v4567_v50 = vpop.f32.mrf.mxu0 }
 0x92b   : > { %v4568_v24 = vadd.f32 %v4567_v50, %v4519_v2  ;;  %v4484_v55 = vpop.f32.mrf.mxu2 }
 0x92d   : > { %v8618_v10 = vadd.f32 %v4568_v24, %v8445_v56  ;;  %v4475_v56 = vadd.f32 %v4474_v20, %v4425_v31 }
 0x92f   : > { %4621 = vadd.xlane.f32.xlu0 %v8618_v10  ;;  %v4524_v25 = vadd.f32 %v4523_v14, %v4475_v56  ;;  %v4435_v20 = vpop.f32.mrf.mxu1  ;;  %v4533_v31 = vpop.f32.mrf.mxu3  ;;  %v4531_v14 = vadd.f32 %v4530_v39, %v4482_v47 }
 0x930   : > { %v4485_v9 = vadd.f32 %v4484_v55, %v4435_v20 }
 0x932   : > { %v4569_v41 = vpop.f32.mrf.mxu0  ;;  %v4534_v48 = vadd.f32 %v4533_v31, %v4485_v9 }
 0x933   : > { %v4570_v21 = vadd.f32 %v4569_v41, %v4521_v16  ;;  %v4486_v2 = vpop.f32.mrf.mxu2  ;;  %v2347_v16 = vadd.f32 %v9136_v3, %v9135_v58 }
 0x935   : > { %v8625_v54 = vadd.f32 %v4570_v21, %v3526_v52  ;;  %v2943_v21 = vadd.f32 %v8371_v1, %v2347_v16 }
 0x937   : > { %4623 = vadd.xlane.f32.xlu1 %v8625_v54  ;;  %v4437_v50 = vpop.f32.mrf.mxu1  ;;  %v4535_v8 = vpop.f32.mrf.mxu3  ;;  %v3532_v56 = vadd.f32 %v8574_v0, %v2943_v21 }
 0x938   : > { %v4487_v52 = vadd.f32 %v4486_v2, %v4437_v50 }
 0x93a   : > { %v4572_v46 = vpop.f32.mrf.mxu0 }
 0x93b   : > { %v4573_v17 = vadd.f32 %v4572_v46, %v4524_v25  ;;  %v4489_v18 = vpop.f32.mrf.mxu2  ;;  %v6570_v46 = vmov 128.0  }
 0x93c   : > { %6263 = vrcp.f32 %v6570_v46 }
 0x93d   : > { %v8629_v38 = vadd.f32 %v4573_v17, %v8461_v23  ;;  %v4480_v23 = vadd.f32 %v4479_v12, %v4430_v57  ;;  %v4536_v12 = vadd.f32 %v4535_v8, %v4487_v52 }
 0x93f   : > { %4625 = vadd.xlane.f32.xlu2 %v8629_v38  ;;  %v4529_v11 = vadd.f32 %v4528_v40, %v4480_v23  ;;  %v4440_v41 = vpop.f32.mrf.mxu1 }
 0x942   : > { %v4574_v35 = vpop.f32.mrf.mxu0  ;;  %v6264_v49 = vpop.eup %6263 }
 0x943   : > { %v4575_v19 = vadd.f32 %v4574_v35, %v4526_v26  ;;  %v4491_v17 = vpop.f32.mrf.mxu2  ;;  %v4646_v0 = vmul.f32 128.0, %v6264_v49  ;;  %vm4650_vm2 = vweird.f32 %v6264_v49 }
 0x945   : > { %v8636_v27 = vadd.f32 %v4575_v19, %v3528_v22  ;;  %v4647_v23 = vsub.f32 1.0, %v4646_v0 }
 0x947   : > { %4627 = vadd.xlane.f32.xlu0 %v8636_v27  ;;  %v4442_v61 = vpop.f32.mrf.mxu1 }
 0x948   : > { %v4492_v4 = vadd.f32 %v4491_v17, %v4442_v61 }
 0x94a   : > { %v4577_v63 = vpop.f32.mrf.mxu0 }
 0x94b   : > { %v4578_v62 = vadd.f32 %v4577_v63, %v4529_v11  ;;  %v4494_v26 = vpop.f32.mrf.mxu2  ;;  %v4648_v63 = vmul.f32 %v6264_v49, %v4647_v23 }
 0x94d   : > { %v8640_v33 = vadd.f32 %v4578_v62, %v8532_v6  ;;  %v4649_v47 = vadd.f32 %v6264_v49, %v4648_v63 }
 0x94f   : > { %4629 = vadd.xlane.f32.xlu1 %v8640_v33  ;;  %v4445_v22 = vpop.f32.mrf.mxu1 }
 0x950   : > { %v4495_v55 = vadd.f32 %v4494_v26, %v4445_v22 }
 0x952   : > { %v4579_v37 = vpop.f32.mrf.mxu0 }
 0x953   : > { %v4580_v5 = vadd.f32 %v4579_v37, %v4531_v14  ;;  %v4496_v31 = vpop.f32.mrf.mxu2 }
 0x955   : > { %v8644_v24 = vadd.f32 %v4580_v5, %v8539_v53  ;;  %v4538_v53 = vpop.f32.mrf.mxu3 }
 0x957   : > { %4631 = vadd.xlane.f32.xlu2 %v8644_v24  ;;  %v4447_v37 = vpop.f32.mrf.mxu1 }
 0x958   : > { %v4497_v2 = vadd.f32 %v4496_v31, %v4447_v37 }
 0x95a   : > { %v4582_v15 = vpop.f32.mrf.mxu0 }
 0x95b   : > { %v4583_v34 = vadd.f32 %v4582_v15, %v4534_v48 }
 0x95d   : > { %v8648_v6 = vadd.f32 %v4583_v34, %v8570_v59  ;;  %v4490_v59 = vadd.f32 %v4489_v18, %v4440_v41  ;;  %v4540_v7 = vpop.f32.mrf.mxu3 }
 0x95e   : > { %v4541_v42 = vadd.f32 %v4540_v7, %v4492_v4 }
 0x95f   : > { %4633 = vadd.xlane.f32.xlu0 %v8648_v6  ;;  %v4539_v36 = vadd.f32 %v4538_v53, %v4490_v59 }
 0x962   : > { %v4584_v57 = vpop.f32.mrf.mxu0 }
 0x963   : > { %v4585_v40 = vadd.f32 %v4584_v57, %v4536_v12 }
 0x965   : > { %v8655_v25 = vadd.f32 %v4585_v40, %v3532_v56  ;;  %v4543_v19 = vpop.f32.mrf.mxu3 }
 0x967   : > { %4635 = vadd.xlane.f32.xlu1 %v8655_v25 }
 0x96a   : > { %v4587_v45 = vpop.f32.mrf.mxu0 }
 0x96b   : > { %v4588_v29 = vadd.f32 %v4587_v45, %v4539_v36 }
 0x96d   : > { %v8659_v1 = vadd.f32 %v4588_v29, %v8579_v60  ;;  %v4544_v60 = vadd.f32 %v4543_v19, %v4495_v55  ;;  %v4545_v5 = vpop.f32.mrf.mxu3 }
 0x96e   : > { %v4546_v50 = vadd.f32 %v4545_v5, %v4497_v2 }
 0x96f   : > { %4637 = vadd.xlane.f32.xlu2 %v8659_v1 }
 0x972   : > { %v4589_v39 = vpop.f32.mrf.mxu0 }
 0x973   : > { %v4590_v35 = vadd.f32 %v4589_v39, %v4541_v42 }
 0x975   : > { %v8663_v11 = vadd.f32 %v4590_v35, %v8584_v44  ;;  %v8670_v44 = vsel %vm4650_vm2, %v6264_v49, %v4649_v47 }
 0x977   : > { %4639 = vadd.xlane.f32.xlu0 %v8663_v11 }
 0x97a   : > { %v4592_v20 = vpop.f32.mrf.mxu0 }
 0x97b   : > { %v4593_v62 = vadd.f32 %v4592_v20, %v4544_v60 }
 0x97d   : > { %v8667_v14 = vadd.f32 %v4593_v62, %v8589_v30 }
 0x97f   : > { %4641 = vadd.xlane.f32.xlu1 %v8667_v14 }
 0x982   : > { %v4594_v8 = vpop.f32.mrf.mxu0  ;;  %v4614_v9 = vpop.xlane.xlu2 %4613 }
 0x983   : > { %v4595_v48 = vadd.f32 %v4594_v8, %v4546_v50  ;;  %v4652_v15 = vmul.f32 %v8670_v44, %v4614_v9 }
 0x985   : > { %v8674_v34 = vadd.f32 %v4595_v48, %v8593_v32  ;;  %v8677_v30 = vsub.f32 %v8596_v43, %v4652_v15 }
 0x987   : > { %4643 = vadd.xlane.f32.xlu2 %v8674_v34  ;;  %v4684_v18 = vmul.f32 %v8677_v30, %v8677_v30 }
 0x989   : > { %4700 = vadd.xlane.f32.xlu0 %v4684_v18 }
 0x98a   : > { %v4616_v58 = vpop.xlane.xlu0 %4615 }
 0x98b   : > { %v4653_v3 = vmul.f32 %v8670_v44, %v4616_v58 }
 0x98d   : > { %v8684_v16 = vsub.f32 %v8603_v51, %v4653_v3 }
 0x98f   : > { %v4685_v41 = vmul.f32 %v8684_v16, %v8684_v16 }
 0x991   : > { %4702 = vadd.xlane.f32.xlu1 %v4685_v41 }
 0x992   : > { %v4618_v32 = vpop.xlane.xlu1 %4617 }
 0x993   : > { %v4654_v43 = vmul.f32 %v8670_v44, %v4618_v32 }
 0x995   : > { %v8690_v52 = vsub.f32 %v8607_v13, %v4654_v43 }
 0x997   : > { %v4686_v53 = vmul.f32 %v8690_v52, %v8690_v52 }
 0x999   : > { %4704 = vadd.xlane.f32.xlu2 %v4686_v53 }
 0x99a   : > { %v4620_v21 = vpop.xlane.xlu2 %4619 }
 0x99b   : > { %v4655_v12 = vmul.f32 %v8670_v44, %v4620_v21 }
 0x99d   : > { %v8696_v51 = vsub.f32 %v8614_v28, %v4655_v12 }
 0x99f   : > { %v4687_v57 = vmul.f32 %v8696_v51, %v8696_v51 }
 0x9a1   : > { %4706 = vadd.xlane.f32.xlu0 %v4687_v57 }
 0x9a2   : > { %v4622_v56 = vpop.xlane.xlu0 %4621 }
 0x9a3   : > { %v4656_v40 = vmul.f32 %v8670_v44, %v4622_v56 }
 0x9a5   : > { %v8702_v13 = vsub.f32 %v8618_v10, %v4656_v40 }
 0x9a7   : > { %v4688_v59 = vmul.f32 %v8702_v13, %v8702_v13 }
 0x9a9   : > { %4708 = vadd.xlane.f32.xlu1 %v4688_v59 }
 0x9aa   : > { %v4624_v46 = vpop.xlane.xlu1 %4623 }
 0x9ab   : > { %v4657_v17 = vmul.f32 %v8670_v44, %v4624_v46 }
 0x9ad   : > { %v8708_v28 = vsub.f32 %v8625_v54, %v4657_v17 }
 0x9af   : > { %v4689_v61 = vmul.f32 %v8708_v28, %v8708_v28 }
 0x9b1   : > { %4710 = vadd.xlane.f32.xlu2 %v4689_v61 }
 0x9b2   : > { %v4626_v36 = vpop.xlane.xlu2 %4625 }
 0x9b3   : > { %v4658_v7 = vmul.f32 %v8670_v44, %v4626_v36  ;;  %v8778_v36 = vld [vmem:[%s8895_s5] ss:$0 sm:$0xff] }
 0x9b5   : > { %v8714_v10 = vsub.f32 %v8629_v38, %v4658_v7 }
 0x9b7   : > { %v4690_v45 = vmul.f32 %v8714_v10, %v8714_v10 }
 0x9b9   : > { %4712 = vadd.xlane.f32.xlu0 %v4690_v45 }
 0x9ba   : > { %v4628_v29 = vpop.xlane.xlu0 %4627 }
 0x9bb   : > { %v4659_v49 = vmul.f32 %v8670_v44, %v4628_v29 }
 0x9bd   : > { %v8720_v54 = vsub.f32 %v8636_v27, %v4659_v49 }
 0x9bf   : > { %v4691_v4 = vmul.f32 %v8720_v54, %v8720_v54 }
 0x9c1   : > { %4714 = vadd.xlane.f32.xlu1 %v4691_v4 }
 0x9c2   : > { %v4630_v0 = vpop.xlane.xlu1 %4629 }
 0x9c3   : > { %v4660_v42 = vmul.f32 %v8670_v44, %v4630_v0 }
 0x9c5   : > { %v8726_v38 = vsub.f32 %v8640_v33, %v4660_v42 }
 0x9c7   : > { %v4692_v26 = vmul.f32 %v8726_v38, %v8726_v38 }
 0x9c9   : > { %4716 = vadd.xlane.f32.xlu2 %v4692_v26 }
 0x9ca   : > { %v4632_v39 = vpop.xlane.xlu2 %4631 }
 0x9cb   : > { %v4661_v35 = vmul.f32 %v8670_v44, %v4632_v39 }
 0x9cd   : > { %v8732_v27 = vsub.f32 %v8644_v24, %v4661_v35 }
 0x9cf   : > { %v4693_v22 = vmul.f32 %v8732_v27, %v8732_v27 }
 0x9d1   : > { %4718 = vadd.xlane.f32.xlu0 %v4693_v22 }
 0x9d2   : > { %v4634_v19 = vpop.xlane.xlu0 %4633 }
 0x9d3   : > { %v4662_v23 = vmul.f32 %v8670_v44, %v4634_v19 }
 0x9d5   : > { %v8738_v33 = vsub.f32 %v8648_v6, %v4662_v23 }
 0x9d7   : > { %v4694_v55 = vmul.f32 %v8738_v33, %v8738_v33 }
 0x9d9   : > { %4720 = vadd.xlane.f32.xlu1 %v4694_v55 }
 0x9da   : > { %v4636_v63 = vpop.xlane.xlu1 %4635 }
 0x9db   : > { %v4663_v60 = vmul.f32 %v8670_v44, %v4636_v63 }
 0x9dd   : > { %v8744_v24 = vsub.f32 %v8655_v25, %v4663_v60 }
 0x9df   : > { %v4695_v20 = vmul.f32 %v8744_v24, %v8744_v24 }
 0x9e1   : > { %4722 = vadd.xlane.f32.xlu2 %v4695_v20 }
 0x9e2   : > { %v4638_v62 = vpop.xlane.xlu2 %4637 }
 0x9e3   : > { %v4664_v31 = vmul.f32 %v8670_v44, %v4638_v62 }
 0x9e5   : > { %v8750_v6 = vsub.f32 %v8659_v1, %v4664_v31 }
 0x9e7   : > { %v4696_v47 = vmul.f32 %v8750_v6, %v8750_v6 }
 0x9e9   : > { %4724 = vadd.xlane.f32.xlu0 %v4696_v47 }
 0x9ea   : > { %v4640_v37 = vpop.xlane.xlu0 %4639 }
 0x9eb   : > { %v4665_v5 = vmul.f32 %v8670_v44, %v4640_v37 }
 0x9ed   : > { %v8756_v25 = vsub.f32 %v8663_v11, %v4665_v5 }
 0x9ef   : > { %v4697_v2 = vmul.f32 %v8756_v25, %v8756_v25 }
 0x9f1   : > { %4726 = vadd.xlane.f32.xlu1 %v4697_v2 }
 0x9f2   : > { %v4642_v50 = vpop.xlane.xlu1 %4641 }
 0x9f3   : > { %v4666_v8 = vmul.f32 %v8670_v44, %v4642_v50 }
 0x9f5   : > { %v8762_v1 = vsub.f32 %v8667_v14, %v4666_v8 }
 0x9f7   : > { %v4698_v9 = vmul.f32 %v8762_v1, %v8762_v1 }
 0x9f9   : > { %4728 = vadd.xlane.f32.xlu2 %v4698_v9 }
 0x9fa   : > { %v4644_v48 = vpop.xlane.xlu2 %4643 }
 0x9fb   : > { %v4667_v15 = vmul.f32 %v8670_v44, %v4644_v48 }
 0x9fc   : > { %v4701_v18 = vpop.xlane.xlu0 %4700 }
 0x9fd   : > { %v8768_v11 = vsub.f32 %v8674_v34, %v4667_v15  ;;  %v4732_v58 = vmul.f32 %v4701_v18, %v8670_v44 }
 0x9ff   : > { %v4748_v3 = vadd.f32 1e-05, %v4732_v58  ;;  %v4699_v41 = vmul.f32 %v8768_v11, %v8768_v11 }
 0xa01   : > { %6265 = vrsqrt.f32 %v4748_v3  ;;  %4730 = vadd.xlane.f32.xlu0 %v4699_v41  ;;  %vm4770_vm4 = vweird.f32 %v4748_v3 }
 0xa04   : > { %v4703_v14 = vpop.xlane.xlu1 %4702 }
 0xa05   : > { %v4733_v32 = vmul.f32 %v4703_v14, %v8670_v44 }
 0xa07   : > { %v6266_v43 = vpop.eup %6265  ;;  %v4749_v53 = vadd.f32 1e-05, %v4733_v32 }
 0xa08   : > { %v4765_v21 = vmul.f32 %v6266_v43, %v4748_v3  ;;  %vm4771_vm3 = vweird.f32 %v6266_v43 }
 0xa09   : > { %6267 = vrsqrt.f32 %v4749_v53  ;;  %vm4772_vm5 = vmor %vm4770_vm4, %vm4771_vm3  ;;  %vm4780_vm7 = vweird.f32 %v4749_v53 }
 0xa0a   : > { %v4766_v12 = vmul.f32 %v6266_v43, %v4765_v21 }
 0xa0c   : > { %v4767_v57 = vmul.f32 0.5, %v4766_v12  ;;  %v4705_v56 = vpop.xlane.xlu2 %4704 }
 0xa0d   : > { %v4734_v34 = vmul.f32 %v4705_v56, %v8670_v44 }
 0xa0e   : > { %v4768_v40 = vsub.f32 1.5, %v4767_v57 }
 0xa0f   : > { %v6268_v59 = vpop.eup %6267  ;;  %v4750_v46 = vadd.f32 1e-05, %v4734_v34 }
 0xa10   : > { %v4769_v17 = vmul.f32 %v6266_v43, %v4768_v40  ;;  %v4775_v61 = vmul.f32 %v6268_v59, %v4749_v53  ;;  %vm4781_vm6 = vweird.f32 %v6268_v59 }
 0xa11   : > { %6269 = vrsqrt.f32 %v4750_v46  ;;  %vm4782_vm8 = vmor %vm4780_vm7, %vm4781_vm6  ;;  %vm4790_vm10 = vweird.f32 %v4750_v46 }
 0xa12   : > { %v4773_v7 = vsel %vm4772_vm5, %v6266_v43, %v4769_v17  ;;  %v4776_v45 = vmul.f32 %v6268_v59, %v4775_v61 }
 0xa13   : > { %v4924_v29 = vmul.f32 %v4773_v7, %v8677_v30 }
 0xa14   : > { %v4777_v49 = vmul.f32 0.5, %v4776_v45  ;;  %v4707_v4 = vpop.xlane.xlu0 %4706 }
 0xa15   : > { %v4944_v0 = vmul.f32 %v8778_v36, %v4924_v29  ;;  %v4735_v42 = vmul.f32 %v4707_v4, %v8670_v44 }
 0xa16   : > { %v4778_v26 = vsub.f32 1.5, %v4777_v49 }
 0xa17   : > { %v6270_v39 = vpop.eup %6269  ;;  %4960 = vst [vmem:[%s8785_s13] sm:$0xff] %v4944_v0  ;;  %v4751_v35 = vadd.f32 1e-05, %v4735_v42 }
 0xa18   : > { %v4779_v22 = vmul.f32 %v6268_v59, %v4778_v26  ;;  %v4785_v19 = vmul.f32 %v6270_v39, %v4750_v46  ;;  %vm4791_vm9 = vweird.f32 %v6270_v39 }
 0xa19   : > { %6271 = vrsqrt.f32 %v4751_v35  ;;  %vm4792_vm11 = vmor %vm4790_vm10, %vm4791_vm9  ;;  %vm4800_vm13 = vweird.f32 %v4751_v35 }
 0xa1a   : > { %v4783_v30 = vsel %vm4782_vm8, %v6268_v59, %v4779_v22  ;;  %v4786_v23 = vmul.f32 %v6270_v39, %v4785_v19 }
 0xa1b   : > { %v4925_v55 = vmul.f32 %v4783_v30, %v8684_v16 }
 0xa1c   : > { %v4787_v63 = vmul.f32 0.5, %v4786_v23  ;;  %v4709_v60 = vpop.xlane.xlu1 %4708 }
 0xa1d   : > { %v4945_v20 = vmul.f32 %v8778_v36, %v4925_v55  ;;  %v4736_v62 = vmul.f32 %v4709_v60, %v8670_v44 }
 0xa1e   : > { %v4788_v31 = vsub.f32 1.5, %v4787_v63 }
 0xa1f   : > { %v6272_v47 = vpop.eup %6271  ;;  %4961 = vst [vmem:[%s8785_s13 + $0x8] sm:$0xff] %v4945_v20  ;;  %v4752_v37 = vadd.f32 1e-05, %v4736_v62 }
 0xa20   : > { %v4789_v5 = vmul.f32 %v6270_v39, %v4788_v31  ;;  %v4795_v2 = vmul.f32 %v6272_v47, %v4751_v35  ;;  %vm4801_vm12 = vweird.f32 %v6272_v47 }
 0xa21   : > { %6273 = vrsqrt.f32 %v4752_v37  ;;  %vm4802_vm14 = vmor %vm4800_vm13, %vm4801_vm12  ;;  %vm4810_vm0 = vweird.f32 %v4752_v37 }
 0xa22   : > { %v4793_v50 = vsel %vm4792_vm11, %v6270_v39, %v4789_v5  ;;  %v4796_v8 = vmul.f32 %v6272_v47, %v4795_v2 }
 0xa23   : > { %v4926_v16 = vmul.f32 %v4793_v50, %v8690_v52 }
 0xa24   : > { %v4797_v9 = vmul.f32 0.5, %v4796_v8  ;;  %v4711_v48 = vpop.xlane.xlu2 %4710 }
 0xa25   : > { %v4946_v15 = vmul.f32 %v8778_v36, %v4926_v16  ;;  %v4737_v18 = vmul.f32 %v4711_v48, %v8670_v44 }
 0xa26   : > { %v4798_v58 = vsub.f32 1.5, %v4797_v9 }
 0xa27   : > { %v6274_v3 = vpop.eup %6273  ;;  %4962 = vst [vmem:[%s8785_s13 + $0x10] sm:$0xff] %v4946_v15  ;;  %v4753_v41 = vadd.f32 1e-05, %v4737_v18 }
 0xa28   : > { %v4799_v14 = vmul.f32 %v6272_v47, %v4798_v58  ;;  %v4805_v32 = vmul.f32 %v6274_v3, %v4752_v37  ;;  %vm4811_vm15 = vweird.f32 %v6274_v3 }
 0xa29   : > { %6275 = vrsqrt.f32 %v4753_v41  ;;  %vm4812_vm1 = vmor %vm4810_vm0, %vm4811_vm15  ;;  %vm4820_vm3 = vweird.f32 %v4753_v41 }
 0xa2a   : > { %v4803_v43 = vsel %vm4802_vm14, %v6272_v47, %v4799_v14  ;;  %v4806_v53 = vmul.f32 %v6274_v3, %v4805_v32 }
 0xa2b   : > { %v4927_v52 = vmul.f32 %v4803_v43, %v8696_v51 }
 0xa2c   : > { %v4807_v21 = vmul.f32 0.5, %v4806_v53  ;;  %v4713_v12 = vpop.xlane.xlu0 %4712 }
 0xa2d   : > { %v4947_v57 = vmul.f32 %v8778_v36, %v4927_v52  ;;  %v4738_v56 = vmul.f32 %v4713_v12, %v8670_v44 }
 0xa2e   : > { %v4808_v34 = vsub.f32 1.5, %v4807_v21 }
 0xa2f   : > { %v6276_v40 = vpop.eup %6275  ;;  %4963 = vst [vmem:[%s8785_s13 + $0x18] sm:$0xff] %v4947_v57  ;;  %v4754_v59 = vadd.f32 1e-05, %v4738_v56 }
 0xa30   : > { %v4809_v46 = vmul.f32 %v6274_v3, %v4808_v34  ;;  %v4815_v17 = vmul.f32 %v6276_v40, %v4753_v41  ;;  %vm4821_vm2 = vweird.f32 %v6276_v40 }
 0xa31   : > { %6277 = vrsqrt.f32 %v4754_v59  ;;  %vm4822_vm4 = vmor %vm4820_vm3, %vm4821_vm2  ;;  %vm4830_vm6 = vweird.f32 %v4754_v59 }
 0xa32   : > { %v4813_v61 = vsel %vm4812_vm1, %v6274_v3, %v4809_v46  ;;  %v4816_v7 = vmul.f32 %v6276_v40, %v4815_v17 }
 0xa33   : > { %v4928_v51 = vmul.f32 %v4813_v61, %v8702_v13 }
 0xa34   : > { %v4817_v45 = vmul.f32 0.5, %v4816_v7  ;;  %v4715_v29 = vpop.xlane.xlu1 %4714 }
 0xa35   : > { %v4948_v49 = vmul.f32 %v8778_v36, %v4928_v51  ;;  %v4739_v4 = vmul.f32 %v4715_v29, %v8670_v44 }
 0xa36   : > { %v4818_v0 = vsub.f32 1.5, %v4817_v45 }
 0xa37   : > { %v6278_v42 = vpop.eup %6277  ;;  %4964 = vst [vmem:[%s8785_s13 + $0x20] sm:$0xff] %v4948_v49  ;;  %v4755_v26 = vadd.f32 1e-05, %v4739_v4 }
 0xa38   : > { %v4819_v39 = vmul.f32 %v6276_v40, %v4818_v0  ;;  %v4825_v35 = vmul.f32 %v6278_v42, %v4754_v59  ;;  %vm4831_vm5 = vweird.f32 %v6278_v42 }
 0xa39   : > { %6279 = vrsqrt.f32 %v4755_v26  ;;  %vm4832_vm7 = vmor %vm4830_vm6, %vm4831_vm5  ;;  %vm4840_vm9 = vweird.f32 %v4755_v26 }
 0xa3a   : > { %v4823_v22 = vsel %vm4822_vm4, %v6276_v40, %v4819_v39  ;;  %v4826_v19 = vmul.f32 %v6278_v42, %v4825_v35 }
 0xa3b   : > { %v4929_v13 = vmul.f32 %v4823_v22, %v8708_v28 }
 0xa3c   : > { %v4827_v30 = vmul.f32 0.5, %v4826_v19  ;;  %v4717_v23 = vpop.xlane.xlu2 %4716 }
 0xa3d   : > { %v4949_v55 = vmul.f32 %v8778_v36, %v4929_v13  ;;  %v4740_v63 = vmul.f32 %v4717_v23, %v8670_v44 }
 0xa3e   : > { %v4828_v60 = vsub.f32 1.5, %v4827_v30 }
 0xa3f   : > { %v6280_v20 = vpop.eup %6279  ;;  %4965 = vst [vmem:[%s8785_s13 + $0x28] sm:$0xff] %v4949_v55  ;;  %v4756_v62 = vadd.f32 1e-05, %v4740_v63 }
 0xa40   : > { %v4829_v31 = vmul.f32 %v6278_v42, %v4828_v60  ;;  %v4835_v47 = vmul.f32 %v6280_v20, %v4755_v26  ;;  %vm4841_vm8 = vweird.f32 %v6280_v20 }
 0xa41   : > { %6281 = vrsqrt.f32 %v4756_v62  ;;  %vm4842_vm10 = vmor %vm4840_vm9, %vm4841_vm8  ;;  %vm4850_vm12 = vweird.f32 %v4756_v62 }
 0xa42   : > { %v4833_v37 = vsel %vm4832_vm7, %v6278_v42, %v4829_v31  ;;  %v4836_v5 = vmul.f32 %v6280_v20, %v4835_v47 }
 0xa43   : > { %v4930_v28 = vmul.f32 %v4833_v37, %v8714_v10 }
 0xa44   : > { %v4837_v2 = vmul.f32 0.5, %v4836_v5  ;;  %v4719_v50 = vpop.xlane.xlu0 %4718 }
 0xa45   : > { %v4950_v8 = vmul.f32 %v8778_v36, %v4930_v28  ;;  %v4741_v16 = vmul.f32 %v4719_v50, %v8670_v44 }
 0xa46   : > { %v4838_v9 = vsub.f32 1.5, %v4837_v2 }
 0xa47   : > { %v6282_v48 = vpop.eup %6281  ;;  %4966 = vst [vmem:[%s8785_s13 + $0x30] sm:$0xff] %v4950_v8  ;;  %v4757_v15 = vadd.f32 1e-05, %v4741_v16 }
 0xa48   : > { %v4839_v18 = vmul.f32 %v6280_v20, %v4838_v9  ;;  %v4845_v58 = vmul.f32 %v6282_v48, %v4756_v62  ;;  %vm4851_vm11 = vweird.f32 %v6282_v48 }
 0xa49   : > { %6283 = vrsqrt.f32 %v4757_v15  ;;  %vm4852_vm13 = vmor %vm4850_vm12, %vm4851_vm11  ;;  %vm4860_vm15 = vweird.f32 %v4757_v15 }
 0xa4a   : > { %v4843_v3 = vsel %vm4842_vm10, %v6280_v20, %v4839_v18  ;;  %v4846_v41 = vmul.f32 %v6282_v48, %v4845_v58 }
 0xa4b   : > { %v4931_v10 = vmul.f32 %v4843_v3, %v8720_v54 }
 0xa4c   : > { %v4847_v14 = vmul.f32 0.5, %v4846_v41  ;;  %v4721_v32 = vpop.xlane.xlu1 %4720 }
 0xa4d   : > { %v4951_v43 = vmul.f32 %v8778_v36, %v4931_v10  ;;  %v4742_v53 = vmul.f32 %v4721_v32, %v8670_v44 }
 0xa4e   : > { %v4848_v52 = vsub.f32 1.5, %v4847_v14 }
 0xa4f   : > { %v6284_v21 = vpop.eup %6283  ;;  %4967 = vst [vmem:[%s8785_s13 + $0x38] sm:$0xff] %v4951_v43  ;;  %v4758_v12 = vadd.f32 1e-05, %v4742_v53 }
 0xa50   : > { %v4849_v57 = vmul.f32 %v6282_v48, %v4848_v52  ;;  %v4855_v56 = vmul.f32 %v6284_v21, %v4757_v15  ;;  %vm4861_vm14 = vweird.f32 %v6284_v21 }
 0xa51   : > { %6285 = vrsqrt.f32 %v4758_v12  ;;  %vm4862_vm0 = vmor %vm4860_vm15, %vm4861_vm14  ;;  %vm4870_vm2 = vweird.f32 %v4758_v12 }
 0xa52   : > { %v4853_v34 = vsel %vm4852_vm13, %v6282_v48, %v4849_v57  ;;  %v4856_v40 = vmul.f32 %v6284_v21, %v4855_v56 }
 0xa53   : > { %v4932_v54 = vmul.f32 %v4853_v34, %v8726_v38 }
 0xa54   : > { %v4857_v59 = vmul.f32 0.5, %v4856_v40  ;;  %v4723_v46 = vpop.xlane.xlu2 %4722 }
 0xa55   : > { %v4952_v17 = vmul.f32 %v8778_v36, %v4932_v54  ;;  %v4743_v61 = vmul.f32 %v4723_v46, %v8670_v44 }
 0xa56   : > { %v4858_v7 = vsub.f32 1.5, %v4857_v59 }
 0xa57   : > { %v6286_v51 = vpop.eup %6285  ;;  %4968 = vst [vmem:[%s8785_s13 + $0x40] sm:$0xff] %v4952_v17  ;;  %v4759_v45 = vadd.f32 1e-05, %v4743_v61 }
 0xa58   : > { %v4859_v29 = vmul.f32 %v6284_v21, %v4858_v7  ;;  %v4865_v49 = vmul.f32 %v6286_v51, %v4758_v12  ;;  %vm4871_vm1 = vweird.f32 %v6286_v51 }
 0xa59   : > { %6287 = vrsqrt.f32 %v4759_v45  ;;  %vm4872_vm3 = vmor %vm4870_vm2, %vm4871_vm1  ;;  %vm4880_vm5 = vweird.f32 %v4759_v45 }
 0xa5a   : > { %v4863_v4 = vsel %vm4862_vm0, %v6284_v21, %v4859_v29  ;;  %v4866_v0 = vmul.f32 %v6286_v51, %v4865_v49 }
 0xa5b   : > { %v4933_v38 = vmul.f32 %v4863_v4, %v8732_v27 }
 0xa5c   : > { %v4867_v42 = vmul.f32 0.5, %v4866_v0  ;;  %v4725_v26 = vpop.xlane.xlu0 %4724 }
 0xa5d   : > { %v4953_v39 = vmul.f32 %v8778_v36, %v4933_v38  ;;  %v4744_v35 = vmul.f32 %v4725_v26, %v8670_v44 }
 0xa5e   : > { %v4868_v22 = vsub.f32 1.5, %v4867_v42 }
 0xa5f   : > { %v6288_v19 = vpop.eup %6287  ;;  %4969 = vst [vmem:[%s8785_s13 + $0x48] sm:$0xff] %v4953_v39  ;;  %v4760_v13 = vadd.f32 1e-05, %v4744_v35 }
 0xa60   : > { %v4869_v30 = vmul.f32 %v6286_v51, %v4868_v22  ;;  %v4875_v23 = vmul.f32 %v6288_v19, %v4759_v45  ;;  %vm4881_vm4 = vweird.f32 %v6288_v19 }
 0xa61   : > { %6289 = vrsqrt.f32 %v4760_v13  ;;  %vm4882_vm6 = vmor %vm4880_vm5, %vm4881_vm4  ;;  %vm4890_vm8 = vweird.f32 %v4760_v13 }
 0xa62   : > { %v4873_v55 = vsel %vm4872_vm3, %v6286_v51, %v4869_v30  ;;  %v4876_v63 = vmul.f32 %v6288_v19, %v4875_v23 }
 0xa63   : > { %v4934_v27 = vmul.f32 %v4873_v55, %v8738_v33 }
 0xa64   : > { %v4877_v60 = vmul.f32 0.5, %v4876_v63  ;;  %v4727_v20 = vpop.xlane.xlu1 %4726 }
 0xa65   : > { %v4954_v62 = vmul.f32 %v8778_v36, %v4934_v27  ;;  %v4745_v31 = vmul.f32 %v4727_v20, %v8670_v44 }
 0xa66   : > { %v4878_v47 = vsub.f32 1.5, %v4877_v60 }
 0xa67   : > { %v6290_v37 = vpop.eup %6289  ;;  %4970 = vst [vmem:[%s8785_s13 + $0x50] sm:$0xff] %v4954_v62  ;;  %v4761_v5 = vadd.f32 1e-05, %v4745_v31 }
 0xa68   : > { %v4879_v28 = vmul.f32 %v6288_v19, %v4878_v47  ;;  %v4885_v2 = vmul.f32 %v6290_v37, %v4760_v13  ;;  %vm4891_vm7 = vweird.f32 %v6290_v37 }
 0xa69   : > { %6291 = vrsqrt.f32 %v4761_v5  ;;  %vm4892_vm9 = vmor %vm4890_vm8, %vm4891_vm7  ;;  %vm4900_vm11 = vweird.f32 %v4761_v5 }
 0xa6a   : > { %v4883_v50 = vsel %vm4882_vm6, %v6288_v19, %v4879_v28  ;;  %v4886_v8 = vmul.f32 %v6290_v37, %v4885_v2 }
 0xa6b   : > { %v4935_v33 = vmul.f32 %v4883_v50, %v8744_v24 }
 0xa6c   : > { %v4887_v16 = vmul.f32 0.5, %v4886_v8  ;;  %v4729_v9 = vpop.xlane.xlu2 %4728 }
 0xa6d   : > { %v4955_v48 = vmul.f32 %v8778_v36, %v4935_v33  ;;  %v4746_v15 = vmul.f32 %v4729_v9, %v8670_v44 }
 0xa6e   : > { %v4888_v18 = vsub.f32 1.5, %v4887_v16 }
 0xa6f   : > { %v6292_v58 = vpop.eup %6291  ;;  %4971 = vst [vmem:[%s8785_s13 + $0x58] sm:$0xff] %v4955_v48  ;;  %v4762_v3 = vadd.f32 1e-05, %v4746_v15 }
 0xa70   : > { %v4889_v41 = vmul.f32 %v6290_v37, %v4888_v18  ;;  %v4895_v10 = vmul.f32 %v6292_v58, %v4761_v5  ;;  %vm4901_vm10 = vweird.f32 %v6292_v58 }
 0xa71   : > { %6293 = vrsqrt.f32 %v4762_v3  ;;  %vm4902_vm12 = vmor %vm4900_vm11, %vm4901_vm10  ;;  %vm4910_vm14 = vweird.f32 %v4762_v3 }
 0xa72   : > { %v4893_v14 = vsel %vm4892_vm9, %v6290_v37, %v4889_v41  ;;  %v4896_v32 = vmul.f32 %v6292_v58, %v4895_v10 }
 0xa73   : > { %v4936_v24 = vmul.f32 %v4893_v14, %v8750_v6 }
 0xa74   : > { %v4897_v43 = vmul.f32 0.5, %v4896_v32  ;;  %v4731_v53 = vpop.xlane.xlu0 %4730 }
 0xa75   : > { %v4956_v52 = vmul.f32 %v8778_v36, %v4936_v24  ;;  %v4747_v21 = vmul.f32 %v4731_v53, %v8670_v44 }
 0xa76   : > { %v4898_v12 = vsub.f32 1.5, %v4897_v43 }
 0xa77   : > { %v6294_v57 = vpop.eup %6293  ;;  %4972 = vst [vmem:[%s8785_s13 + $0x60] sm:$0xff] %v4956_v52  ;;  %v4763_v56 = vadd.f32 1e-05, %v4747_v21 }
 0xa78   : > { %v4899_v34 = vmul.f32 %v6292_v58, %v4898_v12  ;;  %v4905_v40 = vmul.f32 %v6294_v57, %v4762_v3  ;;  %vm4911_vm13 = vweird.f32 %v6294_v57 }
 0xa79   : > { %6295 = vrsqrt.f32 %v4763_v56  ;;  %vm4912_vm15 = vmor %vm4910_vm14, %vm4911_vm13  ;;  %vm4920_vm1 = vweird.f32 %v4763_v56 }
 0xa7a   : > { %v4903_v6 = vsel %vm4902_vm12, %v6292_v58, %v4899_v34  ;;  %v4906_v54 = vmul.f32 %v6294_v57, %v4905_v40 }
 0xa7b   : > { %v4937_v59 = vmul.f32 %v4903_v6, %v8756_v25 }
 0xa7c   : > { %v4907_v46 = vmul.f32 0.5, %v4906_v54 }
 0xa7d   : > { %v4957_v44 = vmul.f32 %v8778_v36, %v4937_v59 }
 0xa7e   : > { %v4908_v17 = vsub.f32 1.5, %v4907_v46 }
 0xa7f   : > { %v6296_v61 = vpop.eup %6295  ;;  %4973 = vst [vmem:[%s8785_s13 + $0x68] sm:$0xff] %v4957_v44 }
 0xa80   : > { %v4909_v7 = vmul.f32 %v6294_v57, %v4908_v17  ;;  %v4915_v51 = vmul.f32 %v6296_v61, %v4763_v56  ;;  %vm4921_vm0 = vweird.f32 %v6296_v61 }
 0xa81   : > { %vm4922_vm2 = vmor %vm4920_vm1, %vm4921_vm0 }
 0xa82   : > { %v4913_v45 = vsel %vm4912_vm15, %v6294_v57, %v4909_v7  ;;  %v4916_v29 = vmul.f32 %v6296_v61, %v4915_v51 }
 0xa83   : > { %v4938_v49 = vmul.f32 %v4913_v45, %v8762_v1 }
 0xa84   : > { %v4917_v25 = vmul.f32 0.5, %v4916_v29 }
 0xa85   : > { %v4958_v4 = vmul.f32 %v8778_v36, %v4938_v49 }
 0xa86   : > { %v4918_v0 = vsub.f32 1.5, %v4917_v25 }
 0xa87   : > { %4974 = vst [vmem:[%s8785_s13 + $0x70] sm:$0xff] %v4958_v4 }
 0xa88   : > { %v4919_v38 = vmul.f32 %v6296_v61, %v4918_v0 }
 0xa8a   : > { %v4923_v1 = vsel %vm4922_vm2, %v6296_v61, %v4919_v38 }
 0xa8b   : > { %v4939_v42 = vmul.f32 %v4923_v1, %v8768_v11 }
 0xa8d   : > { %v4959_v26 = vmul.f32 %v8778_v36, %v4939_v42 }
 0xa8f   : > { %4975 = vst [vmem:[%s8785_s13 + $0x78] sm:$0xff] %v4959_v26 }
 0xa90   : > { %6474 = shalt.err (!%p6471_p13)
}
 0xa91   : > { %s6571_s11 = smov 128   ;;  %s6572_s14 = smov 256  }
 0xa92   : > { %s6573_s18 = smov 8  }
 0xa93   : > { %5762 = dma.vmem_to_hbm [thread:$0]  (%p6724_p5), %s4994_s12, 2048, %s4996_s8, %s4977_s19, %s6571_s11, %s6572_s14, %s6573_s18  }
 0xa94 PF: > { %s9138_s16 = sld [smem:[#allocation16_spill]]  ;;  %p5794_p0 = scmp.ge.s32.totalorder %s6553_s28, 2 }
 0xa96   : > { %p5782_p3 = pnand %p5794_p0, %p6668_p6 }
 0xa98   : > { %p5783_p7 = pneg %p5782_p3 }
 0xa9a   : > { %s5010_s1 = sand.u32 1, %s9138_s16  }
 0xa9b   : > { %s5011_s17 = scalar_lea.sflag [#allocation4], %s5010_s1 }
 0xa9c   : > { %6520 = dma.done.wait (%p5783_p7), %s5011_s17, 2048  }
 0xa9d   : > { %6522 = vsyncadd (%p5783_p7), %s5011_s17, 4294965248  ;;  %s24_s28 = sadd.s32 1, %s6553_s28   ;;  %s9140_s15 = sld [smem:[#allocation18_spill]] }
 0xa9e   : > { %p21_p9 = scmp.ge.s32.totalorder %s24_s28, 6   ;;  %s9141_s20 = sld [smem:[#allocation20_spill]] }
 0xa9f   : > { %s9142_s21 = smov %s6529_s22  ;;  %s9143_s22 = smov %s6533_s23 }
 0xaa0   : > { %s9144_s23 = smov %s6737_s2  ;;  %s9145_s24 = smov %s6545_s26 }
 0xaa1   : > { %s9146_s25 = smov %s6549_s27  ;;  %23 = sbr.rel (!%p21_p9) target bundleno = 14 (0xe), region = 105 }
 0xaa3   : > { %s9147_s26 = smov %s9140_s15 }
 0xaa4   : > { %s9148_s27 = smov %s9141_s20 }
 0xaa6   :  { %5017 = vsyncpa [#allocation3], 1 }
 0xaa7   :  { %5019 = vsyncpa [#allocation3 + $0x1], 1 }
 0xaa8   :  { %5020 = vsyncpa [#allocation6], 1 }
 0xaa9   :  { %5021 = vsyncpa [#allocation9], 1 }
 0xaaa   :  { %5022 = vsyncpa [#allocation4], 1 }
 0xaab   :  { %5024 = vsyncpa [#allocation4 + $0x1], 1 }

</bundles_post_ra>
